<compile_context>
chip_gen: v5e
topology: v5e:2x2
jax: 0.10.0
libtpu: 0.0.40
codegen_flags: <defaults>
</compile_context>

<pallas_src>
import functools

import jax
import jax.numpy as jnp
from jax.experimental import pallas as pl
from jax.experimental.pallas import tpu as pltpu

LANE = 128      # vreg lane width   (last dim)
SUBLANE = 8     # vreg sublane width (second-to-last dim, f32)


def _round_up(n, m):
    return ((n + m - 1) // m) * m


# ------------------------------ fused kernel ---------------------------------

def _fused_lstm_head_kernel(
        x_ref, wih0_ref, wihr_ref, whh_ref, b_ref,
        gamma_ref, beta_ref, wd_ref, bd_ref, wf_ref, bf_ref,
        o_ref,
        act_scr, gx_scr, h_scr, c_scr,
        *, seq_len, hidden_real, time_chunk):
    """One grid step == one LSTM layer.  Padded shapes (per block):

      x_ref   : (T*Bp, Dx_p)    bf16  time-major, rows [t*Bp,(t+1)*Bp) = step t
      wih0_ref: (Dx_p, 4*Hp)    bf16  layer-0 input weights (gate-blocked)
      wihr_ref: (Hp,   4*Hp)    bf16  this layer's input weights (slot 0 dummy)
      whh_ref : (Hp,   4*Hp)    bf16  this layer's recurrent weights
      b_ref   : (1,    4*Hp)    f32   b_ih + b_hh, gate-blocked
      gamma/beta: (1,Hp) f32 ; wd:(Hp,Dh_p) bf16 ; bd:(1,Dh_p) f32
      wf:(Dh_p,Cp) bf16 ; bf:(1,Cp) f32 ; o_ref:(Bp,Cp) f32
      act_scr : (T*Bp, Hp)            bf16  previous layer's hidden sequence
      gx_scr  : (time_chunk*Bp, 4*Hp) f32   chunked input projection (+bias)
      h_scr / c_scr : (Bp, Hp)        f32   recurrent state
    """
    layer = pl.program_id(0)
    num_layers = pl.num_programs(0)
    batch_pad, hidden_pad = h_scr.shape

    # Fresh (h0, c0) = 0 for every layer.
    h_scr[...] = jnp.zeros_like(h_scr)
    c_scr[...] = jnp.zeros_like(c_scr)

    # Hoisted out of the per-timestep loop (review: avoid re-reading per step).
    bias = b_ref[...]                       # (1, 4*Hp) f32
    w_hh = whh_ref[...]                     # (Hp, 4*Hp) bf16

    # Time loop in chunks: the input projection for `time_chunk` steps is one
    # MXU matmul (M = time_chunk*Bp) into a small VMEM scratch; only h @ W_hh
    # remains inside the sequential recurrence.
    for t0 in range(0, seq_len, time_chunk):
        n_t = min(time_chunk, seq_len - t0)
        rows = n_t * batch_pad
        base = t0 * batch_pad

        @pl.when(layer == 0)
        def _():                            # layer 0 reads the raw input x
            gx_scr[pl.ds(0, rows), :] = (
                jnp.dot(x_ref[pl.ds(base, rows), :], wih0_ref[...],
                        preferred_element_type=jnp.float32) + bias)

        @pl.when(layer > 0)
        def _():                            # deeper layers read act_scr (bf16)
            gx_scr[pl.ds(0, rows), :] = (
                jnp.dot(act_scr[pl.ds(base, rows), :], wihr_ref[...],
                        preferred_element_type=jnp.float32) + bias)

        # Sequential recurrence over this chunk (static unroll; bounded by
        # time_chunk so vreg live ranges stay bounded).
        for tt in range(n_t):
            row = tt * batch_pad
            gates = gx_scr[pl.ds(row, batch_pad), :] + jnp.dot(
                h_scr[...].astype(jnp.bfloat16), w_hh,
                preferred_element_type=jnp.float32)          # (Bp, 4*Hp) f32
            # Gate slices are whole 128-lane tiles (gate-blocked layout).
            i_g = jax.nn.sigmoid(gates[:, 0 * hidden_pad:1 * hidden_pad])
            f_g = jax.nn.sigmoid(gates[:, 1 * hidden_pad:2 * hidden_pad])
            g_g = jnp.tanh(gates[:, 2 * hidden_pad:3 * hidden_pad])
            o_g = jax.nn.sigmoid(gates[:, 3 * hidden_pad:4 * hidden_pad])
            c_new = f_g * c_scr[...] + i_g * g_g
            h_new = o_g * jnp.tanh(c_new)
            c_scr[...] = c_new
            h_scr[...] = h_new
            # Feed the next layer (bf16 MXU operand).  Safe in-place: these
            # source rows were already consumed by this chunk's projection.
            act_scr[pl.ds(base + row, batch_pad), :] = h_new.astype(jnp.bfloat16)

    # ---- Head on h_T of the last layer (dropout = identity in eval mode).
    @pl.when(layer == num_layers - 1)
    def _():
        x = h_scr[...]                               # (Bp, Hp); padded cols are 0
        inv_h = 1.0 / float(hidden_real)
        mean = jnp.sum(x, axis=-1, keepdims=True) * inv_h
        ex2 = jnp.sum(x * x, axis=-1, keepdims=True) * inv_h
        var = ex2 - mean * mean                      # biased var, like nn.LayerNorm
        xn = (x - mean) * jax.lax.rsqrt(var + 1e-5)
        y = xn * gamma_ref[...] + beta_ref[...]      # padded gamma/beta = 0
        hd = jnp.dot(y.astype(jnp.bfloat16), wd_ref[...],
                     preferred_element_type=jnp.float32) + bd_ref[...]
        hd = jnp.maximum(hd, 0.0)                    # ReLU
        o_ref[...] = jnp.dot(hd.astype(jnp.bfloat16), wf_ref[...],
                             preferred_element_type=jnp.float32) + bf_ref[...]


# ------------------------------ pallas_call wrapper --------------------------

def _vmem_limit_bytes(*, rows, din_pad, hidden_pad, dhp, classes_pad,
                      batch_pad, time_chunk):
    gp = 4 * hidden_pad
    db = 2  # double-buffering factor for pipelined blocks
    n = 0
    n += db * rows * din_pad * 2                                  # x (bf16)
    n += db * din_pad * gp * 2                                    # wih0
    n += 2 * db * hidden_pad * gp * 2                             # wihr + whh blocks
    n += db * SUBLANE * gp * 4                                    # bias block
    n += db * 2 * SUBLANE * hidden_pad * 4                        # gamma, beta
    n += db * (hidden_pad * dhp * 2 + SUBLANE * dhp * 4)          # wd, bd
    n += db * (dhp * classes_pad * 2 + SUBLANE * classes_pad * 4)  # wf, bf
    n += db * batch_pad * classes_pad * 4                         # output
    n += rows * hidden_pad * 2                                    # act scratch
    n += time_chunk * batch_pad * gp * 4                          # gx chunk scratch
    n += 2 * batch_pad * hidden_pad * 4                           # h, c
    # 1.5x headroom for compiler temporaries; floor 32 MiB, cap 96 MiB.
    return int(min(max(1.5 * n + (1 << 20), 32 << 20), 96 << 20))


def _fused_forward_call(x_flat, packed, *, seq_len, batch_pad, hidden_size,
                        time_chunk):
    num_layers = packed["whh"].shape[0]
    hidden_pad = packed["whh"].shape[1]
    gate_pad = 4 * hidden_pad
    din_pad = packed["wih0"].shape[0]
    dhp = packed["wd"].shape[1]
    classes_pad = packed["wf"].shape[1]
    rows = seq_len * batch_pad

    kernel = functools.partial(
        _fused_lstm_head_kernel, seq_len=seq_len, hidden_real=hidden_size,
        time_chunk=time_chunk)

    grid_spec = pltpu.PrefetchScalarGridSpec(
        num_scalar_prefetch=0,
        grid=(num_layers,),
        in_specs=[
            # Constant block index => fetched once, stays VMEM-resident.
            pl.BlockSpec((rows, din_pad), lambda l: (0, 0)),            # x (bf16)
            pl.BlockSpec((din_pad, gate_pad), lambda l: (0, 0)),        # wih0
            # Per-layer blocks => auto double-buffered across the layer grid.
            pl.BlockSpec((None, hidden_pad, gate_pad), lambda l: (l, 0, 0)),  # wihr
            pl.BlockSpec((None, hidden_pad, gate_pad), lambda l: (l, 0, 0)),  # whh
            pl.BlockSpec((None, 1, gate_pad), lambda l: (l, 0, 0)),           # bias
            pl.BlockSpec((1, hidden_pad), lambda l: (0, 0)),            # gamma
            pl.BlockSpec((1, hidden_pad), lambda l: (0, 0)),            # beta
            pl.BlockSpec((hidden_pad, dhp), lambda l: (0, 0)),          # wd
            pl.BlockSpec((1, dhp), lambda l: (0, 0)),                   # bd
            pl.BlockSpec((dhp, classes_pad), lambda l: (0, 0)),         # wf
            pl.BlockSpec((1, classes_pad), lambda l: (0, 0)),           # bf
        ],
        out_specs=pl.BlockSpec((batch_pad, classes_pad), lambda l: (0, 0)),
        scratch_shapes=[
            pltpu.VMEM((rows, hidden_pad), jnp.bfloat16),                   # act
            pltpu.VMEM((time_chunk * batch_pad, gate_pad), jnp.float32),    # gx chunk
            pltpu.VMEM((batch_pad, hidden_pad), jnp.float32),               # h
            pltpu.VMEM((batch_pad, hidden_pad), jnp.float32),               # c
        ])

    vmem_limit = _vmem_limit_bytes(
        rows=rows, din_pad=din_pad, hidden_pad=hidden_pad, dhp=dhp,
        classes_pad=classes_pad, batch_pad=batch_pad, time_chunk=time_chunk)

    return pl.pallas_call(
        kernel,
        out_shape=jax.ShapeDtypeStruct((batch_pad, classes_pad), jnp.float32),
        grid_spec=grid_spec,
        compiler_params=pltpu.CompilerParams(
            dimension_semantics=("arbitrary",),   # layers are sequential
            vmem_limit_bytes=vmem_limit),
    )(x_flat, packed["wih0"], packed["wihr"], packed["whh"], packed["b"],
      packed["gamma"], packed["beta"], packed["wd"], packed["bd"],
      packed["wf"], packed["bf"])


# ------------------------------ params ----------------------------------------

def init_params(key, input_size, hidden_size, num_layers, num_classes):
    """Deterministic synthetic params, PyTorch-like uniform(-k, k) init."""
    params = {"lstm": []}
    k = 1.0 / jnp.sqrt(hidden_size)
    for layer in range(num_layers):
        d_in = input_size if layer == 0 else hidden_size
        key, k1, k2, k3, k4 = jax.random.split(key, 5)
        w_ih = jax.random.uniform(k1, (4 * hidden_size, d_in), jnp.float32, -k, k)
        w_hh = jax.random.uniform(k2, (4 * hidden_size, hidden_size), jnp.float32, -k, k)
        b_ih = jax.random.uniform(k3, (4 * hidden_size,), jnp.float32, -k, k)
        b_hh = jax.random.uniform(k4, (4 * hidden_size,), jnp.float32, -k, k)
        params["lstm"].append({
            "w_ih_t": w_ih.T,                                # (d_in, 4H)
            "w_hh_t": w_hh.T,                                # (H, 4H)
            "b": (b_ih + b_hh).reshape(1, 4 * hidden_size),  # (1, 4H)
        })
    params["ln_gamma"] = jnp.ones((1, hidden_size), jnp.float32)
    params["ln_beta"] = jnp.zeros((1, hidden_size), jnp.float32)

    d_half = hidden_size // 2
    key, k5, k6, k7, k8 = jax.random.split(key, 5)
    kd = 1.0 / jnp.sqrt(hidden_size)
    kf = 1.0 / jnp.sqrt(d_half)
    params["w_dense_t"] = jax.random.uniform(
        k5, (d_half, hidden_size), jnp.float32, -kd, kd).T    # (H, H/2)
    params["b_dense"] = jax.random.uniform(
        k6, (d_half,), jnp.float32, -kd, kd).reshape(1, d_half)
    params["w_fc_t"] = jax.random.uniform(
        k7, (num_classes, d_half), jnp.float32, -kf, kf).T    # (H/2, C)
    params["b_fc"] = jax.random.uniform(
        k8, (num_classes,), jnp.float32, -kf, kf).reshape(1, num_classes)
    return params


def _pad_gate_blocks(w, rows_pad, h, h_pad, dtype):
    """(rows, 4*h) -> (rows_pad, 4*h_pad); gate k -> cols [k*h_pad, k*h_pad+h)."""
    rows = w.shape[0]
    out = jnp.zeros((rows_pad, 4 * h_pad), dtype)
    for k in range(4):
        out = out.at[:rows, k * h_pad:k * h_pad + h].set(
            w[:, k * h:(k + 1) * h].astype(dtype))
    return out


def pack_params(params, *, input_size, hidden_size, num_classes):
    """Pad / cast PyTorch-layout params into TPU-tile-friendly kernel arrays."""
    H = hidden_size
    Hp = _round_up(H, LANE)
    Dx_p = _round_up(input_size, LANE)          # layer-0 K is NOT inflated to Hp
    Dh = hidden_size // 2
    Dhp = _round_up(Dh, LANE)
    Cp = _round_up(num_classes, LANE)

    # Layer-0 input weights live in their own array; layers>=1 are stacked with
    # a zero dummy in slot 0 so the layer-grid index_map is simply (l, 0, 0).
    wih0 = _pad_gate_blocks(params["lstm"][0]["w_ih_t"], Dx_p, H, Hp, jnp.bfloat16)
    wihr = [jnp.zeros((Hp, 4 * Hp), jnp.bfloat16)]
    whh, b = [], []
    for li, lp in enumerate(params["lstm"]):
        if li > 0:
            wihr.append(_pad_gate_blocks(lp["w_ih_t"], Hp, H, Hp, jnp.bfloat16))
        whh.append(_pad_gate_blocks(lp["w_hh_t"], Hp, H, Hp, jnp.bfloat16))
        b.append(_pad_gate_blocks(lp["b"], 1, H, Hp, jnp.float32))

    return {
        "wih0": wih0,                                    # (Dx_p, 4*Hp)      bf16
        "wihr": jnp.stack(wihr),                         # (L,  Hp, 4*Hp)    bf16
        "whh": jnp.stack(whh),                           # (L,  Hp, 4*Hp)    bf16
        "b": jnp.stack(b),                               # (L,  1,  4*Hp)    f32
        "gamma": jnp.zeros((1, Hp), jnp.float32).at[:, :H].set(params["ln_gamma"]),
        "beta": jnp.zeros((1, Hp), jnp.float32).at[:, :H].set(params["ln_beta"]),
        "wd": jnp.zeros((Hp, Dhp), jnp.bfloat16).at[:H, :Dh].set(
            params["w_dense_t"].astype(jnp.bfloat16)),
        "bd": jnp.zeros((1, Dhp), jnp.float32).at[:, :Dh].set(params["b_dense"]),
        "wf": jnp.zeros((Dhp, Cp), jnp.bfloat16).at[:Dh, :num_classes].set(
            params["w_fc_t"].astype(jnp.bfloat16)),
        "bf": jnp.zeros((1, Cp), jnp.float32).at[:, :num_classes].set(params["b_fc"]),
    }


# ------------------------------ forward ---------------------------------------

@functools.partial(jax.jit, static_argnames=("hidden_size", "num_classes"))
def lstm_forward(packed, x_btd, *, hidden_size, num_classes):
    """x_btd: (B, T, D) batch_first, like the PyTorch module."""
    B, T, D = x_btd.shape
    Bp = _round_up(B, SUBLANE)
    Dx_p = packed["wih0"].shape[0]
    time_chunk = min(T, 16)
    # batch_first -> time-major, pad batch -> Bp and features -> Dx_p, cast to
    # bf16 (MXU operand dtype) in the wrapper, flatten to (T*Bp, Dx_p).
    x = jnp.transpose(x_btd, (1, 0, 2)).astype(jnp.bfloat16)        # (T, B, D)
    x_pad = jnp.zeros((T, Bp, Dx_p), jnp.bfloat16).at[:, :B, :D].set(x)
    x_flat = x_pad.reshape(T * Bp, Dx_p)
    out_pad = _fused_forward_call(x_flat, packed, seq_len=T, batch_pad=Bp,
                                  hidden_size=hidden_size, time_chunk=time_chunk)
    return out_pad[:B, :num_classes]


if __name__ == "__main__":
    batch, seq, input_size = 2, 8, 16
    hidden_size, num_layers, num_classes = 32, 2, 4

    key = jax.random.PRNGKey(0)
    key, xkey, pkey = jax.random.split(key, 3)
    x = jax.random.normal(xkey, (batch, seq, input_size), jnp.float32)
    params = init_params(pkey, input_size, hidden_size, num_layers, num_classes)
    packed = pack_params(params, input_size=input_size,
                         hidden_size=hidden_size, num_classes=num_classes)

    out = lstm_forward(packed, x, hidden_size=hidden_size,
                       num_classes=num_classes)
    jax.block_until_ready(out)
    assert out.shape == (batch, num_classes), out.shape
    assert bool(jnp.all(jnp.isfinite(out)))
    print("KERNEL_OK")
</pallas_src>

<mosaic_0001>
module attributes {stable_mosaic.version = 11 : i64} {
  func.func @_fused_lstm_head_kernel(%arg0: i32, %arg1: memref<64x128xbf16, #tpu.memory_space<vmem>>, %arg2: memref<128x512xbf16, #tpu.memory_space<vmem>>, %arg3: memref<1x128x512xbf16, #tpu.memory_space<vmem>>, %arg4: memref<1x128x512xbf16, #tpu.memory_space<vmem>>, %arg5: memref<1x1x512xf32, #tpu.memory_space<vmem>>, %arg6: memref<1x128xf32, #tpu.memory_space<vmem>>, %arg7: memref<1x128xf32, #tpu.memory_space<vmem>>, %arg8: memref<128x128xbf16, #tpu.memory_space<vmem>>, %arg9: memref<1x128xf32, #tpu.memory_space<vmem>>, %arg10: memref<128x128xbf16, #tpu.memory_space<vmem>>, %arg11: memref<1x128xf32, #tpu.memory_space<vmem>>, %arg12: memref<8x128xf32, #tpu.memory_space<vmem>>, %arg13: memref<64x128xbf16, #tpu.memory_space<vmem>>, %arg14: memref<64x512xf32, #tpu.memory_space<vmem>>, %arg15: memref<8x128xf32, #tpu.memory_space<vmem>>, %arg16: memref<8x128xf32, #tpu.memory_space<vmem>>) attributes {dimension_semantics = [#tpu.dimension_semantics<arbitrary>], iteration_bounds = array<i64: 2>, scalar_prefetch = 0 : i64, scratch_operands = 4 : i64, tpu.core_type = #tpu.core_type<tc>, window_params = [{pipeline_mode = #tpu.pipeline_mode<synchronous>, transform_indices = @transform_0, window_bounds = array<i64: 64, 128>}, {pipeline_mode = #tpu.pipeline_mode<synchronous>, transform_indices = @transform_1, window_bounds = array<i64: 128, 512>}, {transform_indices = @transform_2, window_bounds = array<i64: 1, 128, 512>}, {transform_indices = @transform_3, window_bounds = array<i64: 1, 128, 512>}, {transform_indices = @transform_4, window_bounds = array<i64: 1, 1, 512>}, {pipeline_mode = #tpu.pipeline_mode<synchronous>, transform_indices = @transform_5, window_bounds = array<i64: 1, 128>}, {pipeline_mode = #tpu.pipeline_mode<synchronous>, transform_indices = @transform_6, window_bounds = array<i64: 1, 128>}, {pipeline_mode = #tpu.pipeline_mode<synchronous>, transform_indices = @transform_7, window_bounds = array<i64: 128, 128>}, {pipeline_mode = #tpu.pipeline_mode<synchronous>, transform_indices = @transform_8, window_bounds = array<i64: 1, 128>}, {pipeline_mode = #tpu.pipeline_mode<synchronous>, transform_indices = @transform_9, window_bounds = array<i64: 128, 128>}, {pipeline_mode = #tpu.pipeline_mode<synchronous>, transform_indices = @transform_10, window_bounds = array<i64: 1, 128>}, {pipeline_mode = #tpu.pipeline_mode<synchronous>, transform_indices = @transform_11, window_bounds = array<i64: 8, 128>}]} {
    %cst = arith.constant 0.000000e+00 : f32
    %0 = vector.broadcast %cst : f32 to vector<8x128xf32>
    %c0 = arith.constant 0 : index
    %c0_0 = arith.constant 0 : index
    %1 = vector.load %arg15[%c0, %c0_0] : memref<8x128xf32, #tpu.memory_space<vmem>>, vector<8x128xf32>
    tpu.vector_store %arg15[%c0, %c0_0], %0 {strides = array<i32>} : memref<8x128xf32, #tpu.memory_space<vmem>>, vector<8x128xf32>,
    %cst_1 = arith.constant 0.000000e+00 : f32
    %2 = vector.broadcast %cst_1 : f32 to vector<8x128xf32>
    %c0_2 = arith.constant 0 : index
    %c0_3 = arith.constant 0 : index
    %3 = vector.load %arg16[%c0_2, %c0_3] : memref<8x128xf32, #tpu.memory_space<vmem>>, vector<8x128xf32>
    tpu.vector_store %arg16[%c0_2, %c0_3], %2 {strides = array<i32>} : memref<8x128xf32, #tpu.memory_space<vmem>>, vector<8x128xf32>,
    %c0_4 = arith.constant 0 : index
    %c0_5 = arith.constant 0 : index
    %c0_6 = arith.constant 0 : index
    %4 = vector.load %arg5[%c0_4, %c0_5, %c0_6] : memref<1x1x512xf32, #tpu.memory_space<vmem>>, vector<1x1x512xf32>
    %5 = vector.shape_cast %4 : vector<1x1x512xf32> to vector<1x512xf32>
    %c0_7 = arith.constant 0 : index
    %c0_8 = arith.constant 0 : index
    %c0_9 = arith.constant 0 : index
    %6 = vector.load %arg4[%c0_7, %c0_8, %c0_9] : memref<1x128x512xbf16, #tpu.memory_space<vmem>>, vector<1x128x512xbf16>
    %7 = vector.shape_cast %6 : vector<1x128x512xbf16> to vector<128x512xbf16>
    %c0_i32 = arith.constant 0 : i32
    %8 = arith.cmpi eq, %arg0, %c0_i32 : i32
    %9 = arith.extui %8 : i1 to i32
    %c0_i32_10 = arith.constant 0 : i32
    %10 = arith.cmpi ne, %9, %c0_i32_10 : i32
    scf.if %10 {
      %c0_135 = arith.constant 0 : index
      %c0_136 = arith.constant 0 : index
      %297 = vector.load %arg1[%c0_135, %c0_136] : memref<64x128xbf16, #tpu.memory_space<vmem>>, vector<64x128xbf16>
      %c0_137 = arith.constant 0 : index
      %c0_138 = arith.constant 0 : index
      %298 = vector.load %arg2[%c0_137, %c0_138] : memref<128x512xbf16, #tpu.memory_space<vmem>>, vector<128x512xbf16>
      %cst_139 = arith.constant dense<0.000000e+00> : vector<64x512xf32>
      %299 = tpu.matmul %297, %298, %cst_139 {dimension_numbers = #tpu.dot_dimension_numbers<[1], [0], [0], [1], [0, 0, 1, 1], [], []>} : vector<64x128xbf16>, vector<128x512xbf16>, vector<64x512xf32> -> vector<64x512xf32>
      %300 = vector.broadcast %5 : vector<1x512xf32> to vector<64x512xf32>
      %301 = arith.addf %299, %300 : vector<64x512xf32>
      %c0_140 = arith.constant 0 : index
      %c0_141 = arith.constant 0 : index
      %302 = vector.load %arg14[%c0_140, %c0_141] : memref<64x512xf32, #tpu.memory_space<vmem>>, vector<64x512xf32>
      tpu.vector_store %arg14[%c0_140, %c0_141], %301 {strides = array<i32>} : memref<64x512xf32, #tpu.memory_space<vmem>>, vector<64x512xf32>,
    } else {
    }
    %c0_i32_11 = arith.constant 0 : i32
    %11 = arith.cmpi sgt, %arg0, %c0_i32_11 : i32
    %12 = arith.extui %11 : i1 to i32
    %c0_i32_12 = arith.constant 0 : i32
    %13 = arith.cmpi ne, %12, %c0_i32_12 : i32
    scf.if %13 {
      %c0_135 = arith.constant 0 : index
      %c0_136 = arith.constant 0 : index
      %297 = vector.load %arg13[%c0_135, %c0_136] : memref<64x128xbf16, #tpu.memory_space<vmem>>, vector<64x128xbf16>
      %c0_137 = arith.constant 0 : index
      %c0_138 = arith.constant 0 : index
      %c0_139 = arith.constant 0 : index
      %298 = vector.load %arg3[%c0_137, %c0_138, %c0_139] : memref<1x128x512xbf16, #tpu.memory_space<vmem>>, vector<1x128x512xbf16>
      %299 = vector.shape_cast %298 : vector<1x128x512xbf16> to vector<128x512xbf16>
      %cst_140 = arith.constant dense<0.000000e+00> : vector<64x512xf32>
      %300 = tpu.matmul %297, %299, %cst_140 {dimension_numbers = #tpu.dot_dimension_numbers<[1], [0], [0], [1], [0, 0, 1, 1], [], []>} : vector<64x128xbf16>, vector<128x512xbf16>, vector<64x512xf32> -> vector<64x512xf32>
      %301 = vector.broadcast %5 : vector<1x512xf32> to vector<64x512xf32>
      %302 = arith.addf %300, %301 : vector<64x512xf32>
      %c0_141 = arith.constant 0 : index
      %c0_142 = arith.constant 0 : index
      %303 = vector.load %arg14[%c0_141, %c0_142] : memref<64x512xf32, #tpu.memory_space<vmem>>, vector<64x512xf32>
      tpu.vector_store %arg14[%c0_141, %c0_142], %302 {strides = array<i32>} : memref<64x512xf32, #tpu.memory_space<vmem>>, vector<64x512xf32>,
    } else {
    }
    %c0_13 = arith.constant 0 : index
    %c0_14 = arith.constant 0 : index
    %14 = vector.load %arg14[%c0_13, %c0_14] : memref<64x512xf32, #tpu.memory_space<vmem>>, vector<8x512xf32>
    %c0_15 = arith.constant 0 : index
    %c0_16 = arith.constant 0 : index
    %15 = vector.load %arg15[%c0_15, %c0_16] : memref<8x128xf32, #tpu.memory_space<vmem>>, vector<8x128xf32>
    %16 = arith.truncf %15 : vector<8x128xf32> to vector<8x128xbf16>
    %cst_17 = arith.constant dense<0.000000e+00> : vector<8x512xf32>
    %17 = tpu.matmul %16, %7, %cst_17 {dimension_numbers = #tpu.dot_dimension_numbers<[1], [0], [0], [1], [0, 0, 1, 1], [], []>} : vector<8x128xbf16>, vector<128x512xbf16>, vector<8x512xf32> -> vector<8x512xf32>
    %18 = arith.addf %14, %17 : vector<8x512xf32>
    %19 = vector.extract_strided_slice %18 {offsets = [0, 0], sizes = [8, 128], strides = [1, 1]} : vector<8x512xf32> to vector<8x128xf32>
    %20 = arith.negf %19 : vector<8x128xf32>
    %21 = math.exp %20 : vector<8x128xf32>
    %cst_18 = arith.constant 1.000000e+00 : f32
    %22 = vector.broadcast %cst_18 : f32 to vector<8x128xf32>
    %23 = arith.addf %22, %21 : vector<8x128xf32>
    %24 = arith.divf %22, %23 : vector<8x128xf32>
    %25 = vector.extract_strided_slice %18 {offsets = [0, 128], sizes = [8, 128], strides = [1, 1]} : vector<8x512xf32> to vector<8x128xf32>
    %26 = arith.negf %25 : vector<8x128xf32>
    %27 = math.exp %26 : vector<8x128xf32>
    %cst_19 = arith.constant 1.000000e+00 : f32
    %28 = vector.broadcast %cst_19 : f32 to vector<8x128xf32>
    %29 = arith.addf %28, %27 : vector<8x128xf32>
    %30 = arith.divf %28, %29 : vector<8x128xf32>
    %31 = vector.extract_strided_slice %18 {offsets = [0, 256], sizes = [8, 128], strides = [1, 1]} : vector<8x512xf32> to vector<8x128xf32>
    %32 = math.tanh %31 : vector<8x128xf32>
    %33 = vector.extract_strided_slice %18 {offsets = [0, 384], sizes = [8, 128], strides = [1, 1]} : vector<8x512xf32> to vector<8x128xf32>
    %34 = arith.negf %33 : vector<8x128xf32>
    %35 = math.exp %34 : vector<8x128xf32>
    %cst_20 = arith.constant 1.000000e+00 : f32
    %36 = vector.broadcast %cst_20 : f32 to vector<8x128xf32>
    %37 = arith.addf %36, %35 : vector<8x128xf32>
    %38 = arith.divf %36, %37 : vector<8x128xf32>
    %c0_21 = arith.constant 0 : index
    %c0_22 = arith.constant 0 : index
    %39 = vector.load %arg16[%c0_21, %c0_22] : memref<8x128xf32, #tpu.memory_space<vmem>>, vector<8x128xf32>
    %40 = arith.mulf %30, %39 : vector<8x128xf32>
    %41 = arith.mulf %24, %32 : vector<8x128xf32>
    %42 = arith.addf %40, %41 : vector<8x128xf32>
    %43 = math.tanh %42 : vector<8x128xf32>
    %44 = arith.mulf %38, %43 : vector<8x128xf32>
    %c0_23 = arith.constant 0 : index
    %c0_24 = arith.constant 0 : index
    %45 = vector.load %arg16[%c0_23, %c0_24] : memref<8x128xf32, #tpu.memory_space<vmem>>, vector<8x128xf32>
    tpu.vector_store %arg16[%c0_23, %c0_24], %42 {strides = array<i32>} : memref<8x128xf32, #tpu.memory_space<vmem>>, vector<8x128xf32>,
    %c0_25 = arith.constant 0 : index
    %c0_26 = arith.constant 0 : index
    %46 = vector.load %arg15[%c0_25, %c0_26] : memref<8x128xf32, #tpu.memory_space<vmem>>, vector<8x128xf32>
    tpu.vector_store %arg15[%c0_25, %c0_26], %44 {strides = array<i32>} : memref<8x128xf32, #tpu.memory_space<vmem>>, vector<8x128xf32>,
    %47 = arith.truncf %44 : vector<8x128xf32> to vector<8x128xbf16>
    %c0_27 = arith.constant 0 : index
    %c0_28 = arith.constant 0 : index
    %48 = vector.load %arg13[%c0_27, %c0_28] : memref<64x128xbf16, #tpu.memory_space<vmem>>, vector<8x128xbf16>
    tpu.vector_store %arg13[%c0_27, %c0_28], %47 {strides = array<i32>} : memref<64x128xbf16, #tpu.memory_space<vmem>>, vector<8x128xbf16>,
    %c8 = arith.constant 8 : index
    %c0_29 = arith.constant 0 : index
    %49 = vector.load %arg14[%c8, %c0_29] : memref<64x512xf32, #tpu.memory_space<vmem>>, vector<8x512xf32>
    %c0_30 = arith.constant 0 : index
    %c0_31 = arith.constant 0 : index
    %50 = vector.load %arg15[%c0_30, %c0_31] : memref<8x128xf32, #tpu.memory_space<vmem>>, vector<8x128xf32>
    %51 = arith.truncf %50 : vector<8x128xf32> to vector<8x128xbf16>
    %cst_32 = arith.constant dense<0.000000e+00> : vector<8x512xf32>
    %52 = tpu.matmul %51, %7, %cst_32 {dimension_numbers = #tpu.dot_dimension_numbers<[1], [0], [0], [1], [0, 0, 1, 1], [], []>} : vector<8x128xbf16>, vector<128x512xbf16>, vector<8x512xf32> -> vector<8x512xf32>
    %53 = arith.addf %49, %52 : vector<8x512xf32>
    %54 = vector.extract_strided_slice %53 {offsets = [0, 0], sizes = [8, 128], strides = [1, 1]} : vector<8x512xf32> to vector<8x128xf32>
    %55 = arith.negf %54 : vector<8x128xf32>
    %56 = math.exp %55 : vector<8x128xf32>
    %cst_33 = arith.constant 1.000000e+00 : f32
    %57 = vector.broadcast %cst_33 : f32 to vector<8x128xf32>
    %58 = arith.addf %57, %56 : vector<8x128xf32>
    %59 = arith.divf %57, %58 : vector<8x128xf32>
    %60 = vector.extract_strided_slice %53 {offsets = [0, 128], sizes = [8, 128], strides = [1, 1]} : vector<8x512xf32> to vector<8x128xf32>
    %61 = arith.negf %60 : vector<8x128xf32>
    %62 = math.exp %61 : vector<8x128xf32>
    %cst_34 = arith.constant 1.000000e+00 : f32
    %63 = vector.broadcast %cst_34 : f32 to vector<8x128xf32>
    %64 = arith.addf %63, %62 : vector<8x128xf32>
    %65 = arith.divf %63, %64 : vector<8x128xf32>
    %66 = vector.extract_strided_slice %53 {offsets = [0, 256], sizes = [8, 128], strides = [1, 1]} : vector<8x512xf32> to vector<8x128xf32>
    %67 = math.tanh %66 : vector<8x128xf32>
    %68 = vector.extract_strided_slice %53 {offsets = [0, 384], sizes = [8, 128], strides = [1, 1]} : vector<8x512xf32> to vector<8x128xf32>
    %69 = arith.negf %68 : vector<8x128xf32>
    %70 = math.exp %69 : vector<8x128xf32>
    %cst_35 = arith.constant 1.000000e+00 : f32
    %71 = vector.broadcast %cst_35 : f32 to vector<8x128xf32>
    %72 = arith.addf %71, %70 : vector<8x128xf32>
    %73 = arith.divf %71, %72 : vector<8x128xf32>
    %c0_36 = arith.constant 0 : index
    %c0_37 = arith.constant 0 : index
    %74 = vector.load %arg16[%c0_36, %c0_37] : memref<8x128xf32, #tpu.memory_space<vmem>>, vector<8x128xf32>
    %75 = arith.mulf %65, %74 : vector<8x128xf32>
    %76 = arith.mulf %59, %67 : vector<8x128xf32>
    %77 = arith.addf %75, %76 : vector<8x128xf32>
    %78 = math.tanh %77 : vector<8x128xf32>
    %79 = arith.mulf %73, %78 : vector<8x128xf32>
    %c0_38 = arith.constant 0 : index
    %c0_39 = arith.constant 0 : index
    %80 = vector.load %arg16[%c0_38, %c0_39] : memref<8x128xf32, #tpu.memory_space<vmem>>, vector<8x128xf32>
    tpu.vector_store %arg16[%c0_38, %c0_39], %77 {strides = array<i32>} : memref<8x128xf32, #tpu.memory_space<vmem>>, vector<8x128xf32>,
    %c0_40 = arith.constant 0 : index
    %c0_41 = arith.constant 0 : index
    %81 = vector.load %arg15[%c0_40, %c0_41] : memref<8x128xf32, #tpu.memory_space<vmem>>, vector<8x128xf32>
    tpu.vector_store %arg15[%c0_40, %c0_41], %79 {strides = array<i32>} : memref<8x128xf32, #tpu.memory_space<vmem>>, vector<8x128xf32>,
    %82 = arith.truncf %79 : vector<8x128xf32> to vector<8x128xbf16>
    %c8_42 = arith.constant 8 : index
    %c0_43 = arith.constant 0 : index
    %83 = vector.load %arg13[%c8_42, %c0_43] : memref<64x128xbf16, #tpu.memory_space<vmem>>, vector<8x128xbf16>
    tpu.vector_store %arg13[%c8_42, %c0_43], %82 {strides = array<i32>} : memref<64x128xbf16, #tpu.memory_space<vmem>>, vector<8x128xbf16>,
    %c16 = arith.constant 16 : index
    %c0_44 = arith.constant 0 : index
    %84 = vector.load %arg14[%c16, %c0_44] : memref<64x512xf32, #tpu.memory_space<vmem>>, vector<8x512xf32>
    %c0_45 = arith.constant 0 : index
    %c0_46 = arith.constant 0 : index
    %85 = vector.load %arg15[%c0_45, %c0_46] : memref<8x128xf32, #tpu.memory_space<vmem>>, vector<8x128xf32>
    %86 = arith.truncf %85 : vector<8x128xf32> to vector<8x128xbf16>
    %cst_47 = arith.constant dense<0.000000e+00> : vector<8x512xf32>
    %87 = tpu.matmul %86, %7, %cst_47 {dimension_numbers = #tpu.dot_dimension_numbers<[1], [0], [0], [1], [0, 0, 1, 1], [], []>} : vector<8x128xbf16>, vector<128x512xbf16>, vector<8x512xf32> -> vector<8x512xf32>
    %88 = arith.addf %84, %87 : vector<8x512xf32>
    %89 = vector.extract_strided_slice %88 {offsets = [0, 0], sizes = [8, 128], strides = [1, 1]} : vector<8x512xf32> to vector<8x128xf32>
    %90 = arith.negf %89 : vector<8x128xf32>
    %91 = math.exp %90 : vector<8x128xf32>
    %cst_48 = arith.constant 1.000000e+00 : f32
    %92 = vector.broadcast %cst_48 : f32 to vector<8x128xf32>
    %93 = arith.addf %92, %91 : vector<8x128xf32>
    %94 = arith.divf %92, %93 : vector<8x128xf32>
    %95 = vector.extract_strided_slice %88 {offsets = [0, 128], sizes = [8, 128], strides = [1, 1]} : vector<8x512xf32> to vector<8x128xf32>
    %96 = arith.negf %95 : vector<8x128xf32>
    %97 = math.exp %96 : vector<8x128xf32>
    %cst_49 = arith.constant 1.000000e+00 : f32
    %98 = vector.broadcast %cst_49 : f32 to vector<8x128xf32>
    %99 = arith.addf %98, %97 : vector<8x128xf32>
    %100 = arith.divf %98, %99 : vector<8x128xf32>
    %101 = vector.extract_strided_slice %88 {offsets = [0, 256], sizes = [8, 128], strides = [1, 1]} : vector<8x512xf32> to vector<8x128xf32>
    %102 = math.tanh %101 : vector<8x128xf32>
    %103 = vector.extract_strided_slice %88 {offsets = [0, 384], sizes = [8, 128], strides = [1, 1]} : vector<8x512xf32> to vector<8x128xf32>
    %104 = arith.negf %103 : vector<8x128xf32>
    %105 = math.exp %104 : vector<8x128xf32>
    %cst_50 = arith.constant 1.000000e+00 : f32
    %106 = vector.broadcast %cst_50 : f32 to vector<8x128xf32>
    %107 = arith.addf %106, %105 : vector<8x128xf32>
    %108 = arith.divf %106, %107 : vector<8x128xf32>
    %c0_51 = arith.constant 0 : index
    %c0_52 = arith.constant 0 : index
    %109 = vector.load %arg16[%c0_51, %c0_52] : memref<8x128xf32, #tpu.memory_space<vmem>>, vector<8x128xf32>
    %110 = arith.mulf %100, %109 : vector<8x128xf32>
    %111 = arith.mulf %94, %102 : vector<8x128xf32>
    %112 = arith.addf %110, %111 : vector<8x128xf32>
    %113 = math.tanh %112 : vector<8x128xf32>
    %114 = arith.mulf %108, %113 : vector<8x128xf32>
    %c0_53 = arith.constant 0 : index
    %c0_54 = arith.constant 0 : index
    %115 = vector.load %arg16[%c0_53, %c0_54] : memref<8x128xf32, #tpu.memory_space<vmem>>, vector<8x128xf32>
    tpu.vector_store %arg16[%c0_53, %c0_54], %112 {strides = array<i32>} : memref<8x128xf32, #tpu.memory_space<vmem>>, vector<8x128xf32>,
    %c0_55 = arith.constant 0 : index
    %c0_56 = arith.constant 0 : index
    %116 = vector.load %arg15[%c0_55, %c0_56] : memref<8x128xf32, #tpu.memory_space<vmem>>, vector<8x128xf32>
    tpu.vector_store %arg15[%c0_55, %c0_56], %114 {strides = array<i32>} : memref<8x128xf32, #tpu.memory_space<vmem>>, vector<8x128xf32>,
    %117 = arith.truncf %114 : vector<8x128xf32> to vector<8x128xbf16>
    %c16_57 = arith.constant 16 : index
    %c0_58 = arith.constant 0 : index
    %118 = vector.load %arg13[%c16_57, %c0_58] : memref<64x128xbf16, #tpu.memory_space<vmem>>, vector<8x128xbf16>
    tpu.vector_store %arg13[%c16_57, %c0_58], %117 {strides = array<i32>} : memref<64x128xbf16, #tpu.memory_space<vmem>>, vector<8x128xbf16>,
    %c24 = arith.constant 24 : index
    %c0_59 = arith.constant 0 : index
    %119 = vector.load %arg14[%c24, %c0_59] : memref<64x512xf32, #tpu.memory_space<vmem>>, vector<8x512xf32>
    %c0_60 = arith.constant 0 : index
    %c0_61 = arith.constant 0 : index
    %120 = vector.load %arg15[%c0_60, %c0_61] : memref<8x128xf32, #tpu.memory_space<vmem>>, vector<8x128xf32>
    %121 = arith.truncf %120 : vector<8x128xf32> to vector<8x128xbf16>
    %cst_62 = arith.constant dense<0.000000e+00> : vector<8x512xf32>
    %122 = tpu.matmul %121, %7, %cst_62 {dimension_numbers = #tpu.dot_dimension_numbers<[1], [0], [0], [1], [0, 0, 1, 1], [], []>} : vector<8x128xbf16>, vector<128x512xbf16>, vector<8x512xf32> -> vector<8x512xf32>
    %123 = arith.addf %119, %122 : vector<8x512xf32>
    %124 = vector.extract_strided_slice %123 {offsets = [0, 0], sizes = [8, 128], strides = [1, 1]} : vector<8x512xf32> to vector<8x128xf32>
    %125 = arith.negf %124 : vector<8x128xf32>
    %126 = math.exp %125 : vector<8x128xf32>
    %cst_63 = arith.constant 1.000000e+00 : f32
    %127 = vector.broadcast %cst_63 : f32 to vector<8x128xf32>
    %128 = arith.addf %127, %126 : vector<8x128xf32>
    %129 = arith.divf %127, %128 : vector<8x128xf32>
    %130 = vector.extract_strided_slice %123 {offsets = [0, 128], sizes = [8, 128], strides = [1, 1]} : vector<8x512xf32> to vector<8x128xf32>
    %131 = arith.negf %130 : vector<8x128xf32>
    %132 = math.exp %131 : vector<8x128xf32>
    %cst_64 = arith.constant 1.000000e+00 : f32
    %133 = vector.broadcast %cst_64 : f32 to vector<8x128xf32>
    %134 = arith.addf %133, %132 : vector<8x128xf32>
    %135 = arith.divf %133, %134 : vector<8x128xf32>
    %136 = vector.extract_strided_slice %123 {offsets = [0, 256], sizes = [8, 128], strides = [1, 1]} : vector<8x512xf32> to vector<8x128xf32>
    %137 = math.tanh %136 : vector<8x128xf32>
    %138 = vector.extract_strided_slice %123 {offsets = [0, 384], sizes = [8, 128], strides = [1, 1]} : vector<8x512xf32> to vector<8x128xf32>
    %139 = arith.negf %138 : vector<8x128xf32>
    %140 = math.exp %139 : vector<8x128xf32>
    %cst_65 = arith.constant 1.000000e+00 : f32
    %141 = vector.broadcast %cst_65 : f32 to vector<8x128xf32>
    %142 = arith.addf %141, %140 : vector<8x128xf32>
    %143 = arith.divf %141, %142 : vector<8x128xf32>
    %c0_66 = arith.constant 0 : index
    %c0_67 = arith.constant 0 : index
    %144 = vector.load %arg16[%c0_66, %c0_67] : memref<8x128xf32, #tpu.memory_space<vmem>>, vector<8x128xf32>
    %145 = arith.mulf %135, %144 : vector<8x128xf32>
    %146 = arith.mulf %129, %137 : vector<8x128xf32>
    %147 = arith.addf %145, %146 : vector<8x128xf32>
    %148 = math.tanh %147 : vector<8x128xf32>
    %149 = arith.mulf %143, %148 : vector<8x128xf32>
    %c0_68 = arith.constant 0 : index
    %c0_69 = arith.constant 0 : index
    %150 = vector.load %arg16[%c0_68, %c0_69] : memref<8x128xf32, #tpu.memory_space<vmem>>, vector<8x128xf32>
    tpu.vector_store %arg16[%c0_68, %c0_69], %147 {strides = array<i32>} : memref<8x128xf32, #tpu.memory_space<vmem>>, vector<8x128xf32>,
    %c0_70 = arith.constant 0 : index
    %c0_71 = arith.constant 0 : index
    %151 = vector.load %arg15[%c0_70, %c0_71] : memref<8x128xf32, #tpu.memory_space<vmem>>, vector<8x128xf32>
    tpu.vector_store %arg15[%c0_70, %c0_71], %149 {strides = array<i32>} : memref<8x128xf32, #tpu.memory_space<vmem>>, vector<8x128xf32>,
    %152 = arith.truncf %149 : vector<8x128xf32> to vector<8x128xbf16>
    %c24_72 = arith.constant 24 : index
    %c0_73 = arith.constant 0 : index
    %153 = vector.load %arg13[%c24_72, %c0_73] : memref<64x128xbf16, #tpu.memory_space<vmem>>, vector<8x128xbf16>
    tpu.vector_store %arg13[%c24_72, %c0_73], %152 {strides = array<i32>} : memref<64x128xbf16, #tpu.memory_space<vmem>>, vector<8x128xbf16>,
    %c32 = arith.constant 32 : index
    %c0_74 = arith.constant 0 : index
    %154 = vector.load %arg14[%c32, %c0_74] : memref<64x512xf32, #tpu.memory_space<vmem>>, vector<8x512xf32>
    %c0_75 = arith.constant 0 : index
    %c0_76 = arith.constant 0 : index
    %155 = vector.load %arg15[%c0_75, %c0_76] : memref<8x128xf32, #tpu.memory_space<vmem>>, vector<8x128xf32>
    %156 = arith.truncf %155 : vector<8x128xf32> to vector<8x128xbf16>
    %cst_77 = arith.constant dense<0.000000e+00> : vector<8x512xf32>
    %157 = tpu.matmul %156, %7, %cst_77 {dimension_numbers = #tpu.dot_dimension_numbers<[1], [0], [0], [1], [0, 0, 1, 1], [], []>} : vector<8x128xbf16>, vector<128x512xbf16>, vector<8x512xf32> -> vector<8x512xf32>
    %158 = arith.addf %154, %157 : vector<8x512xf32>
    %159 = vector.extract_strided_slice %158 {offsets = [0, 0], sizes = [8, 128], strides = [1, 1]} : vector<8x512xf32> to vector<8x128xf32>
    %160 = arith.negf %159 : vector<8x128xf32>
    %161 = math.exp %160 : vector<8x128xf32>
    %cst_78 = arith.constant 1.000000e+00 : f32
    %162 = vector.broadcast %cst_78 : f32 to vector<8x128xf32>
    %163 = arith.addf %162, %161 : vector<8x128xf32>
    %164 = arith.divf %162, %163 : vector<8x128xf32>
    %165 = vector.extract_strided_slice %158 {offsets = [0, 128], sizes = [8, 128], strides = [1, 1]} : vector<8x512xf32> to vector<8x128xf32>
    %166 = arith.negf %165 : vector<8x128xf32>
    %167 = math.exp %166 : vector<8x128xf32>
    %cst_79 = arith.constant 1.000000e+00 : f32
    %168 = vector.broadcast %cst_79 : f32 to vector<8x128xf32>
    %169 = arith.addf %168, %167 : vector<8x128xf32>
    %170 = arith.divf %168, %169 : vector<8x128xf32>
    %171 = vector.extract_strided_slice %158 {offsets = [0, 256], sizes = [8, 128], strides = [1, 1]} : vector<8x512xf32> to vector<8x128xf32>
    %172 = math.tanh %171 : vector<8x128xf32>
    %173 = vector.extract_strided_slice %158 {offsets = [0, 384], sizes = [8, 128], strides = [1, 1]} : vector<8x512xf32> to vector<8x128xf32>
    %174 = arith.negf %173 : vector<8x128xf32>
    %175 = math.exp %174 : vector<8x128xf32>
    %cst_80 = arith.constant 1.000000e+00 : f32
    %176 = vector.broadcast %cst_80 : f32 to vector<8x128xf32>
    %177 = arith.addf %176, %175 : vector<8x128xf32>
    %178 = arith.divf %176, %177 : vector<8x128xf32>
    %c0_81 = arith.constant 0 : index
    %c0_82 = arith.constant 0 : index
    %179 = vector.load %arg16[%c0_81, %c0_82] : memref<8x128xf32, #tpu.memory_space<vmem>>, vector<8x128xf32>
    %180 = arith.mulf %170, %179 : vector<8x128xf32>
    %181 = arith.mulf %164, %172 : vector<8x128xf32>
    %182 = arith.addf %180, %181 : vector<8x128xf32>
    %183 = math.tanh %182 : vector<8x128xf32>
    %184 = arith.mulf %178, %183 : vector<8x128xf32>
    %c0_83 = arith.constant 0 : index
    %c0_84 = arith.constant 0 : index
    %185 = vector.load %arg16[%c0_83, %c0_84] : memref<8x128xf32, #tpu.memory_space<vmem>>, vector<8x128xf32>
    tpu.vector_store %arg16[%c0_83, %c0_84], %182 {strides = array<i32>} : memref<8x128xf32, #tpu.memory_space<vmem>>, vector<8x128xf32>,
    %c0_85 = arith.constant 0 : index
    %c0_86 = arith.constant 0 : index
    %186 = vector.load %arg15[%c0_85, %c0_86] : memref<8x128xf32, #tpu.memory_space<vmem>>, vector<8x128xf32>
    tpu.vector_store %arg15[%c0_85, %c0_86], %184 {strides = array<i32>} : memref<8x128xf32, #tpu.memory_space<vmem>>, vector<8x128xf32>,
    %187 = arith.truncf %184 : vector<8x128xf32> to vector<8x128xbf16>
    %c32_87 = arith.constant 32 : index
    %c0_88 = arith.constant 0 : index
    %188 = vector.load %arg13[%c32_87, %c0_88] : memref<64x128xbf16, #tpu.memory_space<vmem>>, vector<8x128xbf16>
    tpu.vector_store %arg13[%c32_87, %c0_88], %187 {strides = array<i32>} : memref<64x128xbf16, #tpu.memory_space<vmem>>, vector<8x128xbf16>,
    %c40 = arith.constant 40 : index
    %c0_89 = arith.constant 0 : index
    %189 = vector.load %arg14[%c40, %c0_89] : memref<64x512xf32, #tpu.memory_space<vmem>>, vector<8x512xf32>
    %c0_90 = arith.constant 0 : index
    %c0_91 = arith.constant 0 : index
    %190 = vector.load %arg15[%c0_90, %c0_91] : memref<8x128xf32, #tpu.memory_space<vmem>>, vector<8x128xf32>
    %191 = arith.truncf %190 : vector<8x128xf32> to vector<8x128xbf16>
    %cst_92 = arith.constant dense<0.000000e+00> : vector<8x512xf32>
    %192 = tpu.matmul %191, %7, %cst_92 {dimension_numbers = #tpu.dot_dimension_numbers<[1], [0], [0], [1], [0, 0, 1, 1], [], []>} : vector<8x128xbf16>, vector<128x512xbf16>, vector<8x512xf32> -> vector<8x512xf32>
    %193 = arith.addf %189, %192 : vector<8x512xf32>
    %194 = vector.extract_strided_slice %193 {offsets = [0, 0], sizes = [8, 128], strides = [1, 1]} : vector<8x512xf32> to vector<8x128xf32>
    %195 = arith.negf %194 : vector<8x128xf32>
    %196 = math.exp %195 : vector<8x128xf32>
    %cst_93 = arith.constant 1.000000e+00 : f32
    %197 = vector.broadcast %cst_93 : f32 to vector<8x128xf32>
    %198 = arith.addf %197, %196 : vector<8x128xf32>
    %199 = arith.divf %197, %198 : vector<8x128xf32>
    %200 = vector.extract_strided_slice %193 {offsets = [0, 128], sizes = [8, 128], strides = [1, 1]} : vector<8x512xf32> to vector<8x128xf32>
    %201 = arith.negf %200 : vector<8x128xf32>
    %202 = math.exp %201 : vector<8x128xf32>
    %cst_94 = arith.constant 1.000000e+00 : f32
    %203 = vector.broadcast %cst_94 : f32 to vector<8x128xf32>
    %204 = arith.addf %203, %202 : vector<8x128xf32>
    %205 = arith.divf %203, %204 : vector<8x128xf32>
    %206 = vector.extract_strided_slice %193 {offsets = [0, 256], sizes = [8, 128], strides = [1, 1]} : vector<8x512xf32> to vector<8x128xf32>
    %207 = math.tanh %206 : vector<8x128xf32>
    %208 = vector.extract_strided_slice %193 {offsets = [0, 384], sizes = [8, 128], strides = [1, 1]} : vector<8x512xf32> to vector<8x128xf32>
    %209 = arith.negf %208 : vector<8x128xf32>
    %210 = math.exp %209 : vector<8x128xf32>
    %cst_95 = arith.constant 1.000000e+00 : f32
    %211 = vector.broadcast %cst_95 : f32 to vector<8x128xf32>
    %212 = arith.addf %211, %210 : vector<8x128xf32>
    %213 = arith.divf %211, %212 : vector<8x128xf32>
    %c0_96 = arith.constant 0 : index
    %c0_97 = arith.constant 0 : index
    %214 = vector.load %arg16[%c0_96, %c0_97] : memref<8x128xf32, #tpu.memory_space<vmem>>, vector<8x128xf32>
    %215 = arith.mulf %205, %214 : vector<8x128xf32>
    %216 = arith.mulf %199, %207 : vector<8x128xf32>
    %217 = arith.addf %215, %216 : vector<8x128xf32>
    %218 = math.tanh %217 : vector<8x128xf32>
    %219 = arith.mulf %213, %218 : vector<8x128xf32>
    %c0_98 = arith.constant 0 : index
    %c0_99 = arith.constant 0 : index
    %220 = vector.load %arg16[%c0_98, %c0_99] : memref<8x128xf32, #tpu.memory_space<vmem>>, vector<8x128xf32>
    tpu.vector_store %arg16[%c0_98, %c0_99], %217 {strides = array<i32>} : memref<8x128xf32, #tpu.memory_space<vmem>>, vector<8x128xf32>,
    %c0_100 = arith.constant 0 : index
    %c0_101 = arith.constant 0 : index
    %221 = vector.load %arg15[%c0_100, %c0_101] : memref<8x128xf32, #tpu.memory_space<vmem>>, vector<8x128xf32>
    tpu.vector_store %arg15[%c0_100, %c0_101], %219 {strides = array<i32>} : memref<8x128xf32, #tpu.memory_space<vmem>>, vector<8x128xf32>,
    %222 = arith.truncf %219 : vector<8x128xf32> to vector<8x128xbf16>
    %c40_102 = arith.constant 40 : index
    %c0_103 = arith.constant 0 : index
    %223 = vector.load %arg13[%c40_102, %c0_103] : memref<64x128xbf16, #tpu.memory_space<vmem>>, vector<8x128xbf16>
    tpu.vector_store %arg13[%c40_102, %c0_103], %222 {strides = array<i32>} : memref<64x128xbf16, #tpu.memory_space<vmem>>, vector<8x128xbf16>,
    %c48 = arith.constant 48 : index
    %c0_104 = arith.constant 0 : index
    %224 = vector.load %arg14[%c48, %c0_104] : memref<64x512xf32, #tpu.memory_space<vmem>>, vector<8x512xf32>
    %c0_105 = arith.constant 0 : index
    %c0_106 = arith.constant 0 : index
    %225 = vector.load %arg15[%c0_105, %c0_106] : memref<8x128xf32, #tpu.memory_space<vmem>>, vector<8x128xf32>
    %226 = arith.truncf %225 : vector<8x128xf32> to vector<8x128xbf16>
    %cst_107 = arith.constant dense<0.000000e+00> : vector<8x512xf32>
    %227 = tpu.matmul %226, %7, %cst_107 {dimension_numbers = #tpu.dot_dimension_numbers<[1], [0], [0], [1], [0, 0, 1, 1], [], []>} : vector<8x128xbf16>, vector<128x512xbf16>, vector<8x512xf32> -> vector<8x512xf32>
    %228 = arith.addf %224, %227 : vector<8x512xf32>
    %229 = vector.extract_strided_slice %228 {offsets = [0, 0], sizes = [8, 128], strides = [1, 1]} : vector<8x512xf32> to vector<8x128xf32>
    %230 = arith.negf %229 : vector<8x128xf32>
    %231 = math.exp %230 : vector<8x128xf32>
    %cst_108 = arith.constant 1.000000e+00 : f32
    %232 = vector.broadcast %cst_108 : f32 to vector<8x128xf32>
    %233 = arith.addf %232, %231 : vector<8x128xf32>
    %234 = arith.divf %232, %233 : vector<8x128xf32>
    %235 = vector.extract_strided_slice %228 {offsets = [0, 128], sizes = [8, 128], strides = [1, 1]} : vector<8x512xf32> to vector<8x128xf32>
    %236 = arith.negf %235 : vector<8x128xf32>
    %237 = math.exp %236 : vector<8x128xf32>
    %cst_109 = arith.constant 1.000000e+00 : f32
    %238 = vector.broadcast %cst_109 : f32 to vector<8x128xf32>
    %239 = arith.addf %238, %237 : vector<8x128xf32>
    %240 = arith.divf %238, %239 : vector<8x128xf32>
    %241 = vector.extract_strided_slice %228 {offsets = [0, 256], sizes = [8, 128], strides = [1, 1]} : vector<8x512xf32> to vector<8x128xf32>
    %242 = math.tanh %241 : vector<8x128xf32>
    %243 = vector.extract_strided_slice %228 {offsets = [0, 384], sizes = [8, 128], strides = [1, 1]} : vector<8x512xf32> to vector<8x128xf32>
    %244 = arith.negf %243 : vector<8x128xf32>
    %245 = math.exp %244 : vector<8x128xf32>
    %cst_110 = arith.constant 1.000000e+00 : f32
    %246 = vector.broadcast %cst_110 : f32 to vector<8x128xf32>
    %247 = arith.addf %246, %245 : vector<8x128xf32>
    %248 = arith.divf %246, %247 : vector<8x128xf32>
    %c0_111 = arith.constant 0 : index
    %c0_112 = arith.constant 0 : index
    %249 = vector.load %arg16[%c0_111, %c0_112] : memref<8x128xf32, #tpu.memory_space<vmem>>, vector<8x128xf32>
    %250 = arith.mulf %240, %249 : vector<8x128xf32>
    %251 = arith.mulf %234, %242 : vector<8x128xf32>
    %252 = arith.addf %250, %251 : vector<8x128xf32>
    %253 = math.tanh %252 : vector<8x128xf32>
    %254 = arith.mulf %248, %253 : vector<8x128xf32>
    %c0_113 = arith.constant 0 : index
    %c0_114 = arith.constant 0 : index
    %255 = vector.load %arg16[%c0_113, %c0_114] : memref<8x128xf32, #tpu.memory_space<vmem>>, vector<8x128xf32>
    tpu.vector_store %arg16[%c0_113, %c0_114], %252 {strides = array<i32>} : memref<8x128xf32, #tpu.memory_space<vmem>>, vector<8x128xf32>,
    %c0_115 = arith.constant 0 : index
    %c0_116 = arith.constant 0 : index
    %256 = vector.load %arg15[%c0_115, %c0_116] : memref<8x128xf32, #tpu.memory_space<vmem>>, vector<8x128xf32>
    tpu.vector_store %arg15[%c0_115, %c0_116], %254 {strides = array<i32>} : memref<8x128xf32, #tpu.memory_space<vmem>>, vector<8x128xf32>,
    %257 = arith.truncf %254 : vector<8x128xf32> to vector<8x128xbf16>
    %c48_117 = arith.constant 48 : index
    %c0_118 = arith.constant 0 : index
    %258 = vector.load %arg13[%c48_117, %c0_118] : memref<64x128xbf16, #tpu.memory_space<vmem>>, vector<8x128xbf16>
    tpu.vector_store %arg13[%c48_117, %c0_118], %257 {strides = array<i32>} : memref<64x128xbf16, #tpu.memory_space<vmem>>, vector<8x128xbf16>,
    %c56 = arith.constant 56 : index
    %c0_119 = arith.constant 0 : index
    %259 = vector.load %arg14[%c56, %c0_119] : memref<64x512xf32, #tpu.memory_space<vmem>>, vector<8x512xf32>
    %c0_120 = arith.constant 0 : index
    %c0_121 = arith.constant 0 : index
    %260 = vector.load %arg15[%c0_120, %c0_121] : memref<8x128xf32, #tpu.memory_space<vmem>>, vector<8x128xf32>
    %261 = arith.truncf %260 : vector<8x128xf32> to vector<8x128xbf16>
    %cst_122 = arith.constant dense<0.000000e+00> : vector<8x512xf32>
    %262 = tpu.matmul %261, %7, %cst_122 {dimension_numbers = #tpu.dot_dimension_numbers<[1], [0], [0], [1], [0, 0, 1, 1], [], []>} : vector<8x128xbf16>, vector<128x512xbf16>, vector<8x512xf32> -> vector<8x512xf32>
    %263 = arith.addf %259, %262 : vector<8x512xf32>
    %264 = vector.extract_strided_slice %263 {offsets = [0, 0], sizes = [8, 128], strides = [1, 1]} : vector<8x512xf32> to vector<8x128xf32>
    %265 = arith.negf %264 : vector<8x128xf32>
    %266 = math.exp %265 : vector<8x128xf32>
    %cst_123 = arith.constant 1.000000e+00 : f32
    %267 = vector.broadcast %cst_123 : f32 to vector<8x128xf32>
    %268 = arith.addf %267, %266 : vector<8x128xf32>
    %269 = arith.divf %267, %268 : vector<8x128xf32>
    %270 = vector.extract_strided_slice %263 {offsets = [0, 128], sizes = [8, 128], strides = [1, 1]} : vector<8x512xf32> to vector<8x128xf32>
    %271 = arith.negf %270 : vector<8x128xf32>
    %272 = math.exp %271 : vector<8x128xf32>
    %cst_124 = arith.constant 1.000000e+00 : f32
    %273 = vector.broadcast %cst_124 : f32 to vector<8x128xf32>
    %274 = arith.addf %273, %272 : vector<8x128xf32>
    %275 = arith.divf %273, %274 : vector<8x128xf32>
    %276 = vector.extract_strided_slice %263 {offsets = [0, 256], sizes = [8, 128], strides = [1, 1]} : vector<8x512xf32> to vector<8x128xf32>
    %277 = math.tanh %276 : vector<8x128xf32>
    %278 = vector.extract_strided_slice %263 {offsets = [0, 384], sizes = [8, 128], strides = [1, 1]} : vector<8x512xf32> to vector<8x128xf32>
    %279 = arith.negf %278 : vector<8x128xf32>
    %280 = math.exp %279 : vector<8x128xf32>
    %cst_125 = arith.constant 1.000000e+00 : f32
    %281 = vector.broadcast %cst_125 : f32 to vector<8x128xf32>
    %282 = arith.addf %281, %280 : vector<8x128xf32>
    %283 = arith.divf %281, %282 : vector<8x128xf32>
    %c0_126 = arith.constant 0 : index
    %c0_127 = arith.constant 0 : index
    %284 = vector.load %arg16[%c0_126, %c0_127] : memref<8x128xf32, #tpu.memory_space<vmem>>, vector<8x128xf32>
    %285 = arith.mulf %275, %284 : vector<8x128xf32>
    %286 = arith.mulf %269, %277 : vector<8x128xf32>
    %287 = arith.addf %285, %286 : vector<8x128xf32>
    %288 = math.tanh %287 : vector<8x128xf32>
    %289 = arith.mulf %283, %288 : vector<8x128xf32>
    %c0_128 = arith.constant 0 : index
    %c0_129 = arith.constant 0 : index
    %290 = vector.load %arg16[%c0_128, %c0_129] : memref<8x128xf32, #tpu.memory_space<vmem>>, vector<8x128xf32>
    tpu.vector_store %arg16[%c0_128, %c0_129], %287 {strides = array<i32>} : memref<8x128xf32, #tpu.memory_space<vmem>>, vector<8x128xf32>,
    %c0_130 = arith.constant 0 : index
    %c0_131 = arith.constant 0 : index
    %291 = vector.load %arg15[%c0_130, %c0_131] : memref<8x128xf32, #tpu.memory_space<vmem>>, vector<8x128xf32>
    tpu.vector_store %arg15[%c0_130, %c0_131], %289 {strides = array<i32>} : memref<8x128xf32, #tpu.memory_space<vmem>>, vector<8x128xf32>,
    %292 = arith.truncf %289 : vector<8x128xf32> to vector<8x128xbf16>
    %c56_132 = arith.constant 56 : index
    %c0_133 = arith.constant 0 : index
    %293 = vector.load %arg13[%c56_132, %c0_133] : memref<64x128xbf16, #tpu.memory_space<vmem>>, vector<8x128xbf16>
    tpu.vector_store %arg13[%c56_132, %c0_133], %292 {strides = array<i32>} : memref<64x128xbf16, #tpu.memory_space<vmem>>, vector<8x128xbf16>,
    %c1_i32 = arith.constant 1 : i32
    %294 = arith.cmpi eq, %arg0, %c1_i32 : i32
    %295 = arith.extui %294 : i1 to i32
    %c0_i32_134 = arith.constant 0 : i32
    %296 = arith.cmpi ne, %295, %c0_i32_134 : i32
    scf.if %296 {
      %c0_135 = arith.constant 0 : index
      %c0_136 = arith.constant 0 : index
      %297 = vector.load %arg15[%c0_135, %c0_136] : memref<8x128xf32, #tpu.memory_space<vmem>>, vector<8x128xf32>
      %cst_137 = arith.constant dense<0.000000e+00> : vector<8xf32>
      %298 = vector.multi_reduction <add>, %297, %cst_137 [1] : vector<8x128xf32> to vector<8xf32>
      %299 = vector.shape_cast %298 : vector<8xf32> to vector<8x1xf32>
      %cst_138 = arith.constant 3.125000e-02 : f32
      %300 = vector.broadcast %cst_138 : f32 to vector<8x1xf32>
      %301 = arith.mulf %299, %300 : vector<8x1xf32>
      %302 = arith.mulf %297, %297 : vector<8x128xf32>
      %cst_139 = arith.constant dense<0.000000e+00> : vector<8xf32>
      %303 = vector.multi_reduction <add>, %302, %cst_139 [1] : vector<8x128xf32> to vector<8xf32>
      %304 = vector.shape_cast %303 : vector<8xf32> to vector<8x1xf32>
      %cst_140 = arith.constant 3.125000e-02 : f32
      %305 = vector.broadcast %cst_140 : f32 to vector<8x1xf32>
      %306 = arith.mulf %304, %305 : vector<8x1xf32>
      %307 = arith.mulf %301, %301 : vector<8x1xf32>
      %308 = arith.subf %306, %307 : vector<8x1xf32>
      %309 = vector.broadcast %301 : vector<8x1xf32> to vector<8x128xf32>
      %310 = arith.subf %297, %309 : vector<8x128xf32>
      %cst_141 = arith.constant 9.99999974E-6 : f32
      %311 = vector.broadcast %cst_141 : f32 to vector<8x1xf32>
      %312 = arith.addf %308, %311 : vector<8x1xf32>
      %313 = math.rsqrt %312 : vector<8x1xf32>
      %314 = vector.broadcast %313 : vector<8x1xf32> to vector<8x128xf32>
      %315 = arith.mulf %310, %314 : vector<8x128xf32>
      %c0_142 = arith.constant 0 : index
      %c0_143 = arith.constant 0 : index
      %316 = vector.load %arg6[%c0_142, %c0_143] : memref<1x128xf32, #tpu.memory_space<vmem>>, vector<1x128xf32>
      %317 = vector.broadcast %316 : vector<1x128xf32> to vector<8x128xf32>
      %318 = arith.mulf %315, %317 : vector<8x128xf32>
      %c0_144 = arith.constant 0 : index
      %c0_145 = arith.constant 0 : index
      %319 = vector.load %arg7[%c0_144, %c0_145] : memref<1x128xf32, #tpu.memory_space<vmem>>, vector<1x128xf32>
      %320 = vector.broadcast %319 : vector<1x128xf32> to vector<8x128xf32>
      %321 = arith.addf %318, %320 : vector<8x128xf32>
      %322 = arith.truncf %321 : vector<8x128xf32> to vector<8x128xbf16>
      %c0_146 = arith.constant 0 : index
      %c0_147 = arith.constant 0 : index
      %323 = vector.load %arg8[%c0_146, %c0_147] : memref<128x128xbf16, #tpu.memory_space<vmem>>, vector<128x128xbf16>
      %cst_148 = arith.constant dense<0.000000e+00> : vector<8x128xf32>
      %324 = tpu.matmul %322, %323, %cst_148 {dimension_numbers = #tpu.dot_dimension_numbers<[1], [0], [0], [1], [0, 0, 1, 1], [], []>} : vector<8x128xbf16>, vector<128x128xbf16>, vector<8x128xf32> -> vector<8x128xf32>
      %c0_149 = arith.constant 0 : index
      %c0_150 = arith.constant 0 : index
      %325 = vector.load %arg9[%c0_149, %c0_150] : memref<1x128xf32, #tpu.memory_space<vmem>>, vector<1x128xf32>
      %326 = vector.broadcast %325 : vector<1x128xf32> to vector<8x128xf32>
      %327 = arith.addf %324, %326 : vector<8x128xf32>
      %cst_151 = arith.constant 0.000000e+00 : f32
      %328 = vector.broadcast %cst_151 : f32 to vector<8x128xf32>
      %329 = arith.maximumf %327, %328 : vector<8x128xf32>
      %330 = arith.truncf %329 : vector<8x128xf32> to vector<8x128xbf16>
      %c0_152 = arith.constant 0 : index
      %c0_153 = arith.constant 0 : index
      %331 = vector.load %arg10[%c0_152, %c0_153] : memref<128x128xbf16, #tpu.memory_space<vmem>>, vector<128x128xbf16>
      %cst_154 = arith.constant dense<0.000000e+00> : vector<8x128xf32>
      %332 = tpu.matmul %330, %331, %cst_154 {dimension_numbers = #tpu.dot_dimension_numbers<[1], [0], [0], [1], [0, 0, 1, 1], [], []>} : vector<8x128xbf16>, vector<128x128xbf16>, vector<8x128xf32> -> vector<8x128xf32>
      %c0_155 = arith.constant 0 : index
      %c0_156 = arith.constant 0 : index
      %333 = vector.load %arg11[%c0_155, %c0_156] : memref<1x128xf32, #tpu.memory_space<vmem>>, vector<1x128xf32>
      %334 = vector.broadcast %333 : vector<1x128xf32> to vector<8x128xf32>
      %335 = arith.addf %332, %334 : vector<8x128xf32>
      %c0_157 = arith.constant 0 : index
      %c0_158 = arith.constant 0 : index
      %336 = vector.load %arg12[%c0_157, %c0_158] : memref<8x128xf32, #tpu.memory_space<vmem>>, vector<8x128xf32>
      tpu.vector_store %arg12[%c0_157, %c0_158], %335 {strides = array<i32>} : memref<8x128xf32, #tpu.memory_space<vmem>>, vector<8x128xf32>,
    } else {
    }
    return
  }
  func.func @transform_0(%arg0: i32) -> (i32, i32) {
    %c0_i32 = arith.constant 0 : i32
    %c0_i32_0 = arith.constant 0 : i32
    %c0_i32_1 = arith.constant 0 : i32
    return %c0_i32, %c0_i32_0 : i32, i32
  }
  func.func @transform_1(%arg0: i32) -> (i32, i32) {
    %c0_i32 = arith.constant 0 : i32
    %c0_i32_0 = arith.constant 0 : i32
    %c0_i32_1 = arith.constant 0 : i32
    return %c0_i32, %c0_i32_0 : i32, i32
  }
  func.func @transform_2(%arg0: i32) -> (i32, i32, i32) {
    %c0_i32 = arith.constant 0 : i32
    %c0_i32_0 = arith.constant 0 : i32
    %c0_i32_1 = arith.constant 0 : i32
    return %arg0, %c0_i32, %c0_i32_0 : i32, i32, i32
  }
  func.func @transform_3(%arg0: i32) -> (i32, i32, i32) {
    %c0_i32 = arith.constant 0 : i32
    %c0_i32_0 = arith.constant 0 : i32
    %c0_i32_1 = arith.constant 0 : i32
    return %arg0, %c0_i32, %c0_i32_0 : i32, i32, i32
  }
  func.func @transform_4(%arg0: i32) -> (i32, i32, i32) {
    %c0_i32 = arith.constant 0 : i32
    %c0_i32_0 = arith.constant 0 : i32
    %c0_i32_1 = arith.constant 0 : i32
    return %arg0, %c0_i32, %c0_i32_0 : i32, i32, i32
  }
  func.func @transform_5(%arg0: i32) -> (i32, i32) {
    %c0_i32 = arith.constant 0 : i32
    %c0_i32_0 = arith.constant 0 : i32
    %c0_i32_1 = arith.constant 0 : i32
    return %c0_i32, %c0_i32_0 : i32, i32
  }
  func.func @transform_6(%arg0: i32) -> (i32, i32) {
    %c0_i32 = arith.constant 0 : i32
    %c0_i32_0 = arith.constant 0 : i32
    %c0_i32_1 = arith.constant 0 : i32
    return %c0_i32, %c0_i32_0 : i32, i32
  }
  func.func @transform_7(%arg0: i32) -> (i32, i32) {
    %c0_i32 = arith.constant 0 : i32
    %c0_i32_0 = arith.constant 0 : i32
    %c0_i32_1 = arith.constant 0 : i32
    return %c0_i32, %c0_i32_0 : i32, i32
  }
  func.func @transform_8(%arg0: i32) -> (i32, i32) {
    %c0_i32 = arith.constant 0 : i32
    %c0_i32_0 = arith.constant 0 : i32
    %c0_i32_1 = arith.constant 0 : i32
    return %c0_i32, %c0_i32_0 : i32, i32
  }
  func.func @transform_9(%arg0: i32) -> (i32, i32) {
    %c0_i32 = arith.constant 0 : i32
    %c0_i32_0 = arith.constant 0 : i32
    %c0_i32_1 = arith.constant 0 : i32
    return %c0_i32, %c0_i32_0 : i32, i32
  }
  func.func @transform_10(%arg0: i32) -> (i32, i32) {
    %c0_i32 = arith.constant 0 : i32
    %c0_i32_0 = arith.constant 0 : i32
    %c0_i32_1 = arith.constant 0 : i32
    return %c0_i32, %c0_i32_0 : i32, i32
  }
  func.func @transform_11(%arg0: i32) -> (i32, i32) {
    %c0_i32 = arith.constant 0 : i32
    %c0_i32_0 = arith.constant 0 : i32
    %c0_i32_1 = arith.constant 0 : i32
    return %c0_i32, %c0_i32_0 : i32, i32
  }
}

</mosaic_0001>

<bundles_post_ra>
// kernel: lstm_forward.1
= control target key start
LH: loop header
LB: loop body
LE: loop exit
PB: predicated region body
PF: predicated region fallthrough
CT: control target
= control target key end

     0   :  { %s4843_s0 = inlined_call_operand.vmem [shape: bf16[64,128], index: 0, kind: input, shape index: {}]   ;;  %s4844_s1 = inlined_call_operand.hbm [shape: bf16[128,512], index: 1, kind: input, shape index: {}]   ;;  %s4845_s2 = inlined_call_operand.hbm [shape: bf16[2,128,512], index: 2, kind: input, shape index: {}]   ;;  %s4846_s3 = inlined_call_operand.hbm [shape: bf16[2,128,512], index: 3, kind: input, shape index: {}]   ;;  %s4847_s4 = inlined_call_operand.vmem [shape: f32[2,1,512], index: 4, kind: input, shape index: {}]   ;;  %s4848_s5 = inlined_call_operand.vmem [shape: f32[1,128], index: 5, kind: input, shape index: {}]   ;;  %s4849_s6 = inlined_call_operand.vmem [shape: f32[1,128], index: 6, kind: input, shape index: {}]   ;;  %s4850_s7 = inlined_call_operand.vmem [shape: bf16[128,128], index: 7, kind: input, shape index: {}]   ;;  %s4851_s8 = inlined_call_operand.vmem [shape: f32[1,128], index: 8, kind: input, shape index: {}]   ;;  %s4852_s9 = inlined_call_operand.hbm [shape: bf16[128,128], index: 9, kind: input, shape index: {}]   ;;  %s4853_s10 = inlined_call_operand.vmem [shape: f32[1,128], index: 10, kind: input, shape index: {}]   ;;  %s4854_s11 = inlined_call_operand.vmem [shape: f32[8,128], index: 11, kind: output, shape index: {}]  }
   0x1   :  { %4859 = sst [smem:[#allocation46_spill]] %s4844_s1 }
   0x2   :  { %4860 = sst [smem:[#allocation47_spill]] %s4845_s2 }
   0x3   :  { %4861 = sst [smem:[#allocation48_spill]] %s4852_s9 }
   0x4   :  { %16 = vsyncpa [#allocation7], 0 }
   0x5   :  { %17 = vsyncpa [#allocation9], 0 }
   0x6   :  { %19 = vsyncpa [#allocation9 + $0x1], 0 }
   0x7   :  { %20 = vsyncpa [#allocation12], 0  ;;  %s3868_s17 = smov 0   ;;  %s3870_s18 = smov 0  }
   0x8   :  { %s3872_s19 = smov 0   ;;  %s3874_s20 = smov 0  }
   0x9 LB: > { %4862 = sst [smem:[#allocation16_spill]] %s3795_s19  ;;  %s3889_s21 = sadd.s32 1, %s3799_s20   ;;  %s3799_s20 = sphi %s3874_s20, %s4926_s20   ;;  %s3795_s19 = sphi %s3872_s19, %s4928_s19   ;;  %s3791_s18 = sphi %s3870_s18, %s4930_s18   ;;  %s3787_s17 = sphi %s3868_s17, %s4929_s17  }
   0xa   : > { %4863 = sst [smem:[#allocation17_spill]] %s3889_s21  ;;  %s75_s22 = sadd.s32 1, %s3795_s19 }
   0xb   : > { %s72_s23 = ssub.s32 %s3799_s20, %s3889_s21  ;;  %p82_p0 = scmp.ne.s32.totalorder %s3795_s19, %s3791_s18 }
   0xc   : > { %p73_p1 = scmp.eq.s32.totalorder %s72_s23, 0  ;;  %p83_p2 = scmp.eq.s32.totalorder %s3799_s20, 0 }
   0xd   : > { %p3461_p4 = scmp.lt.s32.totalorder %s3799_s20, 2  ;;  %s357_s25 = sand.u32 1, %s3799_s20  }
   0xe   : > { %s3898_s24 = scalar_select %p73_p1, %s3795_s19, %s75_s22  }
   0xf   : > { %p84_p3 = por %p83_p2, %p82_p0  ;;  %s359_s26 = sand.u32 1, %s3795_s19  }
  0x10   : > { %4864 = sst [smem:[#allocation18_spill]] %s3898_s24  ;;  %s2790_s27 = sshll.u32 %s359_s26, 8 }
  0x11   : > { %s3311_s28 = sshll.u32 %s3799_s20, 8  ;;  %s4865_s2 = sld [smem:[#allocation47_spill]] }
  0x12   : > { %s361_s14 = scalar_lea.vmem [#allocation8], %s2790_s27  ;;  %p3910_p5 = pnand %p3461_p4, %p84_p3 }
  0x13   : > { %s3907_s15 = sshll.u32 %s361_s14, 4  ;;  %s388_s26 = scalar_lea.hbm %s4846_s3, %s3311_s28  ;;  %s370_s15 = int_to_ptr.vmem [resolvable:$true] %s3907_s15 }
  0x14   : > { %s383_s24 = scalar_lea.vmem [#allocation10], %s2790_s27  ;;  %s389_s30 = sshll.u32 %s388_s26, 4  ;;  %s3938_s30 = int_to_ptr.hbm [resolvable:$true] %s389_s30 }
  0x15   : > { %s3917_s29 = sshll.u32 %s383_s24, 4  ;;  %p3641_p7 = pneg %p3910_p5 }
  0x16   : > { %4867 = sst [smem:[#allocation19_spill]] %s3917_s29 }
  0x17   : > { %s366_s12 = scalar_lea.hbm %s4865_s2, %s3311_s28  ;;  %s3644_s28 = scalar_lea.hbm %s4865_s2, 512 }
  0x18   : > { %s367_s13 = sshll.u32 %s366_s12, 4  ;;  %s3919_s12 = scalar_lea.sflag [#allocation9], %s357_s25  ;;  %s368_s13 = int_to_ptr.hbm [resolvable:$true] %s367_s13 }
  0x19   : > { %s3637_s14 = sshra.s32 %s368_s13, 4  ;;  %s3638_s14 = int_to_ptr.hbm [resolvable:$true] %s3637_s14 }
  0x1a   : > { %s3639_s19 = scalar_lea.hbm %s3638_s14, 256  ;;  %p3645_p10 = scmp.lt.s32.totalorder %s3638_s14, %s4865_s2 }
  0x1b   : > { %p3640_p6 = scmp.ne.s32.totalorder %s3638_s14, %s3639_s19  ;;  %p3646_p11 = scmp.lt.s32.totalorder %s3644_s28, %s3639_s19 }
  0x1d   : > { %p3642_p8 = pnand %p3641_p7, %p3640_p6  ;;  %p3647_p12 = por %p3646_p11, %p3645_p10 }
  0x1f   : > { %p3643_p9 = pneg %p3642_p8 }
  0x21   : > { %p3648_p13 = pnand %p3647_p12, %p3643_p9 }
  0x23   : > { %3651 = shalt.err (!%p3648_p13)
}
  0x24   : > { %s3801_s25 = smov 256   ;;  %s3802_s26 = smov 16  }
  0x25   : > { %3455 = dma.hbm_to_vmem [thread:$0]  (!%p3910_p5), %s368_s13, 4096, %s370_s15, %s3919_s12, %s3801_s25, %s3801_s25, %s3802_s26  }
  0x26   : > { %s3942_s19 = sadd.s32 4294967295, %s3799_s20   ;;  %p88_p1 = scmp.ne.s32.totalorder %s3791_s18, %s3787_s17 }
  0x27   : > { %p89_p0 = scmp.eq.s32.totalorder %s3942_s19, 0  ;;  %p2786_p2 = scmp.ge.s32.totalorder %s3799_s20, 1 }
  0x28   : > { %p298_p3 = scmp.lt.s32.totalorder %s3799_s20, 3  ;;  %p2787_p4 = scmp.ne.s32.totalorder %s3942_s19, 0 }
  0x29   : > { %p3952_p6 = por %p89_p0, %p88_p1  ;;  %s4869_s1 = sld [smem:[#allocation46_spill]] }
  0x2a   : > { %p3959_p8 = pnand %p2786_p2, %p298_p3  ;;  %s4871_s9 = sld [smem:[#allocation48_spill]] }
  0x2b   : > { %s3803_s27 = smov [#allocation6]   ;;  %s3804_s13 = smov [#allocation11]  }
  0x2c   : > { %p3445_p9 = pneg %p3959_p8  ;;  %s314_s24 = sshll.u32 %s3803_s27, 4  ;;  %s315_s24 = int_to_ptr.vmem [resolvable:$true] %s314_s24 }
  0x2d   : > { %s340_s15 = sshll.u32 %s3804_s13, 4  ;;  %s3805_s29 = smov 64   ;;  %s341_s15 = int_to_ptr.vmem [resolvable:$true] %s340_s15 }
  0x2e   : > { %p3446_p10 = pnand %p3445_p9, %p89_p0  ;;  %s3727_s17 = sshra.s32 %s3938_s30, 4  ;;  %s3728_s17 = int_to_ptr.hbm [resolvable:$true] %s3727_s17 }
  0x2f   : > { %s312_s22 = sshll.u32 %s4869_s1, 4  ;;  %s3806_s1 = smov 4   ;;  %s313_s22 = int_to_ptr.hbm [resolvable:$true] %s312_s22 }
  0x30   : > { %s338_s20 = sshll.u32 %s4871_s9, 4  ;;  %s3729_s28 = scalar_lea.hbm %s3728_s17, 256  ;;  %s339_s20 = int_to_ptr.hbm [resolvable:$true] %s338_s20 }
  0x31   : > { %3448 = dma.hbm_to_vmem [thread:$0]  (!%p3446_p10), %s313_s22, 4096, %s315_s24, [#allocation7], %s3801_s25, %s3801_s25, %s3802_s26  }
  0x32   : > { %3451 = dma.hbm_to_vmem [thread:$0]  (!%p3446_p10), %s339_s20, 1024, %s341_s15, [#allocation12], %s3805_s29, %s3805_s29, %s3806_s1  }
  0x33   : > { %p3730_p11 = scmp.ne.s32.totalorder %s3728_s17, %s3729_s28  ;;  %s3734_s13 = scalar_lea.hbm %s4846_s3, 512 }
  0x34   : > { %p3735_p1 = scmp.lt.s32.totalorder %s3728_s17, %s4846_s3  ;;  %p3736_p2 = scmp.lt.s32.totalorder %s3734_s13, %s3729_s28 }
  0x35   : > { %p3732_p12 = pnand %p3730_p11, %p3641_p7 }
  0x36   : > { %p3737_p3 = por %p3736_p2, %p3735_p1 }
  0x37   : > { %p3733_p13 = pneg %p3732_p12 }
  0x39   : > { %p3738_p9 = pnand %p3737_p3, %p3733_p13 }
  0x3b   : > { %3741 = shalt.err (!%p3738_p9)
}
  0x3c   : > { %s4872_s1 = sld [smem:[#allocation19_spill]] }
  0x3f   : > { %410 = sbr.rel (%p3959_p8) target bundleno = 2405 (0x965), region = 64 }
  0x42   : > { %s4873_s29 = int_to_ptr.vmem [resolvable:$true] %s4872_s1 }
  0x43   : > { %3458 = dma.hbm_to_vmem [thread:$0]  (!%p3910_p5), %s3938_s30, 4096, %s4873_s29, %s3919_s12, %s3801_s25, %s3801_s25, %s3802_s26  }
  0x44   : > { %3774 = dma.done.wait (%p89_p0), [#allocation7], 4096  }
  0x45   : > { %3776 = vsyncadd (%p89_p0), [#allocation7], 4294963200  ;;  %s417_s2 = sand.u32 1, %s3942_s19   ;;  %s419_s9 = sand.u32 1, %s3791_s18  }
  0x46   : > { %s2798_s21 = sshll.u32 %s419_s9, 8  ;;  %s418_s16 = scalar_lea.sflag [#allocation9], %s417_s2 }
  0x47   : > { %s4000_s22 = scalar_lea.vmem [#allocation8], %s2798_s21 }
  0x48   : > { %3778 = dma.done.wait (%p3952_p6), %s418_s16, 8192  }
  0x49   : > { %3780 = vsyncadd (%p3952_p6), %s418_s16, 4294959104  ;;  %s4006_s30 = scalar_lea.vmem [#allocation10], %s2798_s21 }
  0x4a   : > { %3782 = dma.done.wait (%p89_p0), [#allocation12], 1024  }
  0x4b   : > { %3784 = vsyncadd (%p89_p0), [#allocation12], 4294966272  ;;  %p480_p5 = scmp.lt.s32.totalorder %s3942_s19, 1  ;;  %v3807_v0 = vmov 0.0   ;;  %v4020_v2 = vld [vmem:[%s4006_s30 + $0x4] sm:$0xf] }
  0x4c   : > { %484 = vst [vmem:[#allocation4] sm:$0xff] %v3807_v0  ;;  %v4023_v3 = vld [vmem:[%s4006_s30] sm:$0xf]  ;;  %v4026_v4 = vld [vmem:[%s4006_s30 + $0xc] sm:$0xf] }
  0x4d   : > { %s481_s12 = scalar_select %p480_p5, %s3942_s19, 1  ;;  %485 = vst [vmem:[#allocation5] sm:$0xff] %v3807_v0  ;;  %v4029_v5 = vld [vmem:[%s4006_s30 + $0x8] sm:$0xf]  ;;  %v4032_v6 = vld [vmem:[%s4006_s30 + $0x10] sm:$0xf0] }
  0x4e   : > { %4874 = vst [vmem:[#allocation20_spill] sm:$0xff] %v4020_v2  ;;  %v4035_v7 = vld [vmem:[%s4006_s30 + $0xc] sm:$0xf0]  ;;  %v4038_v8 = vld [vmem:[%s4006_s30 + $0x18] sm:$0xf0] }
  0x4f   : > { %s2801_s25 = sshll.u32 %s481_s12, 2  ;;  %4875 = vst [vmem:[#allocation21_spill] sm:$0xff] %v4023_v3  ;;  %v4041_v9 = vld [vmem:[%s4006_s30 + $0x14] sm:$0xf0]  ;;  %v4044_v10 = vld [vmem:[%s4006_s30 + $0x24] sm:$0xf] }
  0x50   : > { %s483_s23 = scalar_lea.vmem %s4847_s4, %s2801_s25  ;;  %4876 = vst [vmem:[#allocation22_spill] sm:$0xff] %v4026_v4  ;;  %v4047_v11 = vld [vmem:[%s4006_s30 + $0x20] sm:$0xf]  ;;  %v4050_v12 = vld [vmem:[%s4006_s30 + $0x2c] sm:$0xf] }
  0x51   : > { %v4017_v1 = vld [vmem:[%s483_s23] sm:$0xf]  ;;  %4877 = vst [vmem:[#allocation23_spill] sm:$0xff] %v4029_v5  ;;  %v4053_v13 = vld [vmem:[%s4006_s30 + $0x28] sm:$0xf] }
  0x52   : > { %4878 = vst [vmem:[#allocation24_spill] sm:$0xff] %v4032_v6  ;;  %v4056_v14 = vld [vmem:[%s4006_s30 + $0x30] sm:$0xf0]  ;;  %v4059_v15 = vld [vmem:[%s4006_s30 + $0x2c] sm:$0xf0] }
  0x53   : > { %4879 = vst [vmem:[#allocation25_spill] sm:$0xff] %v4035_v7  ;;  %v4062_v16 = vld [vmem:[%s4006_s30 + $0x38] sm:$0xf0]  ;;  %v4065_v17 = vld [vmem:[%s4006_s30 + $0x34] sm:$0xf0] }
  0x54   : > { %4880 = vst [vmem:[#allocation26_spill] sm:$0xff] %v4038_v8  ;;  %v4068_v18 = vld [vmem:[%s4006_s30 + $0x44] sm:$0xf]  ;;  %v4071_v19 = vld [vmem:[%s4006_s30 + $0x40] sm:$0xf] }
  0x55   : > { %4881 = vst [vmem:[#allocation27_spill] sm:$0xff] %v4041_v9  ;;  %v4074_v20 = vld [vmem:[%s4006_s30 + $0x4c] sm:$0xf]  ;;  %v4077_v21 = vld [vmem:[%s4006_s30 + $0x48] sm:$0xf] }
  0x56   : > { %4882 = vst [vmem:[#allocation28_spill] sm:$0xff] %v4044_v10  ;;  %v4080_v22 = vld [vmem:[%s4006_s30 + $0x50] sm:$0xf0]  ;;  %v4083_v23 = vld [vmem:[%s4006_s30 + $0x4c] sm:$0xf0] }
  0x57   : > { %4883 = vst [vmem:[#allocation29_spill] sm:$0xff] %v4047_v11  ;;  %v4086_v24 = vld [vmem:[%s4006_s30 + $0x58] sm:$0xf0]  ;;  %v4089_v25 = vld [vmem:[%s4006_s30 + $0x54] sm:$0xf0] }
  0x58   : > { %4884 = vst [vmem:[#allocation30_spill] sm:$0xff] %v4050_v12  ;;  %v4092_v26 = vld [vmem:[%s4006_s30 + $0x64] sm:$0xf]  ;;  %v4095_v27 = vld [vmem:[%s4006_s30 + $0x60] sm:$0xf] }
  0x59   : > { %4885 = vst [vmem:[#allocation31_spill] sm:$0xff] %v4053_v13  ;;  %v4098_v28 = vld [vmem:[%s4006_s30 + $0x6c] sm:$0xf]  ;;  %v4101_v29 = vld [vmem:[%s4006_s30 + $0x68] sm:$0xf] }
  0x5a   : > { %4886 = vst [vmem:[#allocation32_spill] sm:$0xff] %v4056_v14  ;;  %v4104_v30 = vld [vmem:[%s4006_s30 + $0x70] sm:$0xf0]  ;;  %v4107_v31 = vld [vmem:[%s4006_s30 + $0x6c] sm:$0xf0] }
  0x5b   : > { %4887 = vst [vmem:[#allocation33_spill] sm:$0xff] %v4059_v15  ;;  %v4110_v32 = vld [vmem:[%s4006_s30 + $0x78] sm:$0xf0]  ;;  %v4113_v33 = vld [vmem:[%s4006_s30 + $0x74] sm:$0xf0] }
  0x5c   : > { %4888 = vst [vmem:[#allocation34_spill] sm:$0xff] %v4062_v16  ;;  %v4116_v34 = vld [vmem:[%s4006_s30 + $0x84] sm:$0xf]  ;;  %v4119_v35 = vld [vmem:[%s4006_s30 + $0x80] sm:$0xf] }
  0x5d   : > { %4889 = vst [vmem:[#allocation35_spill] sm:$0xff] %v4065_v17  ;;  %v4122_v36 = vld [vmem:[%s4006_s30 + $0x8c] sm:$0xf]  ;;  %v4125_v37 = vld [vmem:[%s4006_s30 + $0x88] sm:$0xf] }
  0x5e   : > { %4890 = vst [vmem:[#allocation36_spill] sm:$0xff] %v4068_v18  ;;  %v4128_v38 = vld [vmem:[%s4006_s30 + $0x90] sm:$0xf0]  ;;  %v4131_v39 = vld [vmem:[%s4006_s30 + $0x8c] sm:$0xf0] }
  0x5f   : > { %4891 = vst [vmem:[#allocation37_spill] sm:$0xff] %v4071_v19  ;;  %v4134_v40 = vld [vmem:[%s4006_s30 + $0x98] sm:$0xf0]  ;;  %v4137_v41 = vld [vmem:[%s4006_s30 + $0x94] sm:$0xf0] }
  0x60   : > { %4892 = vst [vmem:[#allocation38_spill] sm:$0xff] %v4074_v20  ;;  %v4140_v42 = vld [vmem:[%s4006_s30 + $0xa4] sm:$0xf]  ;;  %v4143_v43 = vld [vmem:[%s4006_s30 + $0xa0] sm:$0xf] }
  0x61   : > { %4893 = vst [vmem:[#allocation39_spill] sm:$0xff] %v4077_v21  ;;  %v4146_v44 = vld [vmem:[%s4006_s30 + $0xac] sm:$0xf]  ;;  %v4149_v45 = vld [vmem:[%s4006_s30 + $0xa8] sm:$0xf] }
  0x62   : > { %4894 = vst [vmem:[#allocation40_spill] sm:$0xff] %v4080_v22  ;;  %v4152_v46 = vld [vmem:[%s4006_s30 + $0xb0] sm:$0xf0]  ;;  %v4155_v47 = vld [vmem:[%s4006_s30 + $0xac] sm:$0xf0] }
  0x63   : > { %4895 = vst [vmem:[#allocation41_spill] sm:$0xff] %v4083_v23  ;;  %v4158_v48 = vld [vmem:[%s4006_s30 + $0xb8] sm:$0xf0]  ;;  %v4161_v49 = vld [vmem:[%s4006_s30 + $0xb4] sm:$0xf0] }
  0x64   : > { %4896 = vst [vmem:[#allocation42_spill] sm:$0xff] %v4086_v24  ;;  %v4164_v50 = vld [vmem:[%s4006_s30 + $0xc4] sm:$0xf]  ;;  %v4167_v51 = vld [vmem:[%s4006_s30 + $0xc0] sm:$0xf] }
  0x65   : > { %4897 = vst [vmem:[#allocation43_spill] sm:$0xff] %v4089_v25  ;;  %v4170_v52 = vld [vmem:[%s4006_s30 + $0xcc] sm:$0xf]  ;;  %v4173_v53 = vld [vmem:[%s4006_s30 + $0xc8] sm:$0xf] }
  0x66   : > { %4898 = vst [vmem:[#allocation44_spill] sm:$0xff] %v4101_v29  ;;  %v4176_v54 = vld [vmem:[%s4006_s30 + $0xd0] sm:$0xf0]  ;;  %v4179_v55 = vld [vmem:[%s4006_s30 + $0xcc] sm:$0xf0]  ;;  %522 = sbr.rel (%p2787_p4) target bundleno = 334 (0x14e), region = 84 }
  0x67   : > { %4899 = vst [vmem:[#allocation45_spill] sm:$0xff] %v4113_v33  ;;  %v4182_v56 = vld [vmem:[%s4006_s30 + $0xd8] sm:$0xf0]  ;;  %v4185_v57 = vld [vmem:[%s4006_s30 + $0xd4] sm:$0xf0] }
  0x68   : > { %v4188_v58 = vld [vmem:[%s4006_s30 + $0xe4] sm:$0xf]  ;;  %v4191_v59 = vld [vmem:[%s4006_s30 + $0xe0] sm:$0xf]  ;;  %v4194_v60 = vld [vmem:[%s4006_s30 + $0xec] sm:$0xf] }
  0x69   : > { %v4197_v61 = vld [vmem:[%s4006_s30 + $0xe8] sm:$0xf]  ;;  %v4200_v62 = vld [vmem:[%s4006_s30 + $0xf0] sm:$0xf0]  ;;  %v4203_v63 = vld [vmem:[%s4006_s30 + $0xec] sm:$0xf0] }
  0x6a   : > { %v4206_v0 = vld [vmem:[%s4006_s30 + $0xf8] sm:$0xf0]  ;;  %v4209_v9 = vld [vmem:[%s4006_s30 + $0xf4] sm:$0xf0] }
  0x6b   : > { %v2933_v5 = vld [vmem:[#allocation6 + $0xe0] sm:$0xf]  ;;  %v3379_v4 = vld [vmem:[#allocation6 + $0xec] sm:$0xf0]  ;;  %v3377_v8 = vld [vmem:[#allocation6 + $0xe4] sm:$0xf] }
  0x6c   : > { %v2934_v2 = vor.u32 %v3379_v4, %v2933_v5  ;;  %v2935_v6 = vld [vmem:[#allocation6 + $0xf0] sm:$0xf0]  ;;  %v2941_v7 = vld [vmem:[#allocation6 + $0xe8] sm:$0xf]  ;;  %v3380_v3 = vld [vmem:[#allocation6 + $0xf4] sm:$0xf0] }
  0x6d   : > { %v2938_v17 = vor.u32 %v3377_v8, %v2935_v6  ;;  %v2942_v13 = vor.u32 %v3380_v3, %v2941_v7  ;;  %v3378_v12 = vld [vmem:[#allocation6 + $0xec] sm:$0xf]  ;;  %v2943_v16 = vld [vmem:[#allocation6 + $0xf8] sm:$0xf0]  ;;  %v2917_v10 = vld [vmem:[#allocation6 + $0xc0] sm:$0xf] }
  0x6e   : > { %756 = vmatpush.bf16.msra.mxu0 %v2934_v2  ;;  %v2946_v14 = vor.u32 %v3378_v12, %v2943_v16  ;;  %v3375_v15 = vld [vmem:[#allocation6 + $0xcc] sm:$0xf0]  ;;  %v3373_v11 = vld [vmem:[#allocation6 + $0xc4] sm:$0xf]  ;;  %v2919_v25 = vld [vmem:[#allocation6 + $0xd0] sm:$0xf0] }
  0x6f   : > { %785 = vmatpush.bf16.msra.mxu1 %v2938_v17  ;;  %814 = vmatpush.bf16.msra.mxu2 %v2942_v13  ;;  %v2918_v21 = vor.u32 %v3375_v15, %v2917_v10  ;;  %v2922_v20 = vor.u32 %v3373_v11, %v2919_v25  ;;  %v2925_v24 = vld [vmem:[#allocation6 + $0xc8] sm:$0xf]  ;;  %v3376_v18 = vld [vmem:[#allocation6 + $0xd4] sm:$0xf0]  ;;  %v3374_v4 = vld [vmem:[#allocation6 + $0xcc] sm:$0xf] }
  0x70   : > { %843 = vmatpush.bf16.msra.mxu3 %v2946_v14  ;;  %v2926_v5 = vor.u32 %v3376_v18, %v2925_v24  ;;  %v2927_v22 = vld [vmem:[#allocation6 + $0xd8] sm:$0xf0]  ;;  %v2901_v6 = vld [vmem:[#allocation6 + $0xa0] sm:$0xf]  ;;  %v3371_v3 = vld [vmem:[#allocation6 + $0xac] sm:$0xf0] }
  0x71   : > { %v2930_v7 = vor.u32 %v3374_v4, %v2927_v22  ;;  %v3369_v8 = vld [vmem:[#allocation6 + $0xa4] sm:$0xf]  ;;  %v2903_v23 = vld [vmem:[#allocation6 + $0xb0] sm:$0xf0]  ;;  %v2909_v2 = vld [vmem:[#allocation6 + $0xa8] sm:$0xf]  ;;  %v2902_v12 = vor.u32 %v3371_v3, %v2901_v6 }
  0x72   : > { %757 = vmatpush.bf16.msra.mxu0 %v2918_v21  ;;  %v3372_v16 = vld [vmem:[#allocation6 + $0xb4] sm:$0xf0]  ;;  %v3370_v19 = vld [vmem:[#allocation6 + $0xac] sm:$0xf]  ;;  %v2911_v17 = vld [vmem:[#allocation6 + $0xb8] sm:$0xf0]  ;;  %v2906_v10 = vor.u32 %v3369_v8, %v2903_v23 }
  0x73   : > { %786 = vmatpush.bf16.msra.mxu1 %v2922_v20  ;;  %815 = vmatpush.bf16.msra.mxu2 %v2926_v5  ;;  %v2910_v11 = vor.u32 %v3372_v16, %v2909_v2  ;;  %v2885_v13 = vld [vmem:[#allocation6 + $0x80] sm:$0xf]  ;;  %v3367_v15 = vld [vmem:[#allocation6 + $0x8c] sm:$0xf0]  ;;  %v3365_v14 = vld [vmem:[#allocation6 + $0x84] sm:$0xf]  ;;  %v2914_v18 = vor.u32 %v3370_v19, %v2911_v17 }
  0x74   : > { %844 = vmatpush.bf16.msra.mxu3 %v2930_v7  ;;  %v2887_v24 = vld [vmem:[#allocation6 + $0x90] sm:$0xf0]  ;;  %v2893_v25 = vld [vmem:[#allocation6 + $0x88] sm:$0xf]  ;;  %v3368_v22 = vld [vmem:[#allocation6 + $0x94] sm:$0xf0]  ;;  %v2886_v21 = vor.u32 %v3367_v15, %v2885_v13 }
  0x75   : > { %v3366_v4 = vld [vmem:[#allocation6 + $0x8c] sm:$0xf]  ;;  %v2895_v33 = vld [vmem:[#allocation6 + $0x98] sm:$0xf0]  ;;  %v2890_v6 = vor.u32 %v3365_v14, %v2887_v24  ;;  %v2894_v3 = vor.u32 %v3368_v22, %v2893_v25  ;;  %v2869_v20 = vld [vmem:[#allocation6 + $0x60] sm:$0xf] }
  0x76   : > { %758 = vmatpush.bf16.msra.mxu0 %v2902_v12  ;;  %v3363_v5 = vld [vmem:[#allocation6 + $0x6c] sm:$0xf0]  ;;  %v3361_v23 = vld [vmem:[#allocation6 + $0x64] sm:$0xf]  ;;  %v2898_v8 = vor.u32 %v3366_v4, %v2895_v33  ;;  %v2871_v2 = vld [vmem:[#allocation6 + $0x70] sm:$0xf0] }
  0x77   : > { %787 = vmatpush.bf16.msra.mxu1 %v2906_v10  ;;  %816 = vmatpush.bf16.msra.mxu2 %v2910_v11  ;;  %v2877_v16 = vld [vmem:[#allocation6 + $0x68] sm:$0xf]  ;;  %v3364_v7 = vld [vmem:[#allocation6 + $0x74] sm:$0xf0]  ;;  %v3362_v19 = vld [vmem:[#allocation6 + $0x6c] sm:$0xf]  ;;  %v2870_v29 = vor.u32 %v3363_v5, %v2869_v20  ;;  %v2874_v12 = vor.u32 %v3361_v23, %v2871_v2 }
  0x78   : > { %845 = vmatpush.bf16.msra.mxu3 %v2914_v18  ;;  %v2879_v17 = vld [vmem:[#allocation6 + $0x78] sm:$0xf0]  ;;  %v2878_v13 = vor.u32 %v3364_v7, %v2877_v16  ;;  %v2853_v10 = vld [vmem:[#allocation6 + $0x40] sm:$0xf]  ;;  %v3359_v11 = vld [vmem:[#allocation6 + $0x4c] sm:$0xf0] }
  0x79   : > { %v3357_v15 = vld [vmem:[#allocation6 + $0x44] sm:$0xf]  ;;  %v2882_v14 = vor.u32 %v3362_v19, %v2879_v17  ;;  %v2855_v24 = vld [vmem:[#allocation6 + $0x50] sm:$0xf0]  ;;  %v2861_v25 = vld [vmem:[#allocation6 + $0x48] sm:$0xf]  ;;  %v2854_v4 = vor.u32 %v3359_v11, %v2853_v10 }
  0x7a   : > { %759 = vmatpush.bf16.msra.mxu0 %v2886_v21  ;;  %v3360_v18 = vld [vmem:[#allocation6 + $0x54] sm:$0xf0]  ;;  %v3358_v33 = vld [vmem:[#allocation6 + $0x4c] sm:$0xf]  ;;  %v2863_v22 = vld [vmem:[#allocation6 + $0x58] sm:$0xf0]  ;;  %v2858_v21 = vor.u32 %v3357_v15, %v2855_v24 }
  0x7b   : > { %788 = vmatpush.bf16.msra.mxu1 %v2890_v6  ;;  %817 = vmatpush.bf16.msra.mxu2 %v2894_v3  ;;  %v2862_v20 = vor.u32 %v3360_v18, %v2861_v25  ;;  %v2837_v6 = vld [vmem:[#allocation6 + $0x20] sm:$0xf]  ;;  %v3355_v3 = vld [vmem:[#allocation6 + $0x2c] sm:$0xf0]  ;;  %v3353_v5 = vld [vmem:[#allocation6 + $0x24] sm:$0xf]  ;;  %v2866_v23 = vor.u32 %v3358_v33, %v2863_v22 }
  0x7c   : > { %846 = vmatpush.bf16.msra.mxu3 %v2898_v8  ;;  %v2839_v2 = vld [vmem:[#allocation6 + $0x30] sm:$0xf0]  ;;  %v2845_v16 = vld [vmem:[#allocation6 + $0x28] sm:$0xf]  ;;  %v3356_v8 = vld [vmem:[#allocation6 + $0x34] sm:$0xf0]  ;;  %v2838_v17 = vor.u32 %v3355_v3, %v2837_v6 }
  0x7d   : > { %v3354_v7 = vld [vmem:[#allocation6 + $0x2c] sm:$0xf]  ;;  %v2847_v19 = vld [vmem:[#allocation6 + $0x38] sm:$0xf0]  ;;  %v2846_v10 = vor.u32 %v3356_v8, %v2845_v16  ;;  %v3349_v11 = vld [vmem:[#allocation6 + $0x4] sm:$0xf] }
  0x7e   : > { %760 = vmatpush.bf16.msra.mxu0 %v2870_v29  ;;  %v2842_v29 = vor.u32 %v3353_v5, %v2839_v2  ;;  %v2850_v15 = vor.u32 %v3354_v7, %v2847_v19  ;;  %v2823_v24 = vld [vmem:[#allocation6 + $0x10] sm:$0xf0]  ;;  %v2829_v25 = vld [vmem:[#allocation6 + $0x8] sm:$0xf]  ;;  %v3350_v18 = vld [vmem:[#allocation6 + $0xc] sm:$0xf] }
  0x7f   : > { %789 = vmatpush.bf16.msra.mxu1 %v2874_v12  ;;  %818 = vmatpush.bf16.msra.mxu2 %v2878_v13  ;;  %v2821_v12 = vld [vmem:[#allocation6] sm:$0xf]  ;;  %v3351_v13 = vld [vmem:[#allocation6 + $0xc] sm:$0xf0]  ;;  %v2831_v33 = vld [vmem:[#allocation6 + $0x18] sm:$0xf0] }
  0x80   : > { %847 = vmatpush.bf16.msra.mxu3 %v2882_v14  ;;  %v3352_v14 = vld [vmem:[#allocation6 + $0x14] sm:$0xf0]  ;;  %v2822_v22 = vor.u32 %v3351_v13, %v2821_v12  ;;  %v3347_v5 = vld [vmem:[%s4843_s0 + $0x10] sm:$0xff]  ;;  %v4226_v2 = vperm.slane %v4017_v1, 0  ;;  %v4229_v16 = vperm.slane %v4017_v1, 1 }
  0x81   : > { %v2830_v6 = vor.u32 %v3352_v14, %v2829_v25  ;;  %v3346_v3 = vld [vmem:[%s4843_s0 + $0x8] sm:$0xff] }
  0x82   : > { %761 = vmatpush.bf16.msra.mxu0 %v2854_v4  ;;  %v2826_v4 = vor.u32 %v3349_v11, %v2823_v24 }
  0x83   : > { %790 = vmatpush.bf16.msra.mxu1 %v2858_v21  ;;  %819 = vmatpush.bf16.msra.mxu2 %v2862_v20  ;;  %v2834_v21 = vor.u32 %v3350_v18, %v2831_v33  ;;  %v3345_v20 = vld [vmem:[%s4843_s0] sm:$0xff] }
  0x84   : > { %848 = vmatpush.bf16.msra.mxu3 %v2866_v23  ;;  %v3348_v23 = vld [vmem:[%s4843_s0 + $0x18] sm:$0xff] }
  0x86   : > { %762 = vmatpush.bf16.msra.mxu0 %v2838_v17 }
  0x87   : > { %791 = vmatpush.bf16.msra.mxu1 %v2842_v29  ;;  %820 = vmatpush.bf16.msra.mxu2 %v2846_v10  ;;  %v4234_v29 = vperm.slane %v4017_v1, 2  ;;  %v4237_v10 = vperm.slane %v4017_v1, 3 }
  0x88   : > { %849 = vmatpush.bf16.msra.mxu3 %v2850_v15 }
  0x8a   : > { %763 = vmatpush.bf16.msra.mxu0 %v2822_v22 }
  0x8b   : > { %792 = vmatpush.bf16.msra.mxu1 %v2826_v4  ;;  %821 = vmatpush.bf16.msra.mxu2 %v2830_v6 }
  0x8c   : > { %850 = vmatpush.bf16.msra.mxu3 %v2834_v21 }
  0x8d   : > { %764 = vmatmul.bf16.vlgmr.msra.gmra.mxu0 %v3345_v20 }
  0x8e   : > { %793 = vmatmul.bf16.vlgmr.msra.gmra.mxu1 %v3345_v20  ;;  %822 = vmatmul.bf16.vlgmr.msra.gmra.mxu2 %v3345_v20 }
  0x8f   : > { %851 = vmatmul.bf16.vlgmr.msra.gmra.mxu3 %v3345_v20 }
  0x9d   : > { %769 = vmatmul.bf16.gmra.mxu0 %v3346_v3 }
  0x9e   : > { %798 = vmatmul.bf16.gmra.mxu1 %v3346_v3  ;;  %827 = vmatmul.bf16.gmra.mxu2 %v3346_v3 }
  0x9f   : > { %856 = vmatmul.bf16.gmra.mxu3 %v3346_v3 }
  0xad   : > { %774 = vmatmul.bf16.gmra.mxu0 %v3347_v5 }
  0xae   : > { %803 = vmatmul.bf16.gmra.mxu1 %v3347_v5  ;;  %832 = vmatmul.bf16.gmra.mxu2 %v3347_v5 }
  0xaf   : > { %861 = vmatmul.bf16.gmra.mxu3 %v3347_v5 }
  0xbd   : > { %779 = vmatmul.bf16.gmra.mxu0 %v3348_v23 }
  0xbe   : > { %808 = vmatmul.bf16.gmra.mxu1 %v3348_v23  ;;  %837 = vmatmul.bf16.gmra.mxu2 %v3348_v23 }
  0xbf   : > { %866 = vmatmul.bf16.gmra.mxu3 %v3348_v23 }
 0x10a   : > { %v765_v8 = vpop.f32.mrf.mxu0 }
 0x10b   : > { %v766_v7 = vadd.f32 %v765_v8, %v4226_v2  ;;  %v794_v19 = vpop.f32.mrf.mxu1 }
 0x10c   : > { %v795_v17 = vadd.f32 %v794_v19, %v4229_v16 }
 0x10d   : > { %872 = vst [vmem:[#allocation3 + $0xb0] sm:$0xff] %v766_v7 }
 0x10e   : > { %873 = vst [vmem:[#allocation3] sm:$0xff] %v795_v17 }
 0x111   : > { %v823_v12 = vpop.f32.mrf.mxu2 }
 0x112   : > { %v824_v13 = vadd.f32 %v823_v12, %v4234_v29  ;;  %v852_v11 = vpop.f32.mrf.mxu3  ;;  %v767_v15 = vpop.f32.mrf.mxu0 }
 0x113   : > { %v853_v24 = vadd.f32 %v852_v11, %v4237_v10  ;;  %v768_v25 = vadd.f32 %v767_v15, %v4226_v2  ;;  %v796_v14 = vpop.f32.mrf.mxu1 }
 0x114   : > { %874 = vst [vmem:[#allocation3 + $0xd8] sm:$0xff] %v824_v13  ;;  %v797_v18 = vadd.f32 %v796_v14, %v4229_v16 }
 0x115   : > { %875 = vst [vmem:[#allocation3 + $0x18] sm:$0xff] %v853_v24 }
 0x116   : > { %876 = vst [vmem:[#allocation3 + $0x50] sm:$0xff] %v768_v25 }
 0x117   : > { %877 = vst [vmem:[#allocation3 + $0x68] sm:$0xff] %v797_v18 }
 0x119   : > { %v825_v33 = vpop.f32.mrf.mxu2 }
 0x11a   : > { %v826_v22 = vadd.f32 %v825_v33, %v4234_v29  ;;  %v854_v4 = vpop.f32.mrf.mxu3  ;;  %v770_v6 = vpop.f32.mrf.mxu0 }
 0x11b   : > { %v855_v21 = vadd.f32 %v854_v4, %v4237_v10  ;;  %v771_v20 = vadd.f32 %v770_v6, %v4226_v2  ;;  %v799_v3 = vpop.f32.mrf.mxu1 }
 0x11c   : > { %878 = vst [vmem:[#allocation3 + $0x30] sm:$0xff] %v826_v22  ;;  %v800_v5 = vadd.f32 %v799_v3, %v4229_v16 }
 0x11d   : > { %879 = vst [vmem:[#allocation3 + $0x48] sm:$0xff] %v855_v21 }
 0x11e   : > { %880 = vst [vmem:[#allocation3 + $0x80] sm:$0xff] %v771_v20 }
 0x11f   : > { %881 = vst [vmem:[#allocation3 + $0x88] sm:$0xff] %v800_v5 }
 0x121   : > { %v828_v23 = vpop.f32.mrf.mxu2 }
 0x122   : > { %v829_v8 = vadd.f32 %v828_v23, %v4234_v29  ;;  %v857_v7 = vpop.f32.mrf.mxu3  ;;  %v772_v19 = vpop.f32.mrf.mxu0 }
 0x123   : > { %v858_v17 = vadd.f32 %v857_v7, %v4237_v10  ;;  %v773_v12 = vadd.f32 %v772_v19, %v4226_v2  ;;  %v801_v13 = vpop.f32.mrf.mxu1 }
 0x124   : > { %882 = vst [vmem:[#allocation3 + $0xe8] sm:$0xff] %v829_v8  ;;  %v802_v11 = vadd.f32 %v801_v13, %v4229_v16 }
 0x125   : > { %883 = vst [vmem:[#allocation3 + $0xb8] sm:$0xff] %v858_v17 }
 0x126   : > { %884 = vst [vmem:[#allocation3 + $0x60] sm:$0xff] %v773_v12 }
 0x127   : > { %885 = vst [vmem:[#allocation3 + $0xf0] sm:$0xff] %v802_v11 }
 0x129   : > { %v830_v15 = vpop.f32.mrf.mxu2 }
 0x12a   : > { %v831_v24 = vadd.f32 %v830_v15, %v4234_v29  ;;  %v859_v25 = vpop.f32.mrf.mxu3  ;;  %v775_v14 = vpop.f32.mrf.mxu0 }
 0x12b   : > { %v860_v18 = vadd.f32 %v859_v25, %v4237_v10  ;;  %v776_v33 = vadd.f32 %v775_v14, %v4226_v2  ;;  %v804_v22 = vpop.f32.mrf.mxu1 }
 0x12c   : > { %886 = vst [vmem:[#allocation3 + $0x8] sm:$0xff] %v831_v24  ;;  %v805_v4 = vadd.f32 %v804_v22, %v4229_v16 }
 0x12d   : > { %887 = vst [vmem:[#allocation3 + $0x78] sm:$0xff] %v860_v18 }
 0x12e   : > { %888 = vst [vmem:[#allocation3 + $0x38] sm:$0xff] %v776_v33 }
 0x12f   : > { %889 = vst [vmem:[#allocation3 + $0x58] sm:$0xff] %v805_v4 }
 0x131   : > { %v833_v6 = vpop.f32.mrf.mxu2 }
 0x132   : > { %v834_v21 = vadd.f32 %v833_v6, %v4234_v29  ;;  %v862_v20 = vpop.f32.mrf.mxu3  ;;  %v777_v3 = vpop.f32.mrf.mxu0 }
 0x133   : > { %v863_v5 = vadd.f32 %v862_v20, %v4237_v10  ;;  %v778_v23 = vadd.f32 %v777_v3, %v4226_v2  ;;  %v806_v8 = vpop.f32.mrf.mxu1 }
 0x134   : > { %890 = vst [vmem:[#allocation3 + $0x40] sm:$0xff] %v834_v21  ;;  %v807_v7 = vadd.f32 %v806_v8, %v4229_v16 }
 0x135   : > { %891 = vst [vmem:[#allocation3 + $0xc8] sm:$0xff] %v863_v5 }
 0x136   : > { %892 = vst [vmem:[#allocation3 + $0xe0] sm:$0xff] %v778_v23 }
 0x137   : > { %893 = vst [vmem:[#allocation3 + $0x90] sm:$0xff] %v807_v7 }
 0x139   : > { %v835_v19 = vpop.f32.mrf.mxu2 }
 0x13a   : > { %v836_v17 = vadd.f32 %v835_v19, %v4234_v29  ;;  %v864_v12 = vpop.f32.mrf.mxu3  ;;  %v780_v13 = vpop.f32.mrf.mxu0 }
 0x13b   : > { %v865_v11 = vadd.f32 %v864_v12, %v4237_v10  ;;  %v781_v15 = vadd.f32 %v780_v13, %v4226_v2  ;;  %v809_v24 = vpop.f32.mrf.mxu1 }
 0x13c   : > { %894 = vst [vmem:[#allocation3 + $0x70] sm:$0xff] %v836_v17  ;;  %v810_v25 = vadd.f32 %v809_v24, %v4229_v16 }
 0x13d   : > { %895 = vst [vmem:[#allocation3 + $0xc0] sm:$0xff] %v865_v11 }
 0x13e   : > { %896 = vst [vmem:[#allocation3 + $0xa8] sm:$0xff] %v781_v15 }
 0x13f   : > { %897 = vst [vmem:[#allocation3 + $0xd0] sm:$0xff] %v810_v25 }
 0x141   : > { %v838_v14 = vpop.f32.mrf.mxu2 }
 0x142   : > { %v839_v18 = vadd.f32 %v838_v14, %v4234_v29  ;;  %v867_v33 = vpop.f32.mrf.mxu3  ;;  %v782_v22 = vpop.f32.mrf.mxu0 }
 0x143   : > { %v868_v4 = vadd.f32 %v867_v33, %v4237_v10  ;;  %v783_v6 = vadd.f32 %v782_v22, %v4226_v2  ;;  %v811_v21 = vpop.f32.mrf.mxu1 }
 0x144   : > { %898 = vst [vmem:[#allocation3 + $0x10] sm:$0xff] %v839_v18  ;;  %v812_v20 = vadd.f32 %v811_v21, %v4229_v16 }
 0x145   : > { %899 = vst [vmem:[#allocation3 + $0x28] sm:$0xff] %v868_v4 }
 0x146   : > { %900 = vst [vmem:[#allocation3 + $0xa0] sm:$0xff] %v783_v6 }
 0x147   : > { %901 = vst [vmem:[#allocation3 + $0xf8] sm:$0xff] %v812_v20 }
 0x149   : > { %v840_v3 = vpop.f32.mrf.mxu2 }
 0x14a   : > { %v841_v5 = vadd.f32 %v840_v3, %v4234_v29  ;;  %v869_v23 = vpop.f32.mrf.mxu3 }
 0x14b   : > { %v870_v8 = vadd.f32 %v869_v23, %v4237_v10 }
 0x14c   : > { %902 = vst [vmem:[#allocation3 + $0x20] sm:$0xff] %v841_v5 }
 0x14d   : > { %903 = vst [vmem:[#allocation3 + $0x98] sm:$0xff] %v870_v8 }
 0x14e PF: > { %p2947_p7 = scmp.le.s32.totalorder %s3942_s19, 0 }
 0x150   : > { %907 = sbr.rel (%p2947_p7) target bundleno = 568 (0x238), region = 88 }
 0x155   : > { %v3078_v2 = vld [vmem:[%s4000_s22 + $0xe0] sm:$0xf]  ;;  %v3415_v16 = vld [vmem:[%s4000_s22 + $0xec] sm:$0xf0]  ;;  %v3413_v29 = vld [vmem:[%s4000_s22 + $0xe4] sm:$0xf] }
 0x156   : > { %v3079_v10 = vor.u32 %v3415_v16, %v3078_v2  ;;  %v3080_v7 = vld [vmem:[%s4000_s22 + $0xf0] sm:$0xf0]  ;;  %v3086_v19 = vld [vmem:[%s4000_s22 + $0xe8] sm:$0xf]  ;;  %v3416_v17 = vld [vmem:[%s4000_s22 + $0xf4] sm:$0xf0] }
 0x157   : > { %v3083_v12 = vor.u32 %v3413_v29, %v3080_v7  ;;  %v3087_v13 = vor.u32 %v3416_v17, %v3086_v19  ;;  %v3414_v11 = vld [vmem:[%s4000_s22 + $0xec] sm:$0xf]  ;;  %v3088_v15 = vld [vmem:[%s4000_s22 + $0xf8] sm:$0xf0]  ;;  %v3062_v24 = vld [vmem:[%s4000_s22 + $0xc0] sm:$0xf] }
 0x158   : > { %1141 = vmatpush.bf16.msra.mxu0 %v3079_v10  ;;  %v3091_v25 = vor.u32 %v3414_v11, %v3088_v15  ;;  %v3411_v14 = vld [vmem:[%s4000_s22 + $0xcc] sm:$0xf0]  ;;  %v3409_v18 = vld [vmem:[%s4000_s22 + $0xc4] sm:$0xf]  ;;  %v3064_v33 = vld [vmem:[%s4000_s22 + $0xd0] sm:$0xf0] }
 0x159   : > { %1170 = vmatpush.bf16.msra.mxu1 %v3083_v12  ;;  %1199 = vmatpush.bf16.msra.mxu2 %v3087_v13  ;;  %v3063_v22 = vor.u32 %v3411_v14, %v3062_v24  ;;  %v3067_v4 = vor.u32 %v3409_v18, %v3064_v33  ;;  %v3070_v6 = vld [vmem:[%s4000_s22 + $0xc8] sm:$0xf]  ;;  %v3412_v21 = vld [vmem:[%s4000_s22 + $0xd4] sm:$0xf0]  ;;  %v3410_v20 = vld [vmem:[%s4000_s22 + $0xcc] sm:$0xf] }
 0x15a   : > { %1228 = vmatpush.bf16.msra.mxu3 %v3091_v25  ;;  %v3071_v3 = vor.u32 %v3412_v21, %v3070_v6  ;;  %v3072_v5 = vld [vmem:[%s4000_s22 + $0xd8] sm:$0xf0]  ;;  %v3046_v23 = vld [vmem:[%s4000_s22 + $0xa0] sm:$0xf]  ;;  %v3407_v8 = vld [vmem:[%s4000_s22 + $0xac] sm:$0xf0] }
 0x15b   : > { %v3075_v2 = vor.u32 %v3410_v20, %v3072_v5  ;;  %v3405_v16 = vld [vmem:[%s4000_s22 + $0xa4] sm:$0xf]  ;;  %v3048_v29 = vld [vmem:[%s4000_s22 + $0xb0] sm:$0xf0]  ;;  %v3054_v10 = vld [vmem:[%s4000_s22 + $0xa8] sm:$0xf]  ;;  %v3047_v7 = vor.u32 %v3407_v8, %v3046_v23 }
 0x15c   : > { %1142 = vmatpush.bf16.msra.mxu0 %v3063_v22  ;;  %v3408_v19 = vld [vmem:[%s4000_s22 + $0xb4] sm:$0xf0]  ;;  %v3406_v17 = vld [vmem:[%s4000_s22 + $0xac] sm:$0xf]  ;;  %v3056_v12 = vld [vmem:[%s4000_s22 + $0xb8] sm:$0xf0]  ;;  %v3051_v13 = vor.u32 %v3405_v16, %v3048_v29 }
 0x15d   : > { %1171 = vmatpush.bf16.msra.mxu1 %v3067_v4  ;;  %1200 = vmatpush.bf16.msra.mxu2 %v3071_v3  ;;  %v3055_v11 = vor.u32 %v3408_v19, %v3054_v10  ;;  %v3030_v15 = vld [vmem:[%s4000_s22 + $0x80] sm:$0xf]  ;;  %v3403_v24 = vld [vmem:[%s4000_s22 + $0x8c] sm:$0xf0]  ;;  %v3401_v25 = vld [vmem:[%s4000_s22 + $0x84] sm:$0xf]  ;;  %v3059_v14 = vor.u32 %v3406_v17, %v3056_v12 }
 0x15e   : > { %1229 = vmatpush.bf16.msra.mxu3 %v3075_v2  ;;  %v3032_v18 = vld [vmem:[%s4000_s22 + $0x90] sm:$0xf0]  ;;  %v3038_v33 = vld [vmem:[%s4000_s22 + $0x88] sm:$0xf]  ;;  %v3404_v22 = vld [vmem:[%s4000_s22 + $0x94] sm:$0xf0]  ;;  %v3031_v21 = vor.u32 %v3403_v24, %v3030_v15 }
 0x15f   : > { %v3402_v6 = vld [vmem:[%s4000_s22 + $0x8c] sm:$0xf]  ;;  %v3040_v4 = vld [vmem:[%s4000_s22 + $0x98] sm:$0xf0]  ;;  %v3035_v20 = vor.u32 %v3401_v25, %v3032_v18  ;;  %v3039_v3 = vor.u32 %v3404_v22, %v3038_v33  ;;  %v3014_v5 = vld [vmem:[%s4000_s22 + $0x60] sm:$0xf] }
 0x160   : > { %1143 = vmatpush.bf16.msra.mxu0 %v3047_v7  ;;  %v3399_v23 = vld [vmem:[%s4000_s22 + $0x6c] sm:$0xf0]  ;;  %v3397_v8 = vld [vmem:[%s4000_s22 + $0x64] sm:$0xf]  ;;  %v3043_v2 = vor.u32 %v3402_v6, %v3040_v4  ;;  %v3016_v16 = vld [vmem:[%s4000_s22 + $0x70] sm:$0xf0] }
 0x161   : > { %1172 = vmatpush.bf16.msra.mxu1 %v3051_v13  ;;  %1201 = vmatpush.bf16.msra.mxu2 %v3055_v11  ;;  %v3022_v29 = vld [vmem:[%s4000_s22 + $0x68] sm:$0xf]  ;;  %v3400_v10 = vld [vmem:[%s4000_s22 + $0x74] sm:$0xf0]  ;;  %v3398_v7 = vld [vmem:[%s4000_s22 + $0x6c] sm:$0xf]  ;;  %v3015_v17 = vor.u32 %v3399_v23, %v3014_v5  ;;  %v3019_v12 = vor.u32 %v3397_v8, %v3016_v16 }
 0x162   : > { %1230 = vmatpush.bf16.msra.mxu3 %v3059_v14  ;;  %v3024_v19 = vld [vmem:[%s4000_s22 + $0x78] sm:$0xf0]  ;;  %v3023_v13 = vor.u32 %v3400_v10, %v3022_v29  ;;  %v2998_v11 = vld [vmem:[%s4000_s22 + $0x40] sm:$0xf]  ;;  %v3395_v15 = vld [vmem:[%s4000_s22 + $0x4c] sm:$0xf0] }
 0x163   : > { %v3393_v24 = vld [vmem:[%s4000_s22 + $0x44] sm:$0xf]  ;;  %v3027_v25 = vor.u32 %v3398_v7, %v3024_v19  ;;  %v3000_v14 = vld [vmem:[%s4000_s22 + $0x50] sm:$0xf0]  ;;  %v3006_v18 = vld [vmem:[%s4000_s22 + $0x48] sm:$0xf]  ;;  %v2999_v4 = vor.u32 %v3395_v15, %v2998_v11 }
 0x164   : > { %1144 = vmatpush.bf16.msra.mxu0 %v3031_v21  ;;  %v3396_v33 = vld [vmem:[%s4000_s22 + $0x54] sm:$0xf0]  ;;  %v3394_v22 = vld [vmem:[%s4000_s22 + $0x4c] sm:$0xf]  ;;  %v3008_v6 = vld [vmem:[%s4000_s22 + $0x58] sm:$0xf0]  ;;  %v3003_v21 = vor.u32 %v3393_v24, %v3000_v14 }
 0x165   : > { %1173 = vmatpush.bf16.msra.mxu1 %v3035_v20  ;;  %1202 = vmatpush.bf16.msra.mxu2 %v3039_v3  ;;  %v3007_v20 = vor.u32 %v3396_v33, %v3006_v18  ;;  %v2982_v3 = vld [vmem:[%s4000_s22 + $0x20] sm:$0xf]  ;;  %v3391_v5 = vld [vmem:[%s4000_s22 + $0x2c] sm:$0xf0]  ;;  %v3389_v23 = vld [vmem:[%s4000_s22 + $0x24] sm:$0xf]  ;;  %v3011_v8 = vor.u32 %v3394_v22, %v3008_v6 }
 0x166   : > { %1231 = vmatpush.bf16.msra.mxu3 %v3043_v2  ;;  %v2984_v2 = vld [vmem:[%s4000_s22 + $0x30] sm:$0xf0]  ;;  %v2990_v16 = vld [vmem:[%s4000_s22 + $0x28] sm:$0xf]  ;;  %v3392_v29 = vld [vmem:[%s4000_s22 + $0x34] sm:$0xf0]  ;;  %v2983_v19 = vor.u32 %v3391_v5, %v2982_v3 }
 0x167   : > { %v3390_v10 = vld [vmem:[%s4000_s22 + $0x2c] sm:$0xf]  ;;  %v2992_v7 = vld [vmem:[%s4000_s22 + $0x38] sm:$0xf0]  ;;  %v3387_v11 = vld [vmem:[%s4000_s22 + $0xc] sm:$0xf0] }
 0x168   : > { %1145 = vmatpush.bf16.msra.mxu0 %v3015_v17  ;;  %v2987_v17 = vor.u32 %v3389_v23, %v2984_v2  ;;  %v3385_v15 = vld [vmem:[%s4000_s22 + $0x4] sm:$0xf]  ;;  %v2995_v24 = vor.u32 %v3390_v10, %v2992_v7  ;;  %v2974_v14 = vld [vmem:[%s4000_s22 + $0x8] sm:$0xf]  ;;  %v3388_v18 = vld [vmem:[%s4000_s22 + $0x14] sm:$0xf0] }
 0x169   : > { %1174 = vmatpush.bf16.msra.mxu1 %v3019_v12  ;;  %1203 = vmatpush.bf16.msra.mxu2 %v3023_v13  ;;  %v2991_v12 = vor.u32 %v3392_v29, %v2990_v16  ;;  %v2966_v13 = vld [vmem:[%s4000_s22] sm:$0xf]  ;;  %v3386_v33 = vld [vmem:[%s4000_s22 + $0xc] sm:$0xf]  ;;  %v2976_v22 = vld [vmem:[%s4000_s22 + $0x18] sm:$0xf0]  ;;  %v2975_v3 = vor.u32 %v3388_v18, %v2974_v14 }
 0x16a   : > { %1232 = vmatpush.bf16.msra.mxu3 %v3027_v25  ;;  %v2968_v25 = vld [vmem:[%s4000_s22 + $0x10] sm:$0xf0]  ;;  %v2967_v6 = vor.u32 %v3387_v11, %v2966_v13  ;;  %v3382_v5 = vld [vmem:[#allocation2 + $0x8] sm:$0xff]  ;;  %v3383_v23 = vld [vmem:[#allocation2 + $0x10] sm:$0xff]  ;;  %v4335_v2 = vperm.slane %v4017_v1, 0  ;;  %v4338_v16 = vperm.slane %v4017_v1, 1 }
 0x16c   : > { %1146 = vmatpush.bf16.msra.mxu0 %v2999_v4  ;;  %v2971_v4 = vor.u32 %v3385_v15, %v2968_v25 }
 0x16d   : > { %1175 = vmatpush.bf16.msra.mxu1 %v3003_v21  ;;  %1204 = vmatpush.bf16.msra.mxu2 %v3007_v20  ;;  %v2979_v21 = vor.u32 %v3386_v33, %v2976_v22  ;;  %v3381_v20 = vld [vmem:[#allocation2] sm:$0xff] }
 0x16e   : > { %1233 = vmatpush.bf16.msra.mxu3 %v3011_v8  ;;  %v3384_v8 = vld [vmem:[#allocation2 + $0x18] sm:$0xff] }
 0x170   : > { %1147 = vmatpush.bf16.msra.mxu0 %v2983_v19 }
 0x171   : > { %1176 = vmatpush.bf16.msra.mxu1 %v2987_v17  ;;  %1205 = vmatpush.bf16.msra.mxu2 %v2991_v12  ;;  %v4343_v17 = vperm.slane %v4017_v1, 2  ;;  %v4346_v12 = vperm.slane %v4017_v1, 3 }
 0x172   : > { %1234 = vmatpush.bf16.msra.mxu3 %v2995_v24 }
 0x174   : > { %1148 = vmatpush.bf16.msra.mxu0 %v2967_v6 }
 0x175   : > { %1177 = vmatpush.bf16.msra.mxu1 %v2971_v4  ;;  %1206 = vmatpush.bf16.msra.mxu2 %v2975_v3 }
 0x176   : > { %1235 = vmatpush.bf16.msra.mxu3 %v2979_v21 }
 0x177   : > { %1149 = vmatmul.bf16.vlgmr.msra.gmra.mxu0 %v3381_v20 }
 0x178   : > { %1178 = vmatmul.bf16.vlgmr.msra.gmra.mxu1 %v3381_v20  ;;  %1207 = vmatmul.bf16.vlgmr.msra.gmra.mxu2 %v3381_v20 }
 0x179   : > { %1236 = vmatmul.bf16.vlgmr.msra.gmra.mxu3 %v3381_v20 }
 0x187   : > { %1154 = vmatmul.bf16.gmra.mxu0 %v3382_v5 }
 0x188   : > { %1183 = vmatmul.bf16.gmra.mxu1 %v3382_v5  ;;  %1212 = vmatmul.bf16.gmra.mxu2 %v3382_v5 }
 0x189   : > { %1241 = vmatmul.bf16.gmra.mxu3 %v3382_v5 }
 0x197   : > { %1159 = vmatmul.bf16.gmra.mxu0 %v3383_v23 }
 0x198   : > { %1188 = vmatmul.bf16.gmra.mxu1 %v3383_v23  ;;  %1217 = vmatmul.bf16.gmra.mxu2 %v3383_v23 }
 0x199   : > { %1246 = vmatmul.bf16.gmra.mxu3 %v3383_v23 }
 0x1a7   : > { %1164 = vmatmul.bf16.gmra.mxu0 %v3384_v8 }
 0x1a8   : > { %1193 = vmatmul.bf16.gmra.mxu1 %v3384_v8  ;;  %1222 = vmatmul.bf16.gmra.mxu2 %v3384_v8 }
 0x1a9   : > { %1251 = vmatmul.bf16.gmra.mxu3 %v3384_v8 }
 0x1f4   : > { %v1150_v29 = vpop.f32.mrf.mxu0 }
 0x1f5   : > { %v1151_v10 = vadd.f32 %v1150_v29, %v4335_v2  ;;  %v1179_v7 = vpop.f32.mrf.mxu1 }
 0x1f6   : > { %v1180_v19 = vadd.f32 %v1179_v7, %v4338_v16 }
 0x1f7   : > { %1257 = vst [vmem:[#allocation3 + $0xb0] sm:$0xff] %v1151_v10 }
 0x1f8   : > { %1258 = vst [vmem:[#allocation3] sm:$0xff] %v1180_v19 }
 0x1fb   : > { %v1208_v13 = vpop.f32.mrf.mxu2 }
 0x1fc   : > { %v1209_v11 = vadd.f32 %v1208_v13, %v4343_v17  ;;  %v1237_v15 = vpop.f32.mrf.mxu3  ;;  %v1152_v24 = vpop.f32.mrf.mxu0 }
 0x1fd   : > { %v1238_v25 = vadd.f32 %v1237_v15, %v4346_v12  ;;  %v1153_v14 = vadd.f32 %v1152_v24, %v4335_v2  ;;  %v1181_v18 = vpop.f32.mrf.mxu1 }
 0x1fe   : > { %1259 = vst [vmem:[#allocation3 + $0xd8] sm:$0xff] %v1209_v11  ;;  %v1182_v33 = vadd.f32 %v1181_v18, %v4338_v16 }
 0x1ff   : > { %1260 = vst [vmem:[#allocation3 + $0x18] sm:$0xff] %v1238_v25 }
 0x200   : > { %1261 = vst [vmem:[#allocation3 + $0x50] sm:$0xff] %v1153_v14 }
 0x201   : > { %1262 = vst [vmem:[#allocation3 + $0x68] sm:$0xff] %v1182_v33 }
 0x203   : > { %v1210_v22 = vpop.f32.mrf.mxu2 }
 0x204   : > { %v1211_v1 = vadd.f32 %v1210_v22, %v4343_v17  ;;  %v1239_v6 = vpop.f32.mrf.mxu3  ;;  %v1155_v4 = vpop.f32.mrf.mxu0 }
 0x205   : > { %v1240_v3 = vadd.f32 %v1239_v6, %v4346_v12  ;;  %v1156_v21 = vadd.f32 %v1155_v4, %v4335_v2  ;;  %v1184_v20 = vpop.f32.mrf.mxu1 }
 0x206   : > { %1263 = vst [vmem:[#allocation3 + $0x30] sm:$0xff] %v1211_v1  ;;  %v1185_v5 = vadd.f32 %v1184_v20, %v4338_v16 }
 0x207   : > { %1264 = vst [vmem:[#allocation3 + $0x48] sm:$0xff] %v1240_v3 }
 0x208   : > { %1265 = vst [vmem:[#allocation3 + $0x80] sm:$0xff] %v1156_v21 }
 0x209   : > { %1266 = vst [vmem:[#allocation3 + $0x88] sm:$0xff] %v1185_v5 }
 0x20b   : > { %v1213_v23 = vpop.f32.mrf.mxu2 }
 0x20c   : > { %v1214_v8 = vadd.f32 %v1213_v23, %v4343_v17  ;;  %v1242_v29 = vpop.f32.mrf.mxu3  ;;  %v1157_v10 = vpop.f32.mrf.mxu0 }
 0x20d   : > { %v1243_v7 = vadd.f32 %v1242_v29, %v4346_v12  ;;  %v1158_v19 = vadd.f32 %v1157_v10, %v4335_v2  ;;  %v1186_v13 = vpop.f32.mrf.mxu1 }
 0x20e   : > { %1267 = vst [vmem:[#allocation3 + $0xe8] sm:$0xff] %v1214_v8  ;;  %v1187_v11 = vadd.f32 %v1186_v13, %v4338_v16 }
 0x20f   : > { %1268 = vst [vmem:[#allocation3 + $0xb8] sm:$0xff] %v1243_v7 }
 0x210   : > { %1269 = vst [vmem:[#allocation3 + $0x60] sm:$0xff] %v1158_v19 }
 0x211   : > { %1270 = vst [vmem:[#allocation3 + $0xf0] sm:$0xff] %v1187_v11 }
 0x213   : > { %v1215_v15 = vpop.f32.mrf.mxu2 }
 0x214   : > { %v1216_v24 = vadd.f32 %v1215_v15, %v4343_v17  ;;  %v1244_v25 = vpop.f32.mrf.mxu3  ;;  %v1160_v14 = vpop.f32.mrf.mxu0 }
 0x215   : > { %v1245_v18 = vadd.f32 %v1244_v25, %v4346_v12  ;;  %v1161_v33 = vadd.f32 %v1160_v14, %v4335_v2  ;;  %v1189_v22 = vpop.f32.mrf.mxu1 }
 0x216   : > { %1271 = vst [vmem:[#allocation3 + $0x8] sm:$0xff] %v1216_v24  ;;  %v1190_v1 = vadd.f32 %v1189_v22, %v4338_v16 }
 0x217   : > { %1272 = vst [vmem:[#allocation3 + $0x78] sm:$0xff] %v1245_v18 }
 0x218   : > { %1273 = vst [vmem:[#allocation3 + $0x38] sm:$0xff] %v1161_v33 }
 0x219   : > { %1274 = vst [vmem:[#allocation3 + $0x58] sm:$0xff] %v1190_v1 }
 0x21b   : > { %v1218_v6 = vpop.f32.mrf.mxu2 }
 0x21c   : > { %v1219_v4 = vadd.f32 %v1218_v6, %v4343_v17  ;;  %v1247_v3 = vpop.f32.mrf.mxu3  ;;  %v1162_v21 = vpop.f32.mrf.mxu0 }
 0x21d   : > { %v1248_v20 = vadd.f32 %v1247_v3, %v4346_v12  ;;  %v1163_v5 = vadd.f32 %v1162_v21, %v4335_v2  ;;  %v1191_v23 = vpop.f32.mrf.mxu1 }
 0x21e   : > { %1275 = vst [vmem:[#allocation3 + $0x40] sm:$0xff] %v1219_v4  ;;  %v1192_v8 = vadd.f32 %v1191_v23, %v4338_v16 }
 0x21f   : > { %1276 = vst [vmem:[#allocation3 + $0xc8] sm:$0xff] %v1248_v20 }
 0x220   : > { %1277 = vst [vmem:[#allocation3 + $0xe0] sm:$0xff] %v1163_v5 }
 0x221   : > { %1278 = vst [vmem:[#allocation3 + $0x90] sm:$0xff] %v1192_v8 }
 0x223   : > { %v1220_v29 = vpop.f32.mrf.mxu2 }
 0x224   : > { %v1221_v10 = vadd.f32 %v1220_v29, %v4343_v17  ;;  %v1249_v7 = vpop.f32.mrf.mxu3  ;;  %v1165_v19 = vpop.f32.mrf.mxu0 }
 0x225   : > { %v1250_v13 = vadd.f32 %v1249_v7, %v4346_v12  ;;  %v1166_v11 = vadd.f32 %v1165_v19, %v4335_v2  ;;  %v1194_v15 = vpop.f32.mrf.mxu1 }
 0x226   : > { %1279 = vst [vmem:[#allocation3 + $0x70] sm:$0xff] %v1221_v10  ;;  %v1195_v24 = vadd.f32 %v1194_v15, %v4338_v16 }
 0x227   : > { %1280 = vst [vmem:[#allocation3 + $0xc0] sm:$0xff] %v1250_v13 }
 0x228   : > { %1281 = vst [vmem:[#allocation3 + $0xa8] sm:$0xff] %v1166_v11 }
 0x229   : > { %1282 = vst [vmem:[#allocation3 + $0xd0] sm:$0xff] %v1195_v24 }
 0x22b   : > { %v1223_v25 = vpop.f32.mrf.mxu2 }
 0x22c   : > { %v1224_v14 = vadd.f32 %v1223_v25, %v4343_v17  ;;  %v1252_v18 = vpop.f32.mrf.mxu3  ;;  %v1167_v33 = vpop.f32.mrf.mxu0 }
 0x22d   : > { %v1253_v22 = vadd.f32 %v1252_v18, %v4346_v12  ;;  %v1168_v1 = vadd.f32 %v1167_v33, %v4335_v2  ;;  %v1196_v6 = vpop.f32.mrf.mxu1 }
 0x22e   : > { %1283 = vst [vmem:[#allocation3 + $0x10] sm:$0xff] %v1224_v14  ;;  %v1197_v4 = vadd.f32 %v1196_v6, %v4338_v16 }
 0x22f   : > { %1284 = vst [vmem:[#allocation3 + $0x28] sm:$0xff] %v1253_v22 }
 0x230   : > { %1285 = vst [vmem:[#allocation3 + $0xa0] sm:$0xff] %v1168_v1 }
 0x231   : > { %1286 = vst [vmem:[#allocation3 + $0xf8] sm:$0xff] %v1197_v4 }
 0x233   : > { %v1225_v3 = vpop.f32.mrf.mxu2 }
 0x234   : > { %v1226_v21 = vadd.f32 %v1225_v3, %v4343_v17  ;;  %v1254_v20 = vpop.f32.mrf.mxu3 }
 0x235   : > { %v1255_v5 = vadd.f32 %v1254_v20, %v4346_v12 }
 0x236   : > { %1287 = vst [vmem:[#allocation3 + $0x20] sm:$0xff] %v1226_v21 }
 0x237   : > { %1288 = vst [vmem:[#allocation3 + $0x98] sm:$0xff] %v1255_v5 }
 0x238 PF: > { %v4380_v23 = vor.u32 %v4203_v63, %v4191_v59  ;;  %v4384_v2 = vor.u32 %v4188_v58, %v4200_v62  ;;  %v4388_v16 = vor.u32 %v4194_v60, %v4206_v0  ;;  %v4392_v17 = vor.u32 %v4209_v9, %v4197_v61  ;;  %v4913_v61 = vld [vmem:[#allocation28_spill] sm:$0xff]  ;;  %v4914_v63 = vld [vmem:[#allocation34_spill] sm:$0xff]  ;;  %v4916_v8 = vld [vmem:[#allocation31_spill] sm:$0xff]  ;;  %p3244_p0 = scmp.ne.s32.totalorder %s3942_s19, 1 }
 0x239   : > { %v4398_v59 = vor.u32 %v4179_v55, %v4167_v51  ;;  %v4402_v58 = vor.u32 %v4164_v50, %v4176_v54  ;;  %v4407_v60 = vor.u32 %v4170_v52, %v4182_v56  ;;  %v4412_v9 = vor.u32 %v4185_v57, %v4173_v53  ;;  %v4910_v54 = vld [vmem:[#allocation29_spill] sm:$0xff]  ;;  %v4912_v57 = vld [vmem:[#allocation32_spill] sm:$0xff]  ;;  %v4915_v0 = vld [vmem:[#allocation30_spill] sm:$0xff] }
 0x23a   : > { %1455 = vmatpush.bf16.msra.mxu0 %v4380_v23  ;;  %1468 = vmatpush.bf16.msra.mxu1 %v4384_v2  ;;  %v4418_v50 = vor.u32 %v4155_v47, %v4143_v43  ;;  %v4422_v51 = vor.u32 %v4140_v42, %v4152_v46  ;;  %v4427_v52 = vor.u32 %v4146_v44, %v4158_v48  ;;  %v4908_v47 = vld [vmem:[#allocation39_spill] sm:$0xff]  ;;  %v4911_v55 = vld [vmem:[#allocation33_spill] sm:$0xff]  ;;  %v4920_v11 = vld [vmem:[#allocation24_spill] sm:$0xff] }
 0x23b   : > { %1494 = vmatpush.bf16.msra.mxu3 %v4388_v16  ;;  %1481 = vmatpush.bf16.msra.mxu2 %v4392_v17  ;;  %v4432_v53 = vor.u32 %v4161_v49, %v4149_v45  ;;  %v4438_v42 = vor.u32 %v4131_v39, %v4119_v35  ;;  %v4442_v43 = vor.u32 %v4116_v34, %v4128_v38  ;;  %v4901_v38 = vld [vmem:[#allocation45_spill] sm:$0xff]  ;;  %v4909_v48 = vld [vmem:[#allocation43_spill] sm:$0xff]  ;;  %v4921_v15 = vld [vmem:[#allocation20_spill] sm:$0xff] }
 0x23c   : > { %v4447_v44 = vor.u32 %v4122_v36, %v4134_v40  ;;  %v4452_v45 = vor.u32 %v4137_v41, %v4125_v37  ;;  %v4458_v34 = vor.u32 %v4107_v31, %v4095_v27  ;;  %v4462_v35 = vor.u32 %v4092_v26, %v4104_v30  ;;  %v4900_v37 = vld [vmem:[#allocation44_spill] sm:$0xff]  ;;  %v4902_v27 = vld [vmem:[#allocation37_spill] sm:$0xff]  ;;  %v4917_v29 = vld [vmem:[#allocation35_spill] sm:$0xff] }
 0x23d   : > { %v4467_v36 = vor.u32 %v4098_v28, %v4110_v32  ;;  %v4472_v39 = vor.u32 %v4901_v38, %v4900_v37  ;;  %v4903_v31 = vld [vmem:[#allocation41_spill] sm:$0xff]  ;;  %v4904_v30 = vld [vmem:[#allocation40_spill] sm:$0xff]  ;;  %v4906_v28 = vld [vmem:[#allocation42_spill] sm:$0xff]  ;;  %v4492_v49 = vor.u32 %v4909_v48, %v4908_v47  ;;  %v4498_v56 = vor.u32 %v4911_v55, %v4910_v54 }
 0x23e   : > { %1456 = vmatpush.bf16.msra.mxu0 %v4398_v59  ;;  %1469 = vmatpush.bf16.msra.mxu1 %v4402_v58  ;;  %v4478_v26 = vor.u32 %v4903_v31, %v4902_v27  ;;  %v4905_v40 = vld [vmem:[#allocation36_spill] sm:$0xff]  ;;  %v4907_v32 = vld [vmem:[#allocation38_spill] sm:$0xff]  ;;  %v4502_v62 = vor.u32 %v4913_v61, %v4912_v57  ;;  %v4507_v12 = vor.u32 %v4915_v0, %v4914_v63  ;;  %v4918_v7 = vld [vmem:[#allocation21_spill] sm:$0xff] }
 0x23f   : > { %1495 = vmatpush.bf16.msra.mxu3 %v4407_v60  ;;  %1482 = vmatpush.bf16.msra.mxu2 %v4412_v9  ;;  %v4482_v41 = vor.u32 %v4905_v40, %v4904_v30  ;;  %v4487_v46 = vor.u32 %v4907_v32, %v4906_v28  ;;  %v4512_v10 = vor.u32 %v4917_v29, %v4916_v8  ;;  %v4919_v19 = vld [vmem:[#allocation25_spill] sm:$0xff]  ;;  %v1293_v25 = vld [vmem:[#allocation4] sm:$0xff]  ;;  %v4924_v22 = vld [vmem:[#allocation23_spill] sm:$0xff] }
 0x240   : > { %v4518_v13 = vor.u32 %v4919_v19, %v4918_v7  ;;  %v4522_v24 = vor.u32 %v4921_v15, %v4920_v11  ;;  %v4922_v14 = vld [vmem:[#allocation26_spill] sm:$0xff]  ;;  %v4925_v1 = vld [vmem:[#allocation27_spill] sm:$0xff]  ;;  %v1294_v4 = vpack.c.bf16 %v1293_v25, %v1293_v25  ;;  %v1289_v3 = vld [vmem:[#allocation3 + $0xb0] sm:$0xff] }
 0x241   : > { %v4923_v18 = vld [vmem:[#allocation22_spill] sm:$0xff]  ;;  %v4532_v6 = vor.u32 %v4925_v1, %v4924_v22  ;;  %v1292_v30 = vld [vmem:[#allocation3 + $0x18] sm:$0xff] }
 0x242   : > { %1457 = vmatpush.bf16.msra.mxu0 %v4418_v50  ;;  %1470 = vmatpush.bf16.msra.mxu1 %v4422_v51  ;;  %v4527_v33 = vor.u32 %v4923_v18, %v4922_v14  ;;  %v1290_v21 = vld [vmem:[#allocation3] sm:$0xff]  ;;  %v1291_v0 = vld [vmem:[#allocation3 + $0xd8] sm:$0xff] }
 0x243   : > { %1496 = vmatpush.bf16.msra.mxu3 %v4427_v52  ;;  %1483 = vmatpush.bf16.msra.mxu2 %v4432_v53 }
 0x246   : > { %1458 = vmatpush.bf16.msra.mxu0 %v4438_v42  ;;  %1471 = vmatpush.bf16.msra.mxu1 %v4442_v43 }
 0x247   : > { %1497 = vmatpush.bf16.msra.mxu3 %v4447_v44  ;;  %1484 = vmatpush.bf16.msra.mxu2 %v4452_v45 }
 0x24a   : > { %1459 = vmatpush.bf16.msra.mxu0 %v4458_v34  ;;  %1472 = vmatpush.bf16.msra.mxu1 %v4462_v35 }
 0x24b   : > { %1498 = vmatpush.bf16.msra.mxu3 %v4467_v36  ;;  %1485 = vmatpush.bf16.msra.mxu2 %v4472_v39 }
 0x24e   : > { %1460 = vmatpush.bf16.msra.mxu0 %v4478_v26  ;;  %1473 = vmatpush.bf16.msra.mxu1 %v4482_v41 }
 0x24f   : > { %1499 = vmatpush.bf16.msra.mxu3 %v4487_v46  ;;  %1486 = vmatpush.bf16.msra.mxu2 %v4492_v49 }
 0x252   : > { %1461 = vmatpush.bf16.msra.mxu0 %v4498_v56  ;;  %1474 = vmatpush.bf16.msra.mxu1 %v4502_v62 }
 0x253   : > { %1500 = vmatpush.bf16.msra.mxu3 %v4507_v12  ;;  %1487 = vmatpush.bf16.msra.mxu2 %v4512_v10 }
 0x256   : > { %1462 = vmatpush.bf16.msra.mxu0 %v4518_v13  ;;  %1475 = vmatpush.bf16.msra.mxu1 %v4522_v24 }
 0x257   : > { %1501 = vmatpush.bf16.msra.mxu3 %v4527_v33  ;;  %1488 = vmatpush.bf16.msra.mxu2 %v4532_v6 }
 0x259   : > { %1463 = vmatmul.bf16.vlgmr.msra.gmra.mxu0 %v1294_v4  ;;  %1476 = vmatmul.bf16.vlgmr.msra.gmra.mxu1 %v1294_v4 }
 0x25a   : > { %1585 = vmatpush.bf16.msrb.mxu0 %v4380_v23  ;;  %1598 = vmatpush.bf16.msrb.mxu1 %v4384_v2 }
 0x25b   : > { %1502 = vmatmul.bf16.vlgmr.msra.gmra.mxu3 %v1294_v4  ;;  %1489 = vmatmul.bf16.vlgmr.msra.gmra.mxu2 %v1294_v4 }
 0x25c   : > { %1611 = vmatpush.bf16.msrb.mxu2 %v4392_v17  ;;  %1624 = vmatpush.bf16.msrb.mxu3 %v4388_v16 }
 0x25e   : > { %1586 = vmatpush.bf16.msrb.mxu0 %v4398_v59  ;;  %1599 = vmatpush.bf16.msrb.mxu1 %v4402_v58 }
 0x260   : > { %1612 = vmatpush.bf16.msrb.mxu2 %v4412_v9  ;;  %1625 = vmatpush.bf16.msrb.mxu3 %v4407_v60 }
 0x262   : > { %1587 = vmatpush.bf16.msrb.mxu0 %v4418_v50  ;;  %1600 = vmatpush.bf16.msrb.mxu1 %v4422_v51 }
 0x264   : > { %1613 = vmatpush.bf16.msrb.mxu2 %v4432_v53  ;;  %1626 = vmatpush.bf16.msrb.mxu3 %v4427_v52 }
 0x266   : > { %1588 = vmatpush.bf16.msrb.mxu0 %v4438_v42  ;;  %1601 = vmatpush.bf16.msrb.mxu1 %v4442_v43 }
 0x268   : > { %1614 = vmatpush.bf16.msrb.mxu2 %v4452_v45  ;;  %1627 = vmatpush.bf16.msrb.mxu3 %v4447_v44 }
 0x26a   : > { %1589 = vmatpush.bf16.msrb.mxu0 %v4458_v34  ;;  %1602 = vmatpush.bf16.msrb.mxu1 %v4462_v35 }
 0x26c   : > { %1615 = vmatpush.bf16.msrb.mxu2 %v4472_v39  ;;  %1628 = vmatpush.bf16.msrb.mxu3 %v4467_v36 }
 0x26e   : > { %1590 = vmatpush.bf16.msrb.mxu0 %v4478_v26  ;;  %1603 = vmatpush.bf16.msrb.mxu1 %v4482_v41 }
 0x270   : > { %1616 = vmatpush.bf16.msrb.mxu2 %v4492_v49  ;;  %1629 = vmatpush.bf16.msrb.mxu3 %v4487_v46 }
 0x272   : > { %1591 = vmatpush.bf16.msrb.mxu0 %v4498_v56  ;;  %1604 = vmatpush.bf16.msrb.mxu1 %v4502_v62 }
 0x274   : > { %1617 = vmatpush.bf16.msrb.mxu2 %v4512_v10  ;;  %1630 = vmatpush.bf16.msrb.mxu3 %v4507_v12 }
 0x276   : > { %1592 = vmatpush.bf16.msrb.mxu0 %v4518_v13  ;;  %1605 = vmatpush.bf16.msrb.mxu1 %v4522_v24 }
 0x278   : > { %1618 = vmatpush.bf16.msrb.mxu2 %v4532_v6  ;;  %1631 = vmatpush.bf16.msrb.mxu3 %v4527_v33 }
 0x27a   : > { %1715 = vmatpush.bf16.msra.mxu0 %v4380_v23  ;;  %1728 = vmatpush.bf16.msra.mxu1 %v4384_v2 }
 0x27c   : > { %1741 = vmatpush.bf16.msra.mxu2 %v4392_v17  ;;  %1754 = vmatpush.bf16.msra.mxu3 %v4388_v16 }
 0x27e   : > { %1716 = vmatpush.bf16.msra.mxu0 %v4398_v59  ;;  %1729 = vmatpush.bf16.msra.mxu1 %v4402_v58 }
 0x280   : > { %1742 = vmatpush.bf16.msra.mxu2 %v4412_v9  ;;  %1755 = vmatpush.bf16.msra.mxu3 %v4407_v60 }
 0x282   : > { %1717 = vmatpush.bf16.msra.mxu0 %v4418_v50  ;;  %1730 = vmatpush.bf16.msra.mxu1 %v4422_v51 }
 0x284   : > { %1743 = vmatpush.bf16.msra.mxu2 %v4432_v53  ;;  %1756 = vmatpush.bf16.msra.mxu3 %v4427_v52 }
 0x286   : > { %1718 = vmatpush.bf16.msra.mxu0 %v4438_v42  ;;  %1731 = vmatpush.bf16.msra.mxu1 %v4442_v43 }
 0x288   : > { %1744 = vmatpush.bf16.msra.mxu2 %v4452_v45  ;;  %1757 = vmatpush.bf16.msra.mxu3 %v4447_v44 }
 0x28a   : > { %1719 = vmatpush.bf16.msra.mxu0 %v4458_v34  ;;  %1732 = vmatpush.bf16.msra.mxu1 %v4462_v35 }
 0x28c   : > { %1745 = vmatpush.bf16.msra.mxu2 %v4472_v39  ;;  %1758 = vmatpush.bf16.msra.mxu3 %v4467_v36 }
 0x28e   : > { %1720 = vmatpush.bf16.msra.mxu0 %v4478_v26  ;;  %1733 = vmatpush.bf16.msra.mxu1 %v4482_v41 }
 0x290   : > { %1746 = vmatpush.bf16.msra.mxu2 %v4492_v49  ;;  %1759 = vmatpush.bf16.msra.mxu3 %v4487_v46 }
 0x292   : > { %1721 = vmatpush.bf16.msra.mxu0 %v4498_v56  ;;  %1734 = vmatpush.bf16.msra.mxu1 %v4502_v62 }
 0x294   : > { %1747 = vmatpush.bf16.msra.mxu2 %v4512_v10  ;;  %1760 = vmatpush.bf16.msra.mxu3 %v4507_v12 }
 0x296   : > { %1722 = vmatpush.bf16.msra.mxu0 %v4518_v13  ;;  %1735 = vmatpush.bf16.msra.mxu1 %v4522_v24 }
 0x298   : > { %1748 = vmatpush.bf16.msra.mxu2 %v4532_v6  ;;  %1761 = vmatpush.bf16.msra.mxu3 %v4527_v33 }
 0x2d6   : > { %v1464_v20 = vpop.f32.mrf.mxu0  ;;  %v1477_v5 = vpop.f32.mrf.mxu1 }
 0x2d7   : > { %v1507_v37 = vadd.f32 %v1464_v20, %v1289_v3  ;;  %v1508_v38 = vadd.f32 %v1477_v5, %v1290_v21 }
 0x2d9   : > { %v3220_v27 = vmul.f32 -1.442695, %v1507_v37  ;;  %v3221_v31 = vmul.f32 -1.442695, %v1508_v38 }
 0x2db   : > { %3503 = vpow2.f32 %v3220_v27 }
 0x2dc   : > { %3505 = vpow2.f32 %v3221_v31 }
 0x2de   : > { %v1503_v40 = vpop.f32.mrf.mxu3  ;;  %v1490_v28 = vpop.f32.mrf.mxu2 }
 0x2df   : > { %v1510_v32 = vadd.f32 %v1503_v40, %v1292_v30  ;;  %v1466_v47 = vpop.f32.mrf.mxu0  ;;  %v1479_v48 = vpop.f32.mrf.mxu1  ;;  %v1509_v19 = vadd.f32 %v1490_v28, %v1291_v0 }
 0x2e0   : > { %v1569_v48 = vld [vmem:[#allocation5] sm:$0xff] }
 0x2e1   : > { %v3222_v54 = vmul.f32 -1.442695, %v1510_v32  ;;  %v3504_v55 = vpop.eup %3503 }
 0x2e2   : > { %v3506_v57 = vpop.eup %3505  ;;  %v1514_v61 = vadd.f32 1.0, %v3504_v55 }
 0x2e3   : > { %3507 = vpow2.f32 %v3222_v54  ;;  %v1533_v63 = vadd.f32 1.0, %v3506_v57 }
 0x2e4   : > { %3509 = vrcp.f32 %v1514_v61  ;;  %v1526_v4 = vand.u32 2147483648, %v1514_v61  ;;  %v1524_v20 = vand.u32 2147483647, %v1514_v61  ;;  %vm1520_vm2 = vweird.f32 %v1514_v61 }
 0x2e5   : > { %3511 = vrcp.f32 %v1533_v63  ;;  %v1545_v3 = vand.u32 2147483648, %v1533_v63  ;;  %v1543_v37 = vand.u32 2147483647, %v1533_v63  ;;  %vm1539_vm3 = vweird.f32 %v1533_v63 }
 0x2e6   : > { %v1505_v8 = vpop.f32.mrf.mxu3  ;;  %v1492_v29 = vpop.f32.mrf.mxu2  ;;  %v1527_v40 = vor.u32 1.1754944e-38, %v1526_v4  ;;  %vm1525_vm6 = vcmp.eq.f32.partialorder %v1524_v20, 8.507059e+37 }
 0x2e7   : > { %v1546_v32 = vor.u32 1.1754944e-38, %v1545_v3  ;;  %vm1544_vm7 = vcmp.eq.f32.partialorder %v1543_v37, 8.507059e+37  ;;  %v1580_v3 = vld [vmem:[#allocation3 + $0x68] sm:$0xff] }
 0x2e9   : > { %v3508_v7 = vpop.eup %3507 }
 0x2ea   : > { %v1553_v11 = vadd.f32 1.0, %v3508_v7  ;;  %v3510_v15 = vpop.eup %3509 }
 0x2eb   : > { %v3512_v25 = vpop.eup %3511  ;;  %v1516_v14 = vmul.f32 %v3510_v15, %v1514_v61  ;;  %vm1521_vm0 = vweird.f32 %v3510_v15 }
 0x2ec   : > { %3513 = vrcp.f32 %v1553_v11  ;;  %v1535_v18 = vmul.f32 %v3512_v25, %v1533_v63  ;;  %vm1540_vm1 = vweird.f32 %v3512_v25  ;;  %vm1522_vm4 = vmor %vm1520_vm2, %vm1521_vm0  ;;  %vm1559_vm9 = vweird.f32 %v1553_v11 }
 0x2ed   : > { %3515 = vtanh.f32 %v1509_v19  ;;  %v1517_v22 = vsub.f32 1.0, %v1516_v14  ;;  %vm1541_vm5 = vmor %vm1539_vm3, %vm1540_vm1  ;;  %v1565_v19 = vand.u32 2147483648, %v1553_v11  ;;  %v1563_v14 = vand.u32 2147483647, %v1553_v11 }
 0x2ee   : > { %v1536_v1 = vsub.f32 1.0, %v1535_v18 }
 0x2ef   : > { %v1518_v21 = vmul.f32 %v3510_v15, %v1517_v22  ;;  %v1566_v18 = vor.u32 1.1754944e-38, %v1565_v19  ;;  %vm1564_vm11 = vcmp.eq.f32.partialorder %v1563_v14, 8.507059e+37 }
 0x2f0   : > { %v1537_v5 = vmul.f32 %v3512_v25, %v1536_v1 }
 0x2f1   : > { %v1519_v27 = vadd.f32 %v3510_v15, %v1518_v21 }
 0x2f2   : > { %v3514_v38 = vpop.eup %3513  ;;  %v1538_v28 = vadd.f32 %v3512_v25, %v1537_v5 }
 0x2f3   : > { %v3516_v31 = vpop.eup %3515  ;;  %v1555_v30 = vmul.f32 %v3514_v38, %v1553_v11  ;;  %v1523_v47 = vsel %vm1522_vm4, %v3510_v15, %v1519_v27  ;;  %vm1560_vm8 = vweird.f32 %v3514_v38  ;;  %v1579_v11 = vld [vmem:[#allocation3 + $0x50] sm:$0xff] }
 0x2f4   : > { %v1528_v55 = vsel %vm1525_vm6, %v1527_v40, %v1523_v47  ;;  %v1542_v57 = vsel %vm1541_vm5, %v3512_v25, %v1538_v28  ;;  %vm1561_vm10 = vmor %vm1559_vm9, %vm1560_vm8 }
 0x2f5   : > { %v1556_v54 = vsub.f32 1.0, %v1555_v30  ;;  %v1547_v0 = vsel %vm1544_vm7, %v1546_v32, %v1542_v57  ;;  %v1571_v8 = vmul.f32 %v3516_v31, %v1528_v55  ;;  %v1582_v31 = vld [vmem:[#allocation3 + $0x48] sm:$0xff] }
 0x2f6   : > { %v1570_v7 = vmul.f32 %v1569_v48, %v1547_v0 }
 0x2f7   : > { %v1557_v29 = vmul.f32 %v3514_v38, %v1556_v54 }
 0x2f8   : > { %v4602_v61 = vadd.f32 %v1571_v8, %v1570_v7  ;;  %v1581_v7 = vld [vmem:[#allocation3 + $0x30] sm:$0xff] }
 0x2f9   : > { %v1558_v63 = vadd.f32 %v3514_v38, %v1557_v29 }
 0x2fa   : > { %3517 = vtanh.f32 %v4602_v61 }
 0x2fb   : > { %v1562_v15 = vsel %vm1561_vm10, %v3514_v38, %v1558_v63 }
 0x2fc   : > { %v1567_v25 = vsel %vm1564_vm11, %v1566_v18, %v1562_v15 }
 0x300   : > { %v3518_v22 = vpop.eup %3517 }
 0x301   : > { %v1574_v1 = vmul.f32 %v3518_v22, %v1567_v25 }
 0x303   : > { %v1577_v4 = vpack.c.bf16 %v1574_v1, %v1574_v1 }
 0x305   : > { %1578 = vst [vmem:[#allocation2] sm:$0xf] %v1577_v4  ;;  %1593 = vmatmul.bf16.vlgmr.msrb.gmra.mxu0 %v1577_v4  ;;  %1606 = vmatmul.bf16.vlgmr.msrb.gmra.mxu1 %v1577_v4 }
 0x306   : > { %1619 = vmatmul.bf16.vlgmr.msrb.gmra.mxu2 %v1577_v4  ;;  %1632 = vmatmul.bf16.vlgmr.msrb.gmra.mxu3 %v1577_v4 }
 0x307   : > { %1845 = vmatpush.bf16.msrb.mxu0 %v4380_v23  ;;  %1858 = vmatpush.bf16.msrb.mxu1 %v4384_v2 }
 0x308   : > { %1871 = vmatpush.bf16.msrb.mxu2 %v4392_v17  ;;  %1884 = vmatpush.bf16.msrb.mxu3 %v4388_v16 }
 0x30b   : > { %1846 = vmatpush.bf16.msrb.mxu0 %v4398_v59  ;;  %1859 = vmatpush.bf16.msrb.mxu1 %v4402_v58 }
 0x30c   : > { %1872 = vmatpush.bf16.msrb.mxu2 %v4412_v9  ;;  %1885 = vmatpush.bf16.msrb.mxu3 %v4407_v60 }
 0x30f   : > { %1847 = vmatpush.bf16.msrb.mxu0 %v4418_v50  ;;  %1860 = vmatpush.bf16.msrb.mxu1 %v4422_v51 }
 0x310   : > { %1873 = vmatpush.bf16.msrb.mxu2 %v4432_v53  ;;  %1886 = vmatpush.bf16.msrb.mxu3 %v4427_v52 }
 0x313   : > { %1848 = vmatpush.bf16.msrb.mxu0 %v4438_v42  ;;  %1861 = vmatpush.bf16.msrb.mxu1 %v4442_v43 }
 0x314   : > { %1874 = vmatpush.bf16.msrb.mxu2 %v4452_v45  ;;  %1887 = vmatpush.bf16.msrb.mxu3 %v4447_v44 }
 0x317   : > { %1849 = vmatpush.bf16.msrb.mxu0 %v4458_v34  ;;  %1862 = vmatpush.bf16.msrb.mxu1 %v4462_v35 }
 0x318   : > { %1875 = vmatpush.bf16.msrb.mxu2 %v4472_v39  ;;  %1888 = vmatpush.bf16.msrb.mxu3 %v4467_v36 }
 0x31b   : > { %1850 = vmatpush.bf16.msrb.mxu0 %v4478_v26  ;;  %1863 = vmatpush.bf16.msrb.mxu1 %v4482_v41 }
 0x31c   : > { %1876 = vmatpush.bf16.msrb.mxu2 %v4492_v49  ;;  %1889 = vmatpush.bf16.msrb.mxu3 %v4487_v46 }
 0x31f   : > { %1851 = vmatpush.bf16.msrb.mxu0 %v4498_v56  ;;  %1864 = vmatpush.bf16.msrb.mxu1 %v4502_v62 }
 0x320   : > { %1877 = vmatpush.bf16.msrb.mxu2 %v4512_v10  ;;  %1890 = vmatpush.bf16.msrb.mxu3 %v4507_v12 }
 0x323   : > { %1852 = vmatpush.bf16.msrb.mxu0 %v4518_v13  ;;  %1865 = vmatpush.bf16.msrb.mxu1 %v4522_v24 }
 0x324   : > { %1878 = vmatpush.bf16.msrb.mxu2 %v4532_v6  ;;  %1891 = vmatpush.bf16.msrb.mxu3 %v4527_v33 }
 0x382   : > { %v1594_v21 = vpop.f32.mrf.mxu0  ;;  %v1607_v20 = vpop.f32.mrf.mxu1 }
 0x383   : > { %v1637_v5 = vadd.f32 %v1594_v21, %v1579_v11  ;;  %v1638_v37 = vadd.f32 %v1607_v20, %v1580_v3 }
 0x385   : > { %v3223_v38 = vmul.f32 -1.442695, %v1637_v5  ;;  %v3224_v27 = vmul.f32 -1.442695, %v1638_v37 }
 0x387   : > { %3519 = vpow2.f32 %v3223_v38 }
 0x388   : > { %3521 = vpow2.f32 %v3224_v27 }
 0x389   : > { %v1620_v30 = vpop.f32.mrf.mxu2  ;;  %v1633_v40 = vpop.f32.mrf.mxu3 }
 0x38a   : > { %v1640_v28 = vadd.f32 %v1633_v40, %v1582_v31  ;;  %v1596_v32 = vpop.f32.mrf.mxu0  ;;  %v1609_v47 = vpop.f32.mrf.mxu1  ;;  %v1639_v15 = vadd.f32 %v1620_v30, %v1581_v7 }
 0x38c   : > { %v3225_v48 = vmul.f32 -1.442695, %v1640_v28 }
 0x38d   : > { %v3520_v54 = vpop.eup %3519 }
 0x38e   : > { %v3522_v55 = vpop.eup %3521  ;;  %v1644_v57 = vadd.f32 1.0, %v3520_v54  ;;  %3523 = vpow2.f32 %v3225_v48 }
 0x38f   : > { %v1663_v0 = vadd.f32 1.0, %v3522_v55 }
 0x390   : > { %3525 = vrcp.f32 %v1644_v57  ;;  %v1656_v11 = vand.u32 2147483648, %v1644_v57  ;;  %v1654_v20 = vand.u32 2147483647, %v1644_v57  ;;  %vm1650_vm14 = vweird.f32 %v1644_v57 }
 0x391   : > { %3527 = vrcp.f32 %v1663_v0  ;;  %v1622_v8 = vpop.f32.mrf.mxu2  ;;  %v1635_v29 = vpop.f32.mrf.mxu3  ;;  %v1675_v3 = vand.u32 2147483648, %v1663_v0  ;;  %v1673_v37 = vand.u32 2147483647, %v1663_v0  ;;  %vm1669_vm15 = vweird.f32 %v1663_v0 }
 0x392   : > { %v1657_v31 = vor.u32 1.1754944e-38, %v1656_v11  ;;  %vm1655_vm2 = vcmp.eq.f32.partialorder %v1654_v20, 8.507059e+37 }
 0x393   : > { %v1676_v28 = vor.u32 1.1754944e-38, %v1675_v3  ;;  %vm1674_vm3 = vcmp.eq.f32.partialorder %v1673_v37, 8.507059e+37 }
 0x394   : > { %v3524_v63 = vpop.eup %3523 }
 0x395   : > { %v1683_v19 = vadd.f32 1.0, %v3524_v63 }
 0x396   : > { %v3526_v14 = vpop.eup %3525 }
 0x397   : > { %v3528_v18 = vpop.eup %3527  ;;  %v1646_v22 = vmul.f32 %v3526_v14, %v1644_v57  ;;  %3529 = vrcp.f32 %v1683_v19  ;;  %vm1651_vm12 = vweird.f32 %v3526_v14  ;;  %vm1689_vm5 = vweird.f32 %v1683_v19 }
 0x398   : > { %v1665_v25 = vmul.f32 %v3528_v18, %v1663_v0  ;;  %3531 = vtanh.f32 %v1639_v15  ;;  %vm1670_vm13 = vweird.f32 %v3528_v18  ;;  %vm1652_vm0 = vmor %vm1650_vm14, %vm1651_vm12  ;;  %v1695_v15 = vand.u32 2147483648, %v1683_v19 }
 0x399   : > { %v1647_v1 = vsub.f32 1.0, %v1646_v22  ;;  %vm1671_vm1 = vmor %vm1669_vm15, %vm1670_vm13 }
 0x39a   : > { %v1666_v4 = vsub.f32 1.0, %v1665_v25  ;;  %v1696_v25 = vor.u32 1.1754944e-38, %v1695_v15 }
 0x39b   : > { %v1648_v21 = vmul.f32 %v3526_v14, %v1647_v1 }
 0x39c   : > { %v1667_v5 = vmul.f32 %v3528_v18, %v1666_v4 }
 0x39d   : > { %v3530_v38 = vpop.eup %3529  ;;  %v1649_v27 = vadd.f32 %v3526_v14, %v1648_v21 }
 0x39e   : > { %v1668_v30 = vadd.f32 %v3528_v18, %v1667_v5  ;;  %v1685_v40 = vmul.f32 %v3530_v38, %v1683_v19  ;;  %v3532_v47 = vpop.eup %3531  ;;  %vm1690_vm4 = vweird.f32 %v3530_v38 }
 0x39f   : > { %v1653_v32 = vsel %vm1652_vm0, %v3526_v14, %v1649_v27  ;;  %v1693_v14 = vand.u32 2147483647, %v1683_v19  ;;  %vm1691_vm6 = vmor %vm1689_vm5, %vm1690_vm4  ;;  %v1710_v19 = vld [vmem:[#allocation3 + $0x88] sm:$0xff]  ;;  %v1712_v27 = vld [vmem:[#allocation3 + $0xb8] sm:$0xff] }
 0x3a0   : > { %v1658_v48 = vsel %vm1655_vm2, %v1657_v31, %v1653_v32  ;;  %v1672_v54 = vsel %vm1671_vm1, %v3528_v18, %v1668_v30  ;;  %v1686_v55 = vsub.f32 1.0, %v1685_v40 }
 0x3a1   : > { %v1677_v8 = vsel %vm1674_vm3, %v1676_v28, %v1672_v54  ;;  %v1701_v29 = vmul.f32 %v3532_v47, %v1658_v48  ;;  %vm1694_vm7 = vcmp.eq.f32.partialorder %v1693_v14, 8.507059e+37 }
 0x3a2   : > { %v1700_v7 = vmul.f32 %v1677_v8, %v4602_v61  ;;  %v1687_v63 = vmul.f32 %v3530_v38, %v1686_v55  ;;  %v1709_v61 = vld [vmem:[#allocation3 + $0x80] sm:$0xff] }
 0x3a4   : > { %v4638_v57 = vadd.f32 %v1701_v29, %v1700_v7  ;;  %v1688_v0 = vadd.f32 %v3530_v38, %v1687_v63  ;;  %v1711_v63 = vld [vmem:[#allocation3 + $0xe8] sm:$0xff] }
 0x3a6   : > { %3533 = vtanh.f32 %v4638_v57  ;;  %v1692_v22 = vsel %vm1691_vm6, %v3530_v38, %v1688_v0 }
 0x3a7   : > { %v1697_v1 = vsel %vm1694_vm7, %v1696_v25, %v1692_v22 }
 0x3ac   : > { %v3534_v18 = vpop.eup %3533 }
 0x3ad   : > { %v1704_v4 = vmul.f32 %v3534_v18, %v1697_v1 }
 0x3af   : > { %v1707_v11 = vpack.c.bf16 %v1704_v4, %v1704_v4 }
 0x3b1   : > { %1708 = vst [vmem:[#allocation2 + $0x4] sm:$0xf] %v1707_v11  ;;  %1723 = vmatmul.bf16.vlgmr.msra.gmra.mxu0 %v1707_v11  ;;  %1736 = vmatmul.bf16.vlgmr.msra.gmra.mxu1 %v1707_v11 }
 0x3b2   : > { %1749 = vmatmul.bf16.vlgmr.msra.gmra.mxu2 %v1707_v11  ;;  %1762 = vmatmul.bf16.vlgmr.msra.gmra.mxu3 %v1707_v11 }
 0x3b3   : > { %1975 = vmatpush.bf16.msra.mxu0 %v4380_v23  ;;  %1988 = vmatpush.bf16.msra.mxu1 %v4384_v2 }
 0x3b4   : > { %2001 = vmatpush.bf16.msra.mxu2 %v4392_v17  ;;  %2014 = vmatpush.bf16.msra.mxu3 %v4388_v16 }
 0x3b7   : > { %1976 = vmatpush.bf16.msra.mxu0 %v4398_v59  ;;  %1989 = vmatpush.bf16.msra.mxu1 %v4402_v58 }
 0x3b8   : > { %2002 = vmatpush.bf16.msra.mxu2 %v4412_v9  ;;  %2015 = vmatpush.bf16.msra.mxu3 %v4407_v60 }
 0x3bb   : > { %1977 = vmatpush.bf16.msra.mxu0 %v4418_v50  ;;  %1990 = vmatpush.bf16.msra.mxu1 %v4422_v51 }
 0x3bc   : > { %2003 = vmatpush.bf16.msra.mxu2 %v4432_v53  ;;  %2016 = vmatpush.bf16.msra.mxu3 %v4427_v52 }
 0x3bf   : > { %1978 = vmatpush.bf16.msra.mxu0 %v4438_v42  ;;  %1991 = vmatpush.bf16.msra.mxu1 %v4442_v43 }
 0x3c0   : > { %2004 = vmatpush.bf16.msra.mxu2 %v4452_v45  ;;  %2017 = vmatpush.bf16.msra.mxu3 %v4447_v44 }
 0x3c3   : > { %1979 = vmatpush.bf16.msra.mxu0 %v4458_v34  ;;  %1992 = vmatpush.bf16.msra.mxu1 %v4462_v35 }
 0x3c4   : > { %2005 = vmatpush.bf16.msra.mxu2 %v4472_v39  ;;  %2018 = vmatpush.bf16.msra.mxu3 %v4467_v36 }
 0x3c7   : > { %1980 = vmatpush.bf16.msra.mxu0 %v4478_v26  ;;  %1993 = vmatpush.bf16.msra.mxu1 %v4482_v41 }
 0x3c8   : > { %2006 = vmatpush.bf16.msra.mxu2 %v4492_v49  ;;  %2019 = vmatpush.bf16.msra.mxu3 %v4487_v46 }
 0x3cb   : > { %1981 = vmatpush.bf16.msra.mxu0 %v4498_v56  ;;  %1994 = vmatpush.bf16.msra.mxu1 %v4502_v62 }
 0x3cc   : > { %2007 = vmatpush.bf16.msra.mxu2 %v4512_v10  ;;  %2020 = vmatpush.bf16.msra.mxu3 %v4507_v12 }
 0x3cf   : > { %1982 = vmatpush.bf16.msra.mxu0 %v4518_v13  ;;  %1995 = vmatpush.bf16.msra.mxu1 %v4522_v24 }
 0x3d0   : > { %2008 = vmatpush.bf16.msra.mxu2 %v4532_v6  ;;  %2021 = vmatpush.bf16.msra.mxu3 %v4527_v33 }
 0x42e   : > { %v1724_v3 = vpop.f32.mrf.mxu0  ;;  %v1737_v21 = vpop.f32.mrf.mxu1 }
 0x42f   : > { %v1767_v20 = vadd.f32 %v1724_v3, %v1709_v61  ;;  %v1768_v5 = vadd.f32 %v1737_v21, %v1710_v19 }
 0x431   : > { %v3226_v37 = vmul.f32 -1.442695, %v1767_v20  ;;  %v3227_v38 = vmul.f32 -1.442695, %v1768_v5 }
 0x433   : > { %3535 = vpow2.f32 %v3226_v37 }
 0x434   : > { %3537 = vpow2.f32 %v3227_v38 }
 0x435   : > { %v1750_v31 = vpop.f32.mrf.mxu2  ;;  %v1763_v30 = vpop.f32.mrf.mxu3 }
 0x436   : > { %v1770_v40 = vadd.f32 %v1763_v30, %v1712_v27  ;;  %v1726_v28 = vpop.f32.mrf.mxu0  ;;  %v1739_v32 = vpop.f32.mrf.mxu1  ;;  %v1769_v22 = vadd.f32 %v1750_v31, %v1711_v63 }
 0x438   : > { %v3228_v47 = vmul.f32 -1.442695, %v1770_v40 }
 0x439   : > { %v3536_v48 = vpop.eup %3535 }
 0x43a   : > { %v3538_v54 = vpop.eup %3537  ;;  %v1774_v55 = vadd.f32 1.0, %v3536_v48  ;;  %3539 = vpow2.f32 %v3228_v47 }
 0x43b   : > { %v1793_v8 = vadd.f32 1.0, %v3538_v54 }
 0x43c   : > { %3541 = vrcp.f32 %v1774_v55  ;;  %v1786_v61 = vand.u32 2147483648, %v1774_v55  ;;  %v1784_v21 = vand.u32 2147483647, %v1774_v55  ;;  %vm1780_vm10 = vweird.f32 %v1774_v55 }
 0x43d   : > { %3543 = vrcp.f32 %v1793_v8  ;;  %v1752_v29 = vpop.f32.mrf.mxu2  ;;  %v1765_v7 = vpop.f32.mrf.mxu3  ;;  %v1805_v19 = vand.u32 2147483648, %v1793_v8  ;;  %v1803_v5 = vand.u32 2147483647, %v1793_v8  ;;  %vm1799_vm11 = vweird.f32 %v1793_v8 }
 0x43e   : > { %v1787_v27 = vor.u32 1.1754944e-38, %v1786_v61  ;;  %vm1785_vm14 = vcmp.eq.f32.partialorder %v1784_v21, 8.507059e+37 }
 0x43f   : > { %v1806_v40 = vor.u32 1.1754944e-38, %v1805_v19  ;;  %vm1804_vm15 = vcmp.eq.f32.partialorder %v1803_v5, 8.507059e+37 }
 0x440   : > { %v3540_v0 = vpop.eup %3539 }
 0x441   : > { %v1813_v15 = vadd.f32 1.0, %v3540_v0 }
 0x442   : > { %v3542_v14 = vpop.eup %3541 }
 0x443   : > { %v3544_v25 = vpop.eup %3543  ;;  %v1776_v18 = vmul.f32 %v3542_v14, %v1774_v55  ;;  %3545 = vrcp.f32 %v1813_v15  ;;  %vm1781_vm8 = vweird.f32 %v3542_v14  ;;  %vm1819_vm1 = vweird.f32 %v1813_v15 }
 0x444   : > { %v1795_v1 = vmul.f32 %v3544_v25, %v1793_v8  ;;  %3547 = vtanh.f32 %v1769_v22  ;;  %vm1800_vm9 = vweird.f32 %v3544_v25  ;;  %vm1782_vm12 = vmor %vm1780_vm10, %vm1781_vm8  ;;  %v1825_v22 = vand.u32 2147483648, %v1813_v15 }
 0x445   : > { %v1777_v4 = vsub.f32 1.0, %v1776_v18  ;;  %vm1801_vm13 = vmor %vm1799_vm11, %vm1800_vm9 }
 0x446   : > { %v1796_v11 = vsub.f32 1.0, %v1795_v1  ;;  %v1826_v1 = vor.u32 1.1754944e-38, %v1825_v22 }
 0x447   : > { %v1778_v3 = vmul.f32 %v3542_v14, %v1777_v4 }
 0x448   : > { %v1797_v20 = vmul.f32 %v3544_v25, %v1796_v11 }
 0x449   : > { %v3546_v37 = vpop.eup %3545  ;;  %v1779_v38 = vadd.f32 %v3542_v14, %v1778_v3 }
 0x44a   : > { %v1798_v31 = vadd.f32 %v3544_v25, %v1797_v20  ;;  %v1815_v30 = vmul.f32 %v3546_v37, %v1813_v15  ;;  %v3548_v32 = vpop.eup %3547  ;;  %vm1820_vm0 = vweird.f32 %v3546_v37 }
 0x44b   : > { %v1783_v28 = vsel %vm1782_vm12, %v3542_v14, %v1779_v38  ;;  %v1823_v14 = vand.u32 2147483647, %v1813_v15  ;;  %vm1821_vm2 = vmor %vm1819_vm1, %vm1820_vm0  ;;  %v1840_v15 = vld [vmem:[#allocation3 + $0xf0] sm:$0xff]  ;;  %v1842_v38 = vld [vmem:[#allocation3 + $0x78] sm:$0xff] }
 0x44c   : > { %v1788_v47 = vsel %vm1785_vm14, %v1787_v27, %v1783_v28  ;;  %v1802_v48 = vsel %vm1801_vm13, %v3544_v25, %v1798_v31  ;;  %v1816_v54 = vsub.f32 1.0, %v1815_v30 }
 0x44d   : > { %v1807_v29 = vsel %vm1804_vm15, %v1806_v40, %v1802_v48  ;;  %v1831_v7 = vmul.f32 %v3548_v32, %v1788_v47  ;;  %vm1824_vm3 = vcmp.eq.f32.partialorder %v1823_v14, 8.507059e+37 }
 0x44e   : > { %v1830_v63 = vmul.f32 %v1807_v29, %v4638_v57  ;;  %v1817_v0 = vmul.f32 %v3546_v37, %v1816_v54  ;;  %v1839_v57 = vld [vmem:[#allocation3 + $0x60] sm:$0xff] }
 0x450   : > { %v4674_v55 = vadd.f32 %v1831_v7, %v1830_v63  ;;  %v1818_v8 = vadd.f32 %v3546_v37, %v1817_v0  ;;  %v1841_v0 = vld [vmem:[#allocation3 + $0x8] sm:$0xff] }
 0x452   : > { %3549 = vtanh.f32 %v4674_v55  ;;  %v1822_v18 = vsel %vm1821_vm2, %v3546_v37, %v1818_v8 }
 0x453   : > { %v1827_v4 = vsel %vm1824_vm3, %v1826_v1, %v1822_v18 }
 0x458   : > { %v3550_v25 = vpop.eup %3549 }
 0x459   : > { %v1834_v11 = vmul.f32 %v3550_v25, %v1827_v4 }
 0x45b   : > { %v1837_v61 = vpack.c.bf16 %v1834_v11, %v1834_v11 }
 0x45d   : > { %1838 = vst [vmem:[#allocation2 + $0x8] sm:$0xf] %v1837_v61  ;;  %1853 = vmatmul.bf16.vlgmr.msrb.gmra.mxu0 %v1837_v61  ;;  %1866 = vmatmul.bf16.vlgmr.msrb.gmra.mxu1 %v1837_v61 }
 0x45e   : > { %1879 = vmatmul.bf16.vlgmr.msrb.gmra.mxu2 %v1837_v61  ;;  %1892 = vmatmul.bf16.vlgmr.msrb.gmra.mxu3 %v1837_v61 }
 0x45f   : > { %2105 = vmatpush.bf16.msrb.mxu0 %v4380_v23  ;;  %2118 = vmatpush.bf16.msrb.mxu1 %v4384_v2 }
 0x460   : > { %2131 = vmatpush.bf16.msrb.mxu2 %v4392_v17  ;;  %2144 = vmatpush.bf16.msrb.mxu3 %v4388_v16 }
 0x463   : > { %2106 = vmatpush.bf16.msrb.mxu0 %v4398_v59  ;;  %2119 = vmatpush.bf16.msrb.mxu1 %v4402_v58 }
 0x464   : > { %2132 = vmatpush.bf16.msrb.mxu2 %v4412_v9  ;;  %2145 = vmatpush.bf16.msrb.mxu3 %v4407_v60 }
 0x467   : > { %2107 = vmatpush.bf16.msrb.mxu0 %v4418_v50  ;;  %2120 = vmatpush.bf16.msrb.mxu1 %v4422_v51 }
 0x468   : > { %2133 = vmatpush.bf16.msrb.mxu2 %v4432_v53  ;;  %2146 = vmatpush.bf16.msrb.mxu3 %v4427_v52 }
 0x46b   : > { %2108 = vmatpush.bf16.msrb.mxu0 %v4438_v42  ;;  %2121 = vmatpush.bf16.msrb.mxu1 %v4442_v43 }
 0x46c   : > { %2134 = vmatpush.bf16.msrb.mxu2 %v4452_v45  ;;  %2147 = vmatpush.bf16.msrb.mxu3 %v4447_v44 }
 0x46f   : > { %2109 = vmatpush.bf16.msrb.mxu0 %v4458_v34  ;;  %2122 = vmatpush.bf16.msrb.mxu1 %v4462_v35 }
 0x470   : > { %2135 = vmatpush.bf16.msrb.mxu2 %v4472_v39  ;;  %2148 = vmatpush.bf16.msrb.mxu3 %v4467_v36 }
 0x473   : > { %2110 = vmatpush.bf16.msrb.mxu0 %v4478_v26  ;;  %2123 = vmatpush.bf16.msrb.mxu1 %v4482_v41 }
 0x474   : > { %2136 = vmatpush.bf16.msrb.mxu2 %v4492_v49  ;;  %2149 = vmatpush.bf16.msrb.mxu3 %v4487_v46 }
 0x477   : > { %2111 = vmatpush.bf16.msrb.mxu0 %v4498_v56  ;;  %2124 = vmatpush.bf16.msrb.mxu1 %v4502_v62 }
 0x478   : > { %2137 = vmatpush.bf16.msrb.mxu2 %v4512_v10  ;;  %2150 = vmatpush.bf16.msrb.mxu3 %v4507_v12 }
 0x47b   : > { %2112 = vmatpush.bf16.msrb.mxu0 %v4518_v13  ;;  %2125 = vmatpush.bf16.msrb.mxu1 %v4522_v24 }
 0x47c   : > { %2138 = vmatpush.bf16.msrb.mxu2 %v4532_v6  ;;  %2151 = vmatpush.bf16.msrb.mxu3 %v4527_v33 }
 0x4da   : > { %v1854_v19 = vpop.f32.mrf.mxu0  ;;  %v1867_v3 = vpop.f32.mrf.mxu1 }
 0x4db   : > { %v1897_v21 = vadd.f32 %v1854_v19, %v1839_v57  ;;  %v1898_v20 = vadd.f32 %v1867_v3, %v1840_v15 }
 0x4dd   : > { %v3229_v5 = vmul.f32 -1.442695, %v1897_v21  ;;  %v3230_v37 = vmul.f32 -1.442695, %v1898_v20 }
 0x4df   : > { %3551 = vpow2.f32 %v3229_v5 }
 0x4e0   : > { %3553 = vpow2.f32 %v3230_v37 }
 0x4e1   : > { %v1880_v27 = vpop.f32.mrf.mxu2  ;;  %v1893_v31 = vpop.f32.mrf.mxu3 }
 0x4e2   : > { %v1900_v30 = vadd.f32 %v1893_v31, %v1842_v38  ;;  %v1856_v40 = vpop.f32.mrf.mxu0  ;;  %v1869_v28 = vpop.f32.mrf.mxu1  ;;  %v1899_v18 = vadd.f32 %v1880_v27, %v1841_v0 }
 0x4e4   : > { %v3231_v32 = vmul.f32 -1.442695, %v1900_v30 }
 0x4e5   : > { %v3552_v47 = vpop.eup %3551 }
 0x4e6   : > { %v3554_v48 = vpop.eup %3553  ;;  %v1904_v54 = vadd.f32 1.0, %v3552_v47  ;;  %3555 = vpow2.f32 %v3231_v32 }
 0x4e7   : > { %v1923_v29 = vadd.f32 1.0, %v3554_v48 }
 0x4e8   : > { %3557 = vrcp.f32 %v1904_v54  ;;  %v1916_v57 = vand.u32 2147483648, %v1904_v54  ;;  %v1914_v3 = vand.u32 2147483647, %v1904_v54  ;;  %vm1910_vm6 = vweird.f32 %v1904_v54 }
 0x4e9   : > { %3559 = vrcp.f32 %v1923_v29  ;;  %v1882_v7 = vpop.f32.mrf.mxu2  ;;  %v1895_v63 = vpop.f32.mrf.mxu3  ;;  %v1935_v15 = vand.u32 2147483648, %v1923_v29  ;;  %v1933_v20 = vand.u32 2147483647, %v1923_v29  ;;  %vm1929_vm7 = vweird.f32 %v1923_v29 }
 0x4ea   : > { %v1917_v38 = vor.u32 1.1754944e-38, %v1916_v57  ;;  %vm1915_vm10 = vcmp.eq.f32.partialorder %v1914_v3, 8.507059e+37 }
 0x4eb   : > { %v1936_v30 = vor.u32 1.1754944e-38, %v1935_v15  ;;  %vm1934_vm11 = vcmp.eq.f32.partialorder %v1933_v20, 8.507059e+37 }
 0x4ec   : > { %v3556_v8 = vpop.eup %3555 }
 0x4ed   : > { %v1943_v22 = vadd.f32 1.0, %v3556_v8 }
 0x4ee   : > { %v3558_v14 = vpop.eup %3557 }
 0x4ef   : > { %v3560_v1 = vpop.eup %3559  ;;  %v1906_v25 = vmul.f32 %v3558_v14, %v1904_v54  ;;  %3561 = vrcp.f32 %v1943_v22  ;;  %vm1911_vm4 = vweird.f32 %v3558_v14  ;;  %vm1949_vm13 = vweird.f32 %v1943_v22 }
 0x4f0   : > { %v1925_v4 = vmul.f32 %v3560_v1, %v1923_v29  ;;  %3563 = vtanh.f32 %v1899_v18  ;;  %vm1930_vm5 = vweird.f32 %v3560_v1  ;;  %vm1912_vm8 = vmor %vm1910_vm6, %vm1911_vm4  ;;  %v1955_v18 = vand.u32 2147483648, %v1943_v22 }
 0x4f1   : > { %v1907_v11 = vsub.f32 1.0, %v1906_v25  ;;  %vm1931_vm9 = vmor %vm1929_vm7, %vm1930_vm5 }
 0x4f2   : > { %v1926_v61 = vsub.f32 1.0, %v1925_v4  ;;  %v1956_v4 = vor.u32 1.1754944e-38, %v1955_v18 }
 0x4f3   : > { %v1908_v19 = vmul.f32 %v3558_v14, %v1907_v11 }
 0x4f4   : > { %v1927_v21 = vmul.f32 %v3560_v1, %v1926_v61 }
 0x4f5   : > { %v3562_v5 = vpop.eup %3561  ;;  %v1909_v37 = vadd.f32 %v3558_v14, %v1908_v19 }
 0x4f6   : > { %v1928_v27 = vadd.f32 %v3560_v1, %v1927_v21  ;;  %v1945_v31 = vmul.f32 %v3562_v5, %v1943_v22  ;;  %v3564_v28 = vpop.eup %3563  ;;  %vm1950_vm12 = vweird.f32 %v3562_v5 }
 0x4f7   : > { %v1913_v40 = vsel %vm1912_vm8, %v3558_v14, %v1909_v37  ;;  %v1953_v14 = vand.u32 2147483647, %v1943_v22  ;;  %vm1951_vm14 = vmor %vm1949_vm13, %vm1950_vm12  ;;  %v1970_v22 = vld [vmem:[#allocation3 + $0x58] sm:$0xff]  ;;  %v1972_v37 = vld [vmem:[#allocation3 + $0xc8] sm:$0xff] }
 0x4f8   : > { %v1918_v32 = vsel %vm1915_vm10, %v1917_v38, %v1913_v40  ;;  %v1932_v47 = vsel %vm1931_vm9, %v3560_v1, %v1928_v27  ;;  %v1946_v48 = vsub.f32 1.0, %v1945_v31 }
 0x4f9   : > { %v1937_v7 = vsel %vm1934_vm11, %v1936_v30, %v1932_v47  ;;  %v1961_v63 = vmul.f32 %v3564_v28, %v1918_v32  ;;  %vm1954_vm15 = vcmp.eq.f32.partialorder %v1953_v14, 8.507059e+37 }
 0x4fa   : > { %v1960_v0 = vmul.f32 %v1937_v7, %v4674_v55  ;;  %v1947_v8 = vmul.f32 %v3562_v5, %v1946_v48  ;;  %v1969_v55 = vld [vmem:[#allocation3 + $0x38] sm:$0xff] }
 0x4fc   : > { %v4710_v54 = vadd.f32 %v1961_v63, %v1960_v0  ;;  %v1948_v29 = vadd.f32 %v3562_v5, %v1947_v8  ;;  %v1971_v8 = vld [vmem:[#allocation3 + $0x40] sm:$0xff] }
 0x4fe   : > { %3565 = vtanh.f32 %v4710_v54  ;;  %v1952_v25 = vsel %vm1951_vm14, %v3562_v5, %v1948_v29 }
 0x4ff   : > { %v1957_v11 = vsel %vm1954_vm15, %v1956_v4, %v1952_v25 }
 0x504   : > { %v3566_v1 = vpop.eup %3565 }
 0x505   : > { %v1964_v61 = vmul.f32 %v3566_v1, %v1957_v11 }
 0x507   : > { %v1967_v57 = vpack.c.bf16 %v1964_v61, %v1964_v61 }
 0x509   : > { %1968 = vst [vmem:[#allocation2 + $0xc] sm:$0xf] %v1967_v57  ;;  %1983 = vmatmul.bf16.vlgmr.msra.gmra.mxu0 %v1967_v57  ;;  %1996 = vmatmul.bf16.vlgmr.msra.gmra.mxu1 %v1967_v57 }
 0x50a   : > { %2009 = vmatmul.bf16.vlgmr.msra.gmra.mxu2 %v1967_v57  ;;  %2022 = vmatmul.bf16.vlgmr.msra.gmra.mxu3 %v1967_v57 }
 0x50b   : > { %2235 = vmatpush.bf16.msra.mxu0 %v4380_v23  ;;  %2248 = vmatpush.bf16.msra.mxu1 %v4384_v2 }
 0x50c   : > { %2261 = vmatpush.bf16.msra.mxu2 %v4392_v17  ;;  %2274 = vmatpush.bf16.msra.mxu3 %v4388_v16 }
 0x50f   : > { %2236 = vmatpush.bf16.msra.mxu0 %v4398_v59  ;;  %2249 = vmatpush.bf16.msra.mxu1 %v4402_v58 }
 0x510   : > { %2262 = vmatpush.bf16.msra.mxu2 %v4412_v9  ;;  %2275 = vmatpush.bf16.msra.mxu3 %v4407_v60 }
 0x513   : > { %2237 = vmatpush.bf16.msra.mxu0 %v4418_v50  ;;  %2250 = vmatpush.bf16.msra.mxu1 %v4422_v51 }
 0x514   : > { %2263 = vmatpush.bf16.msra.mxu2 %v4432_v53  ;;  %2276 = vmatpush.bf16.msra.mxu3 %v4427_v52 }
 0x517   : > { %2238 = vmatpush.bf16.msra.mxu0 %v4438_v42  ;;  %2251 = vmatpush.bf16.msra.mxu1 %v4442_v43 }
 0x518   : > { %2264 = vmatpush.bf16.msra.mxu2 %v4452_v45  ;;  %2277 = vmatpush.bf16.msra.mxu3 %v4447_v44 }
 0x51b   : > { %2239 = vmatpush.bf16.msra.mxu0 %v4458_v34  ;;  %2252 = vmatpush.bf16.msra.mxu1 %v4462_v35 }
 0x51c   : > { %2265 = vmatpush.bf16.msra.mxu2 %v4472_v39  ;;  %2278 = vmatpush.bf16.msra.mxu3 %v4467_v36 }
 0x51f   : > { %2240 = vmatpush.bf16.msra.mxu0 %v4478_v26  ;;  %2253 = vmatpush.bf16.msra.mxu1 %v4482_v41 }
 0x520   : > { %2266 = vmatpush.bf16.msra.mxu2 %v4492_v49  ;;  %2279 = vmatpush.bf16.msra.mxu3 %v4487_v46 }
 0x523   : > { %2241 = vmatpush.bf16.msra.mxu0 %v4498_v56  ;;  %2254 = vmatpush.bf16.msra.mxu1 %v4502_v62 }
 0x524   : > { %2267 = vmatpush.bf16.msra.mxu2 %v4512_v10  ;;  %2280 = vmatpush.bf16.msra.mxu3 %v4507_v12 }
 0x527   : > { %2242 = vmatpush.bf16.msra.mxu0 %v4518_v13  ;;  %2255 = vmatpush.bf16.msra.mxu1 %v4522_v24 }
 0x528   : > { %2268 = vmatpush.bf16.msra.mxu2 %v4532_v6  ;;  %2281 = vmatpush.bf16.msra.mxu3 %v4527_v33 }
 0x586   : > { %v1984_v15 = vpop.f32.mrf.mxu0  ;;  %v1997_v19 = vpop.f32.mrf.mxu1 }
 0x587   : > { %v2027_v3 = vadd.f32 %v1984_v15, %v1969_v55  ;;  %v2028_v21 = vadd.f32 %v1997_v19, %v1970_v22 }
 0x589   : > { %v3232_v20 = vmul.f32 -1.442695, %v2027_v3  ;;  %v3233_v5 = vmul.f32 -1.442695, %v2028_v21 }
 0x58b   : > { %3567 = vpow2.f32 %v3232_v20 }
 0x58c   : > { %3569 = vpow2.f32 %v3233_v5 }
 0x58d   : > { %v2010_v38 = vpop.f32.mrf.mxu2  ;;  %v2023_v27 = vpop.f32.mrf.mxu3 }
 0x58e   : > { %v2030_v31 = vadd.f32 %v2023_v27, %v1972_v37  ;;  %v1986_v30 = vpop.f32.mrf.mxu0  ;;  %v1999_v40 = vpop.f32.mrf.mxu1  ;;  %v2029_v25 = vadd.f32 %v2010_v38, %v1971_v8 }
 0x590   : > { %v3234_v28 = vmul.f32 -1.442695, %v2030_v31 }
 0x591   : > { %v3568_v32 = vpop.eup %3567 }
 0x592   : > { %v3570_v47 = vpop.eup %3569  ;;  %v2034_v48 = vadd.f32 1.0, %v3568_v32  ;;  %3571 = vpow2.f32 %v3234_v28 }
 0x593   : > { %v2053_v7 = vadd.f32 1.0, %v3570_v47 }
 0x594   : > { %3573 = vrcp.f32 %v2034_v48  ;;  %v2046_v55 = vand.u32 2147483648, %v2034_v48  ;;  %v2044_v19 = vand.u32 2147483647, %v2034_v48  ;;  %vm2040_vm2 = vweird.f32 %v2034_v48 }
 0x595   : > { %3575 = vrcp.f32 %v2053_v7  ;;  %v2012_v63 = vpop.f32.mrf.mxu2  ;;  %v2025_v0 = vpop.f32.mrf.mxu3  ;;  %v2065_v22 = vand.u32 2147483648, %v2053_v7  ;;  %v2063_v21 = vand.u32 2147483647, %v2053_v7  ;;  %vm2059_vm3 = vweird.f32 %v2053_v7 }
 0x596   : > { %v2047_v37 = vor.u32 1.1754944e-38, %v2046_v55  ;;  %vm2045_vm6 = vcmp.eq.f32.partialorder %v2044_v19, 8.507059e+37 }
 0x597   : > { %v2066_v31 = vor.u32 1.1754944e-38, %v2065_v22  ;;  %vm2064_vm7 = vcmp.eq.f32.partialorder %v2063_v21, 8.507059e+37 }
 0x598   : > { %v3572_v29 = vpop.eup %3571 }
 0x599   : > { %v2073_v18 = vadd.f32 1.0, %v3572_v29 }
 0x59a   : > { %v3574_v14 = vpop.eup %3573 }
 0x59b   : > { %v3576_v4 = vpop.eup %3575  ;;  %v2036_v1 = vmul.f32 %v3574_v14, %v2034_v48  ;;  %3577 = vrcp.f32 %v2073_v18  ;;  %vm2041_vm0 = vweird.f32 %v3574_v14  ;;  %vm2079_vm9 = vweird.f32 %v2073_v18 }
 0x59c   : > { %v2055_v11 = vmul.f32 %v3576_v4, %v2053_v7  ;;  %3579 = vtanh.f32 %v2029_v25  ;;  %vm2060_vm1 = vweird.f32 %v3576_v4  ;;  %vm2042_vm4 = vmor %vm2040_vm2, %vm2041_vm0  ;;  %v2085_v25 = vand.u32 2147483648, %v2073_v18 }
 0x59d   : > { %v2037_v61 = vsub.f32 1.0, %v2036_v1  ;;  %vm2061_vm5 = vmor %vm2059_vm3, %vm2060_vm1 }
 0x59e   : > { %v2056_v57 = vsub.f32 1.0, %v2055_v11  ;;  %v2086_v11 = vor.u32 1.1754944e-38, %v2085_v25 }
 0x59f   : > { %v2038_v15 = vmul.f32 %v3574_v14, %v2037_v61 }
 0x5a0   : > { %v2057_v3 = vmul.f32 %v3576_v4, %v2056_v57 }
 0x5a1   : > { %v3578_v20 = vpop.eup %3577  ;;  %v2039_v5 = vadd.f32 %v3574_v14, %v2038_v15 }
 0x5a2   : > { %v2058_v38 = vadd.f32 %v3576_v4, %v2057_v3  ;;  %v2075_v27 = vmul.f32 %v3578_v20, %v2073_v18  ;;  %v3580_v40 = vpop.eup %3579  ;;  %vm2080_vm8 = vweird.f32 %v3578_v20 }
 0x5a3   : > { %v2043_v30 = vsel %vm2042_vm4, %v3574_v14, %v2039_v5  ;;  %v2083_v14 = vand.u32 2147483647, %v2073_v18  ;;  %vm2081_vm10 = vmor %vm2079_vm9, %vm2080_vm8 }
 0x5a4   : > { %v2048_v28 = vsel %vm2045_vm6, %v2047_v37, %v2043_v30  ;;  %v2062_v32 = vsel %vm2061_vm5, %v3576_v4, %v2058_v38  ;;  %v2076_v47 = vsub.f32 1.0, %v2075_v27 }
 0x5a5   : > { %v2067_v63 = vsel %vm2064_vm7, %v2066_v31, %v2062_v32  ;;  %v2091_v0 = vmul.f32 %v3580_v40, %v2048_v28  ;;  %vm2084_vm11 = vcmp.eq.f32.partialorder %v2083_v14, 8.507059e+37 }
 0x5a6   : > { %v2090_v8 = vmul.f32 %v2067_v63, %v4710_v54  ;;  %v2077_v29 = vmul.f32 %v3578_v20, %v2076_v47 }
 0x5a8   : > { %v4746_v48 = vadd.f32 %v2091_v0, %v2090_v8  ;;  %v2078_v7 = vadd.f32 %v3578_v20, %v2077_v29 }
 0x5aa   : > { %3581 = vtanh.f32 %v4746_v48  ;;  %v2082_v1 = vsel %vm2081_vm10, %v3578_v20, %v2078_v7 }
 0x5ab   : > { %v2087_v61 = vsel %vm2084_vm11, %v2086_v11, %v2082_v1 }
 0x5b0   : > { %v3582_v4 = vpop.eup %3581 }
 0x5b1   : > { %v2094_v57 = vmul.f32 %v3582_v4, %v2087_v61 }
 0x5b3   : > { %v2097_v55 = vpack.c.bf16 %v2094_v57, %v2094_v57 }
 0x5b5   : > { %2098 = vst [vmem:[#allocation2 + $0x10] sm:$0xf] %v2097_v55  ;;  %2113 = vmatmul.bf16.vlgmr.msrb.gmra.mxu0 %v2097_v55  ;;  %2126 = vmatmul.bf16.vlgmr.msrb.gmra.mxu1 %v2097_v55 }
 0x5b6   : > { %2139 = vmatmul.bf16.vlgmr.msrb.gmra.mxu2 %v2097_v55  ;;  %2152 = vmatmul.bf16.vlgmr.msrb.gmra.mxu3 %v2097_v55  ;;  %v2230_v55 = vld [vmem:[#allocation3 + $0xd0] sm:$0xff] }
 0x5b7   : > { %2365 = vmatpush.bf16.msrb.mxu0 %v4380_v23  ;;  %2378 = vmatpush.bf16.msrb.mxu1 %v4384_v2  ;;  %v2099_v23 = vld [vmem:[#allocation3 + $0xe0] sm:$0xff]  ;;  %v2100_v2 = vld [vmem:[#allocation3 + $0x90] sm:$0xff] }
 0x5b8   : > { %2391 = vmatpush.bf16.msrb.mxu2 %v4392_v17  ;;  %2404 = vmatpush.bf16.msrb.mxu3 %v4388_v16 }
 0x5bb   : > { %2366 = vmatpush.bf16.msrb.mxu0 %v4398_v59  ;;  %2379 = vmatpush.bf16.msrb.mxu1 %v4402_v58 }
 0x5bc   : > { %2392 = vmatpush.bf16.msrb.mxu2 %v4412_v9  ;;  %2405 = vmatpush.bf16.msrb.mxu3 %v4407_v60 }
 0x5bf   : > { %2367 = vmatpush.bf16.msrb.mxu0 %v4418_v50  ;;  %2380 = vmatpush.bf16.msrb.mxu1 %v4422_v51  ;;  %v2102_v50 = vld [vmem:[#allocation3 + $0xc0] sm:$0xff] }
 0x5c0   : > { %2393 = vmatpush.bf16.msrb.mxu2 %v4432_v53  ;;  %2406 = vmatpush.bf16.msrb.mxu3 %v4427_v52 }
 0x5c3   : > { %2368 = vmatpush.bf16.msrb.mxu0 %v4438_v42  ;;  %2381 = vmatpush.bf16.msrb.mxu1 %v4442_v43 }
 0x5c4   : > { %2394 = vmatpush.bf16.msrb.mxu2 %v4452_v45  ;;  %2407 = vmatpush.bf16.msrb.mxu3 %v4447_v44 }
 0x5c7   : > { %2369 = vmatpush.bf16.msrb.mxu0 %v4458_v34  ;;  %2382 = vmatpush.bf16.msrb.mxu1 %v4462_v35 }
 0x5c8   : > { %2395 = vmatpush.bf16.msrb.mxu2 %v4472_v39  ;;  %2408 = vmatpush.bf16.msrb.mxu3 %v4467_v36 }
 0x5cb   : > { %2370 = vmatpush.bf16.msrb.mxu0 %v4478_v26  ;;  %2383 = vmatpush.bf16.msrb.mxu1 %v4482_v41  ;;  %v2101_v41 = vld [vmem:[#allocation3 + $0x70] sm:$0xff] }
 0x5cc   : > { %2396 = vmatpush.bf16.msrb.mxu2 %v4492_v49  ;;  %2409 = vmatpush.bf16.msrb.mxu3 %v4487_v46 }
 0x5cf   : > { %2371 = vmatpush.bf16.msrb.mxu0 %v4498_v56  ;;  %2384 = vmatpush.bf16.msrb.mxu1 %v4502_v62 }
 0x5d0   : > { %2397 = vmatpush.bf16.msrb.mxu2 %v4512_v10  ;;  %2410 = vmatpush.bf16.msrb.mxu3 %v4507_v12 }
 0x5d3   : > { %2372 = vmatpush.bf16.msrb.mxu0 %v4518_v13  ;;  %2385 = vmatpush.bf16.msrb.mxu1 %v4522_v24 }
 0x5d4   : > { %2398 = vmatpush.bf16.msrb.mxu2 %v4532_v6  ;;  %2411 = vmatpush.bf16.msrb.mxu3 %v4527_v33 }
 0x632   : > { %v2114_v16 = vpop.f32.mrf.mxu0  ;;  %v2127_v17 = vpop.f32.mrf.mxu1 }
 0x633   : > { %v2157_v59 = vadd.f32 %v2114_v16, %v2099_v23  ;;  %v2158_v58 = vadd.f32 %v2127_v17, %v2100_v2 }
 0x635   : > { %v3235_v60 = vmul.f32 -1.442695, %v2157_v59  ;;  %v3236_v9 = vmul.f32 -1.442695, %v2158_v58 }
 0x637   : > { %3583 = vpow2.f32 %v3235_v60  ;;  %v2232_v60 = vld [vmem:[#allocation3 + $0x28] sm:$0xff] }
 0x638   : > { %3585 = vpow2.f32 %v3236_v9 }
 0x639   : > { %v2140_v51 = vpop.f32.mrf.mxu2  ;;  %v2153_v52 = vpop.f32.mrf.mxu3 }
 0x63a   : > { %v2160_v53 = vadd.f32 %v2153_v52, %v2102_v50  ;;  %v2116_v42 = vpop.f32.mrf.mxu0  ;;  %v2129_v43 = vpop.f32.mrf.mxu1  ;;  %v2159_v62 = vadd.f32 %v2140_v51, %v2101_v41 }
 0x63c   : > { %v3237_v44 = vmul.f32 -1.442695, %v2160_v53 }
 0x63d   : > { %v3584_v45 = vpop.eup %3583 }
 0x63e   : > { %v3586_v34 = vpop.eup %3585  ;;  %v2164_v35 = vadd.f32 1.0, %v3584_v45  ;;  %3587 = vpow2.f32 %v3237_v44 }
 0x63f   : > { %v2183_v36 = vadd.f32 1.0, %v3586_v34 }
 0x640   : > { %3589 = vrcp.f32 %v2164_v35  ;;  %v2176_v6 = vand.u32 2147483648, %v2164_v35  ;;  %v2174_v22 = vand.u32 2147483647, %v2164_v35  ;;  %vm2170_vm14 = vweird.f32 %v2164_v35 }
 0x641   : > { %3591 = vrcp.f32 %v2183_v36  ;;  %v2142_v39 = vpop.f32.mrf.mxu2  ;;  %v2155_v26 = vpop.f32.mrf.mxu3  ;;  %v2195_v54 = vand.u32 2147483648, %v2183_v36  ;;  %v2193_v19 = vand.u32 2147483647, %v2183_v36  ;;  %vm2189_vm15 = vweird.f32 %v2183_v36 }
 0x642   : > { %v2177_v20 = vor.u32 1.1754944e-38, %v2176_v6  ;;  %vm2175_vm2 = vcmp.eq.f32.partialorder %v2174_v22, 8.507059e+37  ;;  %v2231_v39 = vld [vmem:[#allocation3 + $0x10] sm:$0xff] }
 0x643   : > { %v2196_v38 = vor.u32 1.1754944e-38, %v2195_v54  ;;  %vm2194_vm3 = vcmp.eq.f32.partialorder %v2193_v19, 8.507059e+37 }
 0x644   : > { %v3588_v46 = vpop.eup %3587 }
 0x645   : > { %v2203_v49 = vadd.f32 1.0, %v3588_v46 }
 0x646   : > { %v3590_v56 = vpop.eup %3589 }
 0x647   : > { %v3592_v12 = vpop.eup %3591  ;;  %v2166_v10 = vmul.f32 %v3590_v56, %v2164_v35  ;;  %3593 = vrcp.f32 %v2203_v49  ;;  %vm2171_vm12 = vweird.f32 %v3590_v56  ;;  %v2215_v7 = vand.u32 2147483648, %v2203_v49 }
 0x648   : > { %v2185_v13 = vmul.f32 %v3592_v12, %v2183_v36  ;;  %3595 = vtanh.f32 %v2159_v62  ;;  %vm2190_vm13 = vweird.f32 %v3592_v12  ;;  %vm2172_vm0 = vmor %vm2170_vm14, %vm2171_vm12  ;;  %vm2209_vm5 = vweird.f32 %v2203_v49 }
 0x649   : > { %v2167_v24 = vsub.f32 1.0, %v2166_v10  ;;  %vm2191_vm1 = vmor %vm2189_vm15, %vm2190_vm13  ;;  %v2213_v25 = vand.u32 2147483647, %v2203_v49  ;;  %v2216_v1 = vor.u32 1.1754944e-38, %v2215_v7 }
 0x64a   : > { %v2186_v33 = vsub.f32 1.0, %v2185_v13 }
 0x64b   : > { %v2168_v18 = vmul.f32 %v3590_v56, %v2167_v24  ;;  %vm2214_vm7 = vcmp.eq.f32.partialorder %v2213_v25, 8.507059e+37 }
 0x64c   : > { %v2187_v15 = vmul.f32 %v3592_v12, %v2186_v33 }
 0x64d   : > { %v3594_v3 = vpop.eup %3593  ;;  %v2169_v21 = vadd.f32 %v3590_v56, %v2168_v18 }
 0x64e   : > { %v2188_v5 = vadd.f32 %v3592_v12, %v2187_v15  ;;  %v2205_v37 = vmul.f32 %v3594_v3, %v2203_v49  ;;  %v3596_v31 = vpop.eup %3595  ;;  %vm2210_vm4 = vweird.f32 %v3594_v3 }
 0x64f   : > { %v2173_v27 = vsel %vm2172_vm0, %v3590_v56, %v2169_v21  ;;  %vm2211_vm6 = vmor %vm2209_vm5, %vm2210_vm4 }
 0x650   : > { %v2178_v30 = vsel %vm2175_vm2, %v2177_v20, %v2173_v27  ;;  %v2192_v40 = vsel %vm2191_vm1, %v3592_v12, %v2188_v5  ;;  %v2206_v28 = vsub.f32 1.0, %v2205_v37 }
 0x651   : > { %v2197_v32 = vsel %vm2194_vm3, %v2196_v38, %v2192_v40  ;;  %v2221_v47 = vmul.f32 %v3596_v31, %v2178_v30 }
 0x652   : > { %v2220_v63 = vmul.f32 %v2197_v32, %v4746_v48  ;;  %v2207_v0 = vmul.f32 %v3594_v3, %v2206_v28  ;;  %v2229_v48 = vld [vmem:[#allocation3 + $0xa8] sm:$0xff] }
 0x654   : > { %v4782_v8 = vadd.f32 %v2221_v47, %v2220_v63  ;;  %v2208_v29 = vadd.f32 %v3594_v3, %v2207_v0 }
 0x656   : > { %3597 = vtanh.f32 %v4782_v8  ;;  %v2212_v14 = vsel %vm2211_vm6, %v3594_v3, %v2208_v29 }
 0x657   : > { %v2217_v4 = vsel %vm2214_vm7, %v2216_v1, %v2212_v14 }
 0x65c   : > { %v3598_v11 = vpop.eup %3597 }
 0x65d   : > { %v2224_v61 = vmul.f32 %v3598_v11, %v2217_v4 }
 0x65f   : > { %v2227_v57 = vpack.c.bf16 %v2224_v61, %v2224_v61 }
 0x661   : > { %2228 = vst [vmem:[#allocation2 + $0x14] sm:$0xf] %v2227_v57  ;;  %2243 = vmatmul.bf16.vlgmr.msra.gmra.mxu0 %v2227_v57  ;;  %2256 = vmatmul.bf16.vlgmr.msra.gmra.mxu1 %v2227_v57 }
 0x662   : > { %2269 = vmatmul.bf16.vlgmr.msra.gmra.mxu2 %v2227_v57  ;;  %2282 = vmatmul.bf16.vlgmr.msra.gmra.mxu3 %v2227_v57  ;;  %v2360_v57 = vld [vmem:[#allocation3 + $0xf8] sm:$0xff] }
 0x6de   : > { %v2244_v23 = vpop.f32.mrf.mxu0  ;;  %v2257_v2 = vpop.f32.mrf.mxu1 }
 0x6df   : > { %v2287_v16 = vadd.f32 %v2244_v23, %v2229_v48  ;;  %v2288_v17 = vadd.f32 %v2257_v2, %v2230_v55 }
 0x6e1   : > { %v3238_v59 = vmul.f32 -1.442695, %v2287_v16  ;;  %v3239_v58 = vmul.f32 -1.442695, %v2288_v17 }
 0x6e3   : > { %3599 = vpow2.f32 %v3238_v59  ;;  %v2362_v59 = vld [vmem:[#allocation3 + $0x98] sm:$0xff] }
 0x6e4   : > { %3601 = vpow2.f32 %v3239_v58 }
 0x6e5   : > { %v2270_v9 = vpop.f32.mrf.mxu2  ;;  %v2283_v50 = vpop.f32.mrf.mxu3 }
 0x6e6   : > { %v2290_v51 = vadd.f32 %v2283_v50, %v2232_v60  ;;  %v2246_v52 = vpop.f32.mrf.mxu0  ;;  %v2259_v53 = vpop.f32.mrf.mxu1  ;;  %v2289_v49 = vadd.f32 %v2270_v9, %v2231_v39 }
 0x6e8   : > { %v3240_v42 = vmul.f32 -1.442695, %v2290_v51 }
 0x6e9   : > { %v3600_v43 = vpop.eup %3599 }
 0x6ea   : > { %v3602_v44 = vpop.eup %3601  ;;  %v2294_v45 = vadd.f32 1.0, %v3600_v43  ;;  %3603 = vpow2.f32 %v3240_v42 }
 0x6eb   : > { %v2313_v34 = vadd.f32 1.0, %v3602_v44 }
 0x6ec   : > { %3605 = vrcp.f32 %v2294_v45  ;;  %v2306_v24 = vand.u32 2147483648, %v2294_v45  ;;  %v2304_v54 = vand.u32 2147483647, %v2294_v45  ;;  %vm2300_vm10 = vweird.f32 %v2294_v45 }
 0x6ed   : > { %3607 = vrcp.f32 %v2313_v34  ;;  %v2272_v35 = vpop.f32.mrf.mxu2  ;;  %v2285_v36 = vpop.f32.mrf.mxu3  ;;  %v2325_v33 = vand.u32 2147483648, %v2313_v34  ;;  %v2323_v22 = vand.u32 2147483647, %v2313_v34  ;;  %vm2319_vm11 = vweird.f32 %v2313_v34 }
 0x6ee   : > { %v2307_v3 = vor.u32 1.1754944e-38, %v2306_v24  ;;  %vm2305_vm14 = vcmp.eq.f32.partialorder %v2304_v54, 8.507059e+37  ;;  %v2361_v35 = vld [vmem:[#allocation3 + $0x20] sm:$0xff] }
 0x6ef   : > { %v2326_v5 = vor.u32 1.1754944e-38, %v2325_v33  ;;  %vm2324_vm15 = vcmp.eq.f32.partialorder %v2323_v22, 8.507059e+37 }
 0x6f0   : > { %v3604_v26 = vpop.eup %3603 }
 0x6f1   : > { %v2333_v41 = vadd.f32 1.0, %v3604_v26 }
 0x6f2   : > { %v3606_v46 = vpop.eup %3605 }
 0x6f3   : > { %v3608_v56 = vpop.eup %3607  ;;  %v2296_v62 = vmul.f32 %v3606_v46, %v2294_v45  ;;  %3609 = vrcp.f32 %v2333_v41  ;;  %vm2301_vm8 = vweird.f32 %v3606_v46  ;;  %v2345_v29 = vand.u32 2147483648, %v2333_v41 }
 0x6f4   : > { %v2315_v12 = vmul.f32 %v3608_v56, %v2313_v34  ;;  %3611 = vtanh.f32 %v2289_v49  ;;  %vm2320_vm9 = vweird.f32 %v3608_v56  ;;  %vm2302_vm12 = vmor %vm2300_vm10, %vm2301_vm8  ;;  %vm2339_vm1 = vweird.f32 %v2333_v41 }
 0x6f5   : > { %v2297_v10 = vsub.f32 1.0, %v2296_v62  ;;  %vm2321_vm13 = vmor %vm2319_vm11, %vm2320_vm9  ;;  %v2343_v7 = vand.u32 2147483647, %v2333_v41  ;;  %v2346_v14 = vor.u32 1.1754944e-38, %v2345_v29 }
 0x6f6   : > { %v2316_v13 = vsub.f32 1.0, %v2315_v12 }
 0x6f7   : > { %v2298_v6 = vmul.f32 %v3606_v46, %v2297_v10  ;;  %vm2344_vm3 = vcmp.eq.f32.partialorder %v2343_v7, 8.507059e+37 }
 0x6f8   : > { %v2317_v18 = vmul.f32 %v3608_v56, %v2316_v13 }
 0x6f9   : > { %v3610_v15 = vpop.eup %3609  ;;  %v2299_v19 = vadd.f32 %v3606_v46, %v2298_v6 }
 0x6fa   : > { %v2318_v21 = vadd.f32 %v3608_v56, %v2317_v18  ;;  %v2335_v20 = vmul.f32 %v3610_v15, %v2333_v41  ;;  %v3612_v38 = vpop.eup %3611  ;;  %vm2340_vm0 = vweird.f32 %v3610_v15 }
 0x6fb   : > { %v2303_v37 = vsel %vm2302_vm12, %v3606_v46, %v2299_v19  ;;  %vm2341_vm2 = vmor %vm2339_vm1, %vm2340_vm0 }
 0x6fc   : > { %v2308_v27 = vsel %vm2305_vm14, %v2307_v3, %v2303_v37  ;;  %v2322_v31 = vsel %vm2321_vm13, %v3608_v56, %v2318_v21  ;;  %v2336_v30 = vsub.f32 1.0, %v2335_v20 }
 0x6fd   : > { %v2327_v40 = vsel %vm2324_vm15, %v2326_v5, %v2322_v31  ;;  %v2351_v28 = vmul.f32 %v3612_v38, %v2308_v27 }
 0x6fe   : > { %v2350_v32 = vmul.f32 %v2327_v40, %v4782_v8  ;;  %v2337_v47 = vmul.f32 %v3610_v15, %v2336_v30  ;;  %v2359_v8 = vld [vmem:[#allocation3 + $0xa0] sm:$0xff] }
 0x700   : > { %v4786_v63 = vadd.f32 %v2351_v28, %v2350_v32  ;;  %v2338_v0 = vadd.f32 %v3610_v15, %v2337_v47 }
 0x702   : > { %3613 = vtanh.f32 %v4786_v63  ;;  %v2342_v25 = vsel %vm2341_vm2, %v3610_v15, %v2338_v0 }
 0x703   : > { %v2347_v11 = vsel %vm2344_vm3, %v2346_v14, %v2342_v25 }
 0x708   : > { %v3614_v1 = vpop.eup %3613 }
 0x709   : > { %v2354_v4 = vmul.f32 %v3614_v1, %v2347_v11 }
 0x70b   : > { %v2357_v61 = vpack.c.bf16 %v2354_v4, %v2354_v4 }
 0x70d   : > { %2358 = vst [vmem:[#allocation2 + $0x18] sm:$0xf] %v2357_v61  ;;  %2373 = vmatmul.bf16.vlgmr.msrb.gmra.mxu0 %v2357_v61  ;;  %2386 = vmatmul.bf16.vlgmr.msrb.gmra.mxu1 %v2357_v61 }
 0x70e   : > { %2399 = vmatmul.bf16.vlgmr.msrb.gmra.mxu2 %v2357_v61  ;;  %2412 = vmatmul.bf16.vlgmr.msrb.gmra.mxu3 %v2357_v61 }
 0x78a   : > { %v2374_v48 = vpop.f32.mrf.mxu0  ;;  %v2387_v55 = vpop.f32.mrf.mxu1 }
 0x78b   : > { %v2417_v23 = vadd.f32 %v2374_v48, %v2359_v8  ;;  %v2418_v2 = vadd.f32 %v2387_v55, %v2360_v57 }
 0x78d   : > { %v3241_v16 = vmul.f32 -1.442695, %v2417_v23  ;;  %v3242_v17 = vmul.f32 -1.442695, %v2418_v2 }
 0x78f   : > { %3615 = vpow2.f32 %v3241_v16 }
 0x790   : > { %3617 = vpow2.f32 %v3242_v17 }
 0x791   : > { %v2400_v58 = vpop.f32.mrf.mxu2  ;;  %v2413_v60 = vpop.f32.mrf.mxu3 }
 0x792   : > { %v2420_v9 = vadd.f32 %v2413_v60, %v2362_v59  ;;  %v2376_v50 = vpop.f32.mrf.mxu0  ;;  %v2389_v51 = vpop.f32.mrf.mxu1  ;;  %v2419_v41 = vadd.f32 %v2400_v58, %v2361_v35 }
 0x794   : > { %v3243_v52 = vmul.f32 -1.442695, %v2420_v9 }
 0x795   : > { %v3616_v53 = vpop.eup %3615 }
 0x796   : > { %v3618_v42 = vpop.eup %3617  ;;  %v2424_v43 = vadd.f32 1.0, %v3616_v53  ;;  %3619 = vpow2.f32 %v3243_v52 }
 0x797   : > { %v2443_v44 = vadd.f32 1.0, %v3618_v42 }
 0x798   : > { %3621 = vrcp.f32 %v2424_v43  ;;  %v2436_v10 = vand.u32 2147483648, %v2424_v43  ;;  %v2434_v33 = vand.u32 2147483647, %v2424_v43  ;;  %vm2430_vm6 = vweird.f32 %v2424_v43 }
 0x799   : > { %3623 = vrcp.f32 %v2443_v44  ;;  %v2402_v45 = vpop.f32.mrf.mxu2  ;;  %v2415_v34 = vpop.f32.mrf.mxu3  ;;  %v2455_v13 = vand.u32 2147483648, %v2443_v44  ;;  %v2453_v54 = vand.u32 2147483647, %v2443_v44  ;;  %vm2449_vm7 = vweird.f32 %v2443_v44 }
 0x79a   : > { %v2437_v15 = vor.u32 1.1754944e-38, %v2436_v10  ;;  %vm2435_vm10 = vcmp.eq.f32.partialorder %v2434_v33, 8.507059e+37 }
 0x79b   : > { %v2456_v21 = vor.u32 1.1754944e-38, %v2455_v13  ;;  %vm2454_vm11 = vcmp.eq.f32.partialorder %v2453_v54, 8.507059e+37 }
 0x79c   : > { %v3620_v36 = vpop.eup %3619 }
 0x79d   : > { %v2463_v39 = vadd.f32 1.0, %v3620_v36 }
 0x79e   : > { %v3622_v26 = vpop.eup %3621 }
 0x79f   : > { %v3624_v46 = vpop.eup %3623  ;;  %v2426_v49 = vmul.f32 %v3622_v26, %v2424_v43  ;;  %3625 = vrcp.f32 %v2463_v39  ;;  %vm2431_vm4 = vweird.f32 %v3622_v26  ;;  %v2475_v0 = vand.u32 2147483648, %v2463_v39 }
 0x7a0   : > { %v2445_v56 = vmul.f32 %v3624_v46, %v2443_v44  ;;  %3627 = vtanh.f32 %v2419_v41  ;;  %vm2450_vm5 = vweird.f32 %v3624_v46  ;;  %vm2432_vm8 = vmor %vm2430_vm6, %vm2431_vm4  ;;  %vm2469_vm13 = vweird.f32 %v2463_v39 }
 0x7a1   : > { %v2427_v62 = vsub.f32 1.0, %v2426_v49  ;;  %vm2451_vm9 = vmor %vm2449_vm7, %vm2450_vm5  ;;  %v2473_v29 = vand.u32 2147483647, %v2463_v39  ;;  %v2476_v25 = vor.u32 1.1754944e-38, %v2475_v0 }
 0x7a2   : > { %v2446_v12 = vsub.f32 1.0, %v2445_v56 }
 0x7a3   : > { %v2428_v24 = vmul.f32 %v3622_v26, %v2427_v62  ;;  %vm2474_vm15 = vcmp.eq.f32.partialorder %v2473_v29, 8.507059e+37 }
 0x7a4   : > { %v2447_v6 = vmul.f32 %v3624_v46, %v2446_v12 }
 0x7a5   : > { %v3626_v18 = vpop.eup %3625  ;;  %v2429_v22 = vadd.f32 %v3622_v26, %v2428_v24 }
 0x7a6   : > { %v2448_v19 = vadd.f32 %v3624_v46, %v2447_v6  ;;  %v2465_v3 = vmul.f32 %v3626_v18, %v2463_v39  ;;  %v3628_v5 = vpop.eup %3627  ;;  %vm2470_vm12 = vweird.f32 %v3626_v18 }
 0x7a7   : > { %v2433_v20 = vsel %vm2432_vm8, %v3622_v26, %v2429_v22  ;;  %vm2471_vm14 = vmor %vm2469_vm13, %vm2470_vm12 }
 0x7a8   : > { %v2438_v37 = vsel %vm2435_vm10, %v2437_v15, %v2433_v20  ;;  %v2452_v38 = vsel %vm2451_vm9, %v3624_v46, %v2448_v19  ;;  %v2466_v27 = vsub.f32 1.0, %v2465_v3 }
 0x7a9   : > { %v2457_v31 = vsel %vm2454_vm11, %v2456_v21, %v2452_v38  ;;  %v2481_v30 = vmul.f32 %v3628_v5, %v2438_v37 }
 0x7aa   : > { %v2480_v40 = vmul.f32 %v2457_v31, %v4786_v63  ;;  %v2467_v28 = vmul.f32 %v3626_v18, %v2466_v27 }
 0x7ac   : > { %v2482_v32 = vadd.f32 %v2481_v30, %v2480_v40  ;;  %v2468_v47 = vadd.f32 %v3626_v18, %v2467_v28 }
 0x7ae   : > { %3629 = vtanh.f32 %v2482_v32  ;;  %2485 = vst [vmem:[#allocation5] sm:$0xff] %v2482_v32  ;;  %v2472_v7 = vsel %vm2471_vm14, %v3626_v18, %v2468_v47 }
 0x7af   : > { %v2477_v1 = vsel %vm2474_vm15, %v2476_v25, %v2472_v7 }
 0x7b4   : > { %v3630_v14 = vpop.eup %3629 }
 0x7b5   : > { %v2484_v11 = vmul.f32 %v3630_v14, %v2477_v1  ;;  %2492 = sbr.rel (%p3244_p0) target bundleno = 2405 (0x965), region = 92 }
 0x7b7   : > { %2486 = vst [vmem:[#allocation4] sm:$0xff] %v2484_v11  ;;  %v2487_v4 = vpack.c.bf16 %v2484_v11, %v2484_v11 }
 0x7b9   : > { %2488 = vst [vmem:[#allocation2 + $0x1c] sm:$0xf] %v2487_v4 }
 0x7ba   : > { %v3424_v8 = vld [vmem:[%s4850_s7 + $0x38] sm:$0xff]  ;;  %v3423_v57 = vld [vmem:[%s4850_s7 + $0x30] sm:$0xff]  ;;  %v3422_v48 = vld [vmem:[%s4850_s7 + $0x28] sm:$0xff] }
 0x7bb   : > { %2595 = vmatpush.bf16.msra.mxu0 %v3424_v8  ;;  %v3421_v55 = vld [vmem:[%s4850_s7 + $0x20] sm:$0xff]  ;;  %v3420_v23 = vld [vmem:[%s4850_s7 + $0x18] sm:$0xff]  ;;  %v3419_v2 = vld [vmem:[%s4850_s7 + $0x10] sm:$0xff] }
 0x7bc   : > { %v3418_v16 = vld [vmem:[%s4850_s7 + $0x8] sm:$0xff]  ;;  %v3417_v59 = vld [vmem:[%s4850_s7] sm:$0xff]  ;;  %v3430_v43 = vld [vmem:[#allocation11 + $0x28] sm:$0xff] }
 0x7bd   : > { %v3432_v51 = vld [vmem:[#allocation11 + $0x38] sm:$0xff]  ;;  %v3431_v53 = vld [vmem:[#allocation11 + $0x30] sm:$0xff]  ;;  %v3429_v44 = vld [vmem:[#allocation11 + $0x20] sm:$0xff] }
 0x7be   : > { %v2493_v63 = vld [vmem:[#allocation4] sm:$0xff]  ;;  %2678 = vmatpush.bf16.msra.mxu1 %v3432_v51  ;;  %v3428_v35 = vld [vmem:[#allocation11 + $0x18] sm:$0xff]  ;;  %v3426_v6 = vld [vmem:[#allocation11 + $0x8] sm:$0xff] }
 0x7bf   : > { %2494 = vadd.xlane.f32.xlu0 %v2493_v63  ;;  %v2497_v61 = vmul.f32 %v2493_v63, %v2493_v63  ;;  %2596 = vmatpush.bf16.msra.mxu0 %v3423_v57  ;;  %v3427_v26 = vld [vmem:[#allocation11 + $0x10] sm:$0xff]  ;;  %v3425_v54 = vld [vmem:[#allocation11] sm:$0xff] }
 0x7c0   : > { %v3631_v56 = vld [vmem:[%s4848_s5] ss:$0 sm:$0xff] }
 0x7c1   : > { %v3632_v10 = vld [vmem:[%s4849_s6] ss:$0 sm:$0xff] }
 0x7c2   : > { %2679 = vmatpush.bf16.msra.mxu1 %v3431_v53  ;;  %v3633_v18 = vld [vmem:[%s4851_s8] ss:$0 sm:$0xff] }
 0x7c3   : > { %2597 = vmatpush.bf16.msra.mxu0 %v3422_v48  ;;  %v3634_v20 = vld [vmem:[%s4853_s10] ss:$0 sm:$0xff] }
 0x7c6   : > { %2680 = vmatpush.bf16.msra.mxu1 %v3430_v43 }
 0x7c7   : > { %2498 = vadd.xlane.f32.xlu0 %v2497_v61  ;;  %2598 = vmatpush.bf16.msra.mxu0 %v3421_v55 }
 0x7ca   : > { %2681 = vmatpush.bf16.msra.mxu1 %v3429_v44 }
 0x7cb   : > { %2599 = vmatpush.bf16.msra.mxu0 %v3420_v23 }
 0x7ce   : > { %2682 = vmatpush.bf16.msra.mxu1 %v3428_v35 }
 0x7cf   : > { %2600 = vmatpush.bf16.msra.mxu0 %v3419_v2 }
 0x7d2   : > { %2683 = vmatpush.bf16.msra.mxu1 %v3427_v26 }
 0x7d3   : > { %2601 = vmatpush.bf16.msra.mxu0 %v3418_v16 }
 0x7d6   : > { %2684 = vmatpush.bf16.msra.mxu1 %v3426_v6 }
 0x7d7   : > { %2602 = vmatpush.bf16.msra.mxu0 %v3417_v59 }
 0x7da   : > { %2685 = vmatpush.bf16.msra.mxu1 %v3425_v54 }
 0x832   : > { %v2495_v17 = vpop.xlane.xlu0 %2494 }
 0x833   : > { %v2496_v58 = vmul.f32 0.03125, %v2495_v17 }
 0x835   : > { %v2501_v9 = vmul.f32 %v2496_v58, %v2496_v58  ;;  %v2503_v49 = vsub.f32 %v2493_v63, %v2496_v58 }
 0x83a   : > { %v2499_v60 = vpop.xlane.xlu0 %2498 }
 0x83b   : > { %v2500_v50 = vmul.f32 0.03125, %v2499_v60 }
 0x83d   : > { %v2502_v52 = vsub.f32 %v2500_v50, %v2501_v9 }
 0x83f   : > { %v2504_v42 = vadd.f32 1e-05, %v2502_v52 }
 0x841   : > { %3635 = vrsqrt.f32 %v2504_v42  ;;  %vm2511_vm1 = vweird.f32 %v2504_v42 }
 0x847   : > { %v3636_v45 = vpop.eup %3635 }
 0x848   : > { %v2506_v34 = vmul.f32 %v3636_v45, %v2504_v42  ;;  %vm2512_vm0 = vweird.f32 %v3636_v45 }
 0x849   : > { %vm2513_vm2 = vmor %vm2511_vm1, %vm2512_vm0 }
 0x84a   : > { %v2507_v36 = vmul.f32 %v3636_v45, %v2506_v34 }
 0x84c   : > { %v2508_v39 = vmul.f32 0.5, %v2507_v36 }
 0x84e   : > { %v2509_v41 = vsub.f32 1.5, %v2508_v39 }
 0x850   : > { %v2510_v46 = vmul.f32 %v3636_v45, %v2509_v41 }
 0x852   : > { %v2514_v62 = vsel %vm2513_vm2, %v3636_v45, %v2510_v46 }
 0x853   : > { %v2515_v12 = vmul.f32 %v2514_v62, %v2503_v49 }
 0x855   : > { %v2520_v13 = vmul.f32 %v3631_v56, %v2515_v12 }
 0x857   : > { %v2525_v24 = vadd.f32 %v3632_v10, %v2520_v13 }
 0x859   : > { %v2526_v33 = vpack.c.bf16 %v2525_v24, %v2525_v24 }
 0x85b   : > { %2603 = vmatmul.bf16.vlgmr.msra.gmra.mxu0 %v2526_v33 }
 0x8d8   : > { %v2604_v22 = vpop.f32.mrf.mxu0 }
 0x8d9   : > { %v2605_v15 = vadd.f32 %v3633_v18, %v2604_v22 }
 0x8db   : > { %v2608_v19 = vmax.f32 %v2605_v15, 0.0 }
 0x8dd   : > { %v2609_v3 = vpack.c.bf16 %v2608_v19, %v2608_v19 }
 0x8df   : > { %2686 = vmatmul.bf16.vlgmr.msra.gmra.mxu1 %v2609_v3 }
 0x8e0   : > { %v2606_v21 = vpop.f32.mrf.mxu0 }
 0x95c   : > { %v2687_v5 = vpop.f32.mrf.mxu1 }
 0x95d   : > { %v2688_v37 = vadd.f32 %v3634_v20, %v2687_v5 }
 0x95f   : > { %2691 = vst [vmem:[%s4854_s11] sm:$0xff] %v2688_v37 }
 0x964   : > { %v2689_v38 = vpop.f32.mrf.mxu1 }
 0x965 PF: > { %s4926_s20 = sld [smem:[#allocation17_spill]]  ;;  %s4929_s17 = smov %s3791_s18 }
 0x966   : > { %s4927_s22 = sld [smem:[#allocation16_spill]] }
 0x967   : > { %s4928_s19 = sld [smem:[#allocation18_spill]] }
 0x96b   : > { %p23_p4 = scmp.ge.s32.totalorder %s4926_s20, 4  }
 0x96c   : > { %s4930_s18 = smov %s4927_s22 }
 0x96d   :  { %25 = sbr.rel (!%p23_p4) target bundleno = 9 (0x9), region = 135 }
 0x972   :  { %2703 = vsyncpa [#allocation7], 1 }
 0x973   :  { %2705 = vsyncpa [#allocation7 + $0x1], 1 }
 0x974   :  { %2706 = vsyncpa [#allocation9], 1 }
 0x975   :  { %2708 = vsyncpa [#allocation9 + $0x1], 1 }
 0x976   :  { %2709 = vsyncpa [#allocation12], 1 }

</bundles_post_ra>
